<compile_context>
chip_gen: v6e
topology: v6e:2x2x1
jax: 0.10.0
libtpu: 0.0.40
codegen_flags: <defaults>
</compile_context>

<pallas_src>
import functools

import jax
import jax.numpy as jnp
from jax.experimental import pallas as pl
from jax.experimental.pallas import tpu as pltpu


def _sts_attention_kernel(h_ref, w_all_ref, wo_t_ref, bo_t_ref, out_ref, qkv_s,
                          *, heads, dim_head, time_window, seq_c, s_pad,
                          clips_per_step, matmul_dtype):
    tw = time_window
    inner = heads * dim_head
    cdt = matmul_dtype

    w_all = w_all_ref[...].astype(cdt)     # (3*inner, qd); Wq block pre-scaled
    wo_t = wo_t_ref[...].astype(cdt)       # (qd, inner)
    bo_t = bo_t_ref[...]                   # (qd, 1), f32
    third = jnp.float32(1.0 / 3.0)

    # Padded spatial *key* positions (>= seq_c) masked out of the softmax.
    key_valid = jax.lax.broadcasted_iota(jnp.int32, (s_pad, s_pad), 1) < seq_c
    neg_big = jnp.float32(-1e30)

    for c in range(clips_per_step):
        # Fused Q|K|V projection: one (3*inner, qd) @ (qd, tw*s_pad) MXU matmul
        # per clip, lane-dense result staged in VMEM scratch.
        qkv_s[c] = jnp.dot(w_all, h_ref[c].astype(cdt),
                           preferred_element_type=jnp.float32)

        for f in range(tw):
            lo = f * s_pad
            lo_prev = max(f - 1, 0) * s_pad

            q_f = qkv_s[c, 0:inner, lo:lo + s_pad]            # (inner, s_pad)

            # Temporal smoothing of K/V post-projection (as in the module):
            #   kv_f <- (kv_f + kv_0 + kv_{max(f-1,0)}) / 3
            if f == 0:
                kv_f = qkv_s[c, inner:3 * inner, 0:s_pad]     # (k0+k0+k0)/3 = k0
            else:
                kv_f = (qkv_s[c, inner:3 * inner, lo:lo + s_pad]
                        + qkv_s[c, inner:3 * inner, 0:s_pad]
                        + qkv_s[c, inner:3 * inner, lo_prev:lo_prev + s_pad]
                        ) * third                             # (2*inner, s_pad)

            o_heads = []
            for hh in range(heads):
                d0 = hh * dim_head
                q_h = q_f[d0:d0 + dim_head, :].astype(cdt)            # (dh, S)
                k_h = kv_f[d0:d0 + dim_head, :].astype(cdt)           # (dh, S)
                v_h = kv_f[inner + d0:inner + d0 + dim_head, :].astype(cdt)

                # scores[i, j] = sum_d q[d, i] * k[d, j]  (scale folded in Wq)
                scores = jax.lax.dot_general(
                    q_h, k_h, (((0,), (0,)), ((), ())),
                    preferred_element_type=jnp.float32)               # (S, S)
                scores = jnp.where(key_valid, scores, neg_big)

                m = jnp.max(scores, axis=-1, keepdims=True)
                p = jnp.exp(scores - m)
                denom = jnp.sum(p, axis=-1, keepdims=True)
                p = p * pl.reciprocal(denom, approx=True)             # softmax

                # o[d, i] = sum_j v[d, j] * p[i, j]
                o_heads.append(jax.lax.dot_general(
                    v_h, p.astype(cdt), (((1,), (1,)), ((), ())),
                    preferred_element_type=jnp.float32))              # (dh, S)

            # Merge heads along sublanes (aligned) and do ONE output-proj dot.
            o_all = jnp.concatenate(o_heads, axis=0).astype(cdt)  # (inner, S)
            out_f = jnp.dot(wo_t, o_all,
                            preferred_element_type=jnp.float32) + bo_t
            out_ref[c, :, lo:lo + s_pad] = out_f.astype(out_ref.dtype)


def _pick_clips_per_step(B, target=8):
    """Largest divisor of B <= target; prefer >=2 grid steps (v7x megacore)."""
    divisors = [d for d in range(1, B + 1) if B % d == 0 and d <= target]
    multi = [d for d in divisors if B // d >= 2]
    return max(multi) if multi else max(divisors)


def sts_attention_pallas(x, params, *, heads, dim_head, time_window, seq_c=62,
                         matmul_dtype=jnp.float32, clips_per_step=None):
    """x: (B, N=time_window, seq_c * query_dim) float32."""
    B, N, CD = x.shape
    assert N == time_window, "sequence axis must equal time_window"
    qd = CD // seq_c
    assert seq_c * qd == CD
    inner = heads * dim_head
    tw = time_window
    scale = float(dim_head) ** (-0.5)

    wq, wk, wv, wo, bo = params            # (qd,inner)x3, (inner,qd), (1,qd)

    # Fused, pre-transposed projection weight (Q pre-scaled); transposed
    # output weight / bias for the lane-dense layout.
    w_all_t = jnp.concatenate([wq * scale, wk, wv], axis=1).T   # (3*inner, qd)
    wo_t = wo.T                                                 # (qd, inner)
    bo_t = bo.reshape(qd, 1)                                    # (qd, 1)

    s_pad = ((seq_c + 7) // 8) * 8
    rows_pc = tw * s_pad                   # rows (lanes) per clip

    # Single wrapper pass: split (c d), zero-pad spatial, put the feature dim
    # on sublanes and flatten (frame, spatial) onto the lane axis.
    h = x.reshape(B, tw, seq_c, qd)
    h = jnp.pad(h, ((0, 0), (0, 0), (0, s_pad - seq_c), (0, 0)))
    h = h.transpose(0, 3, 1, 2).reshape(B, qd, rows_pc)         # (B, qd, 320)

    if clips_per_step is None:
        clips_per_step = _pick_clips_per_step(B)
    assert B % clips_per_step == 0, "clips_per_step must divide B"
    grid = (B // clips_per_step,)

    kernel = functools.partial(
        _sts_attention_kernel,
        heads=heads, dim_head=dim_head, time_window=tw, seq_c=seq_c,
        s_pad=s_pad, clips_per_step=clips_per_step, matmul_dtype=matmul_dtype)

    out_t = pl.pallas_call(
        kernel,
        out_shape=jax.ShapeDtypeStruct((B, qd, rows_pc), x.dtype),
        grid_spec=pltpu.PrefetchScalarGridSpec(
            num_scalar_prefetch=0,
            grid=grid,
            in_specs=[
                pl.BlockSpec((clips_per_step, qd, rows_pc),
                             lambda b: (b, 0, 0)),                   # h (T)
                pl.BlockSpec((3 * inner, qd), lambda b: (0, 0)),     # [Wq|Wk|Wv]^T
                pl.BlockSpec((qd, inner), lambda b: (0, 0)),         # Wo^T
                pl.BlockSpec((qd, 1), lambda b: (0, 0)),             # bo^T
            ],
            out_specs=pl.BlockSpec((clips_per_step, qd, rows_pc),
                                   lambda b: (b, 0, 0)),
            scratch_shapes=[pltpu.VMEM((clips_per_step, 3 * inner, rows_pc),
                                       jnp.float32)],
        ),
        compiler_params=pltpu.CompilerParams(
            dimension_semantics=("parallel",)),
    )(h, w_all_t, wo_t, bo_t)

    # Undo the transposed layout; drop the spatial padding.
    out = out_t.reshape(B, qd, tw, s_pad).transpose(0, 2, 3, 1)  # (B,tw,64,qd)
    out = out[:, :, :seq_c, :].reshape(B, tw, seq_c * qd)
    return out


def sts_attention_reference(x, params, *, heads, dim_head, time_window, seq_c=62):
    """Pure-JAX reference mirroring the PyTorch forward."""
    B, N, CD = x.shape
    qd = CD // seq_c
    wq, wk, wv, wo, bo = params
    scale = float(dim_head) ** (-0.5)

    h = x.reshape(B * N, seq_c, qd)
    q = h @ wq
    k = h @ wk
    v = h @ wv

    tw = time_window
    former = jnp.maximum(jnp.arange(tw) - 1, 0)
    first = jnp.zeros((tw,), jnp.int32)

    def smooth(t):
        t = t.reshape(B, tw, seq_c, heads * dim_head)
        t = (t + t[:, first] + t[:, former]) / 3.0
        return t.reshape(B * tw, seq_c, heads * dim_head)

    k = smooth(k)
    v = smooth(v)

    def to_heads(t):
        bs, s, d = t.shape
        return t.reshape(bs, s, heads, d // heads).transpose(0, 2, 1, 3) \
                .reshape(bs * heads, s, d // heads)

    qh, kh, vh = to_heads(q), to_heads(k), to_heads(v)
    scores = scale * jnp.einsum('bqd,bkd->bqk', qh, kh)
    probs = jax.nn.softmax(scores, axis=-1)
    out = jnp.einsum('bqk,bkd->bqd', probs, vh)
    bs, s, d = out.shape
    out = out.reshape(bs // heads, heads, s, d).transpose(0, 2, 1, 3) \
             .reshape(bs // heads, s, d * heads)
    out = out @ wo + bo
    return out.reshape(B, N, seq_c * qd)


if __name__ == "__main__":
    # Small, module-consistent shapes.
    B = 2
    time_window = 5          # N (sequence axis) must equal time_window
    query_dim = 16
    heads = 2
    dim_head = 8
    inner_dim = heads * dim_head
    seq_c = 62               # hard-coded c=62 in the module's rearrange

    key = jax.random.PRNGKey(0)
    kx, k1, k2, k3, k4, k5 = jax.random.split(key, 6)

    x = jax.random.normal(kx, (B, time_window, seq_c * query_dim), jnp.float32)

    # Deterministic parameter init (weights stored as (in_dim, out_dim)).
    s_in = 1.0 / jnp.sqrt(query_dim)
    s_inner = 1.0 / jnp.sqrt(inner_dim)
    wq = jax.random.normal(k1, (query_dim, inner_dim), jnp.float32) * s_in
    wk = jax.random.normal(k2, (query_dim, inner_dim), jnp.float32) * s_in
    wv = jax.random.normal(k3, (query_dim, inner_dim), jnp.float32) * s_in
    wo = jax.random.normal(k4, (inner_dim, query_dim), jnp.float32) * s_inner
    bo = jax.random.normal(k5, (1, query_dim), jnp.float32) * 0.01
    params = (wq, wk, wv, wo, bo)

    out = sts_attention_pallas(x, params, heads=heads, dim_head=dim_head,
                               time_window=time_window, seq_c=seq_c)
    out = jax.block_until_ready(out)

    ref = sts_attention_reference(x, params, heads=heads, dim_head=dim_head,
                                  time_window=time_window, seq_c=seq_c)
    assert out.shape == (B, time_window, seq_c * query_dim)
    # Tolerance covers the approximate (EUP) reciprocal in the softmax and the
    # scale-folded / fused-weight float re-association.
    err = jnp.max(jnp.abs(out - ref))
    assert jnp.allclose(out, ref, atol=5e-3, rtol=5e-3), f"max abs err = {err}"

    print("KERNEL_OK")
</pallas_src>

<mosaic_0001>
module attributes {stable_mosaic.version = 11 : i64} {
  func.func @_sts_attention_kernel(%arg0: i32, %arg1: memref<1x16x320xf32, #tpu.memory_space<vmem>>, %arg2: memref<48x16xf32, #tpu.memory_space<vmem>>, %arg3: memref<16x16xf32, #tpu.memory_space<vmem>>, %arg4: memref<16x1xf32, #tpu.memory_space<vmem>>, %arg5: memref<1x16x320xf32, #tpu.memory_space<vmem>>, %arg6: memref<1x48x320xf32, #tpu.memory_space<vmem>>) attributes {dimension_semantics = [#tpu.dimension_semantics<parallel>], iteration_bounds = array<i64: 2>, scalar_prefetch = 0 : i64, scratch_operands = 1 : i64, tpu.core_type = #tpu.core_type<tc>, window_params = [{transform_indices = @transform_0, window_bounds = array<i64: 1, 16, 320>}, {pipeline_mode = #tpu.pipeline_mode<synchronous>, transform_indices = @transform_1, window_bounds = array<i64: 48, 16>}, {pipeline_mode = #tpu.pipeline_mode<synchronous>, transform_indices = @transform_2, window_bounds = array<i64: 16, 16>}, {pipeline_mode = #tpu.pipeline_mode<synchronous>, transform_indices = @transform_3, window_bounds = array<i64: 16, 1>}, {transform_indices = @transform_4, window_bounds = array<i64: 1, 16, 320>}]} {
    %c0 = arith.constant 0 : index
    %c0_0 = arith.constant 0 : index
    %0 = vector.load %arg2[%c0, %c0_0] : memref<48x16xf32, #tpu.memory_space<vmem>>, vector<48x16xf32>
    %c0_1 = arith.constant 0 : index
    %c0_2 = arith.constant 0 : index
    %1 = vector.load %arg3[%c0_1, %c0_2] : memref<16x16xf32, #tpu.memory_space<vmem>>, vector<16x16xf32>
    %c0_3 = arith.constant 0 : index
    %c0_4 = arith.constant 0 : index
    %2 = vector.load %arg4[%c0_3, %c0_4] : memref<16x1xf32, #tpu.memory_space<vmem>>, vector<16x1xf32>
    %3 = tpu.iota {dimensions = array<i32: 1>} : vector<64x64xi32>
    %c62_i32 = arith.constant 62 : i32
    %4 = vector.broadcast %c62_i32 : i32 to vector<64x64xi32>
    %5 = arith.cmpi slt, %3, %4 : vector<64x64xi32>
    %c0_5 = arith.constant 0 : index
    %c0_6 = arith.constant 0 : index
    %c0_7 = arith.constant 0 : index
    %6 = vector.load %arg1[%c0_5, %c0_6, %c0_7] : memref<1x16x320xf32, #tpu.memory_space<vmem>>, vector<1x16x320xf32>
    %7 = vector.shape_cast %6 : vector<1x16x320xf32> to vector<16x320xf32>
    %cst = arith.constant dense<0.000000e+00> : vector<48x320xf32>
    %8 = tpu.matmul %0, %7, %cst {dimension_numbers = #tpu.dot_dimension_numbers<[1], [0], [0], [1], [0, 0, 1, 1], [], []>} : vector<48x16xf32>, vector<16x320xf32>, vector<48x320xf32> -> vector<48x320xf32>
    %c0_8 = arith.constant 0 : index
    %c0_9 = arith.constant 0 : index
    %c0_10 = arith.constant 0 : index
    %9 = vector.load %arg6[%c0_8, %c0_9, %c0_10] : memref<1x48x320xf32, #tpu.memory_space<vmem>>, vector<1x48x320xf32>
    %10 = vector.shape_cast %9 : vector<1x48x320xf32> to vector<48x320xf32>
    %11 = vector.shape_cast %8 : vector<48x320xf32> to vector<1x48x320xf32>
    tpu.vector_store %arg6[%c0_8, %c0_9, %c0_10], %11 {strides = array<i32>} : memref<1x48x320xf32, #tpu.memory_space<vmem>>, vector<1x48x320xf32>,
    %c0_11 = arith.constant 0 : index
    %c0_12 = arith.constant 0 : index
    %c0_13 = arith.constant 0 : index
    %12 = vector.load %arg6[%c0_11, %c0_12, %c0_13] : memref<1x48x320xf32, #tpu.memory_space<vmem>>, vector<1x16x64xf32>
    %13 = vector.shape_cast %12 : vector<1x16x64xf32> to vector<16x64xf32>
    %c0_14 = arith.constant 0 : index
    %c16 = arith.constant 16 : index
    %c0_15 = arith.constant 0 : index
    %14 = vector.load %arg6[%c0_14, %c16, %c0_15] : memref<1x48x320xf32, #tpu.memory_space<vmem>>, vector<1x32x64xf32>
    %15 = vector.shape_cast %14 : vector<1x32x64xf32> to vector<32x64xf32>
    %16 = vector.extract_strided_slice %13 {offsets = [0, 0], sizes = [8, 64], strides = [1, 1]} : vector<16x64xf32> to vector<8x64xf32>
    %17 = vector.extract_strided_slice %15 {offsets = [0, 0], sizes = [8, 64], strides = [1, 1]} : vector<32x64xf32> to vector<8x64xf32>
    %18 = vector.extract_strided_slice %15 {offsets = [16, 0], sizes = [8, 64], strides = [1, 1]} : vector<32x64xf32> to vector<8x64xf32>
    %cst_16 = arith.constant dense<0.000000e+00> : vector<64x64xf32>
    %19 = tpu.matmul %16, %17, %cst_16 {dimension_numbers = #tpu.dot_dimension_numbers<[0], [0], [1], [1], [0, 1, 1, 1], [], []>} : vector<8x64xf32>, vector<8x64xf32>, vector<64x64xf32> -> vector<64x64xf32>
    %cst_17 = arith.constant -1.000000e+30 : f32
    %20 = vector.broadcast %cst_17 : f32 to vector<64x64xf32>
    %21 = arith.select %5, %19, %20 : vector<64x64xi1>, vector<64x64xf32>
    %cst_18 = arith.constant dense<0xFF800000> : vector<64xf32>
    %22 = vector.multi_reduction <maximumf>, %21, %cst_18 [1] : vector<64x64xf32> to vector<64xf32>
    %23 = vector.shape_cast %22 : vector<64xf32> to vector<64x1xf32>
    %24 = vector.broadcast %23 : vector<64x1xf32> to vector<64x64xf32>
    %25 = arith.subf %21, %24 : vector<64x64xf32>
    %26 = math.exp %25 : vector<64x64xf32>
    %cst_19 = arith.constant dense<0.000000e+00> : vector<64xf32>
    %27 = vector.multi_reduction <add>, %26, %cst_19 [1] : vector<64x64xf32> to vector<64xf32>
    %28 = vector.shape_cast %27 : vector<64xf32> to vector<64x1xf32>
    %29 = tpu.reciprocal %28 {approx = true} : vector<64x1xf32> -> vector<64x1xf32>
    %30 = vector.broadcast %29 : vector<64x1xf32> to vector<64x64xf32>
    %31 = arith.mulf %26, %30 : vector<64x64xf32>
    %cst_20 = arith.constant dense<0.000000e+00> : vector<8x64xf32>
    %32 = tpu.matmul %18, %31, %cst_20 {dimension_numbers = #tpu.dot_dimension_numbers<[1], [1], [0], [0], [0, 0, 1, 0], [], []>} : vector<8x64xf32>, vector<64x64xf32>, vector<8x64xf32> -> vector<8x64xf32>
    %33 = vector.extract_strided_slice %13 {offsets = [8, 0], sizes = [8, 64], strides = [1, 1]} : vector<16x64xf32> to vector<8x64xf32>
    %34 = vector.extract_strided_slice %15 {offsets = [8, 0], sizes = [8, 64], strides = [1, 1]} : vector<32x64xf32> to vector<8x64xf32>
    %35 = vector.extract_strided_slice %15 {offsets = [24, 0], sizes = [8, 64], strides = [1, 1]} : vector<32x64xf32> to vector<8x64xf32>
    %cst_21 = arith.constant dense<0.000000e+00> : vector<64x64xf32>
    %36 = tpu.matmul %33, %34, %cst_21 {dimension_numbers = #tpu.dot_dimension_numbers<[0], [0], [1], [1], [0, 1, 1, 1], [], []>} : vector<8x64xf32>, vector<8x64xf32>, vector<64x64xf32> -> vector<64x64xf32>
    %cst_22 = arith.constant -1.000000e+30 : f32
    %37 = vector.broadcast %cst_22 : f32 to vector<64x64xf32>
    %38 = arith.select %5, %36, %37 : vector<64x64xi1>, vector<64x64xf32>
    %cst_23 = arith.constant dense<0xFF800000> : vector<64xf32>
    %39 = vector.multi_reduction <maximumf>, %38, %cst_23 [1] : vector<64x64xf32> to vector<64xf32>
    %40 = vector.shape_cast %39 : vector<64xf32> to vector<64x1xf32>
    %41 = vector.broadcast %40 : vector<64x1xf32> to vector<64x64xf32>
    %42 = arith.subf %38, %41 : vector<64x64xf32>
    %43 = math.exp %42 : vector<64x64xf32>
    %cst_24 = arith.constant dense<0.000000e+00> : vector<64xf32>
    %44 = vector.multi_reduction <add>, %43, %cst_24 [1] : vector<64x64xf32> to vector<64xf32>
    %45 = vector.shape_cast %44 : vector<64xf32> to vector<64x1xf32>
    %46 = tpu.reciprocal %45 {approx = true} : vector<64x1xf32> -> vector<64x1xf32>
    %47 = vector.broadcast %46 : vector<64x1xf32> to vector<64x64xf32>
    %48 = arith.mulf %43, %47 : vector<64x64xf32>
    %cst_25 = arith.constant dense<0.000000e+00> : vector<8x64xf32>
    %49 = tpu.matmul %35, %48, %cst_25 {dimension_numbers = #tpu.dot_dimension_numbers<[1], [1], [0], [0], [0, 0, 1, 0], [], []>} : vector<8x64xf32>, vector<64x64xf32>, vector<8x64xf32> -> vector<8x64xf32>
    %50 = tpu.concatenate %32, %49 in 0 : vector<8x64xf32>, vector<8x64xf32> -> vector<16x64xf32>
    %cst_26 = arith.constant dense<0.000000e+00> : vector<16x64xf32>
    %51 = tpu.matmul %1, %50, %cst_26 {dimension_numbers = #tpu.dot_dimension_numbers<[1], [0], [0], [1], [0, 0, 1, 1], [], []>} : vector<16x16xf32>, vector<16x64xf32>, vector<16x64xf32> -> vector<16x64xf32>
    %52 = vector.broadcast %2 : vector<16x1xf32> to vector<16x64xf32>
    %53 = arith.addf %51, %52 : vector<16x64xf32>
    %c0_27 = arith.constant 0 : index
    %c0_28 = arith.constant 0 : index
    %c0_29 = arith.constant 0 : index
    %54 = vector.load %arg5[%c0_27, %c0_28, %c0_29] : memref<1x16x320xf32, #tpu.memory_space<vmem>>, vector<1x16x64xf32>
    %55 = vector.shape_cast %54 : vector<1x16x64xf32> to vector<16x64xf32>
    %56 = vector.shape_cast %53 : vector<16x64xf32> to vector<1x16x64xf32>
    tpu.vector_store %arg5[%c0_27, %c0_28, %c0_29], %56 {strides = array<i32>} : memref<1x16x320xf32, #tpu.memory_space<vmem>>, vector<1x16x64xf32>,
    %c0_30 = arith.constant 0 : index
    %c0_31 = arith.constant 0 : index
    %c64 = arith.constant 64 : index
    %57 = vector.load %arg6[%c0_30, %c0_31, %c64] : memref<1x48x320xf32, #tpu.memory_space<vmem>>, vector<1x16x64xf32>
    %58 = vector.shape_cast %57 : vector<1x16x64xf32> to vector<16x64xf32>
    %c0_32 = arith.constant 0 : index
    %c16_33 = arith.constant 16 : index
    %c64_34 = arith.constant 64 : index
    %59 = vector.load %arg6[%c0_32, %c16_33, %c64_34] : memref<1x48x320xf32, #tpu.memory_space<vmem>>, vector<1x32x64xf32>
    %60 = vector.shape_cast %59 : vector<1x32x64xf32> to vector<32x64xf32>
    %c0_35 = arith.constant 0 : index
    %c16_36 = arith.constant 16 : index
    %c0_37 = arith.constant 0 : index
    %61 = vector.load %arg6[%c0_35, %c16_36, %c0_37] : memref<1x48x320xf32, #tpu.memory_space<vmem>>, vector<1x32x64xf32>
    %62 = vector.shape_cast %61 : vector<1x32x64xf32> to vector<32x64xf32>
    %63 = arith.addf %60, %62 : vector<32x64xf32>
    %c0_38 = arith.constant 0 : index
    %c16_39 = arith.constant 16 : index
    %c0_40 = arith.constant 0 : index
    %64 = vector.load %arg6[%c0_38, %c16_39, %c0_40] : memref<1x48x320xf32, #tpu.memory_space<vmem>>, vector<1x32x64xf32>
    %65 = vector.shape_cast %64 : vector<1x32x64xf32> to vector<32x64xf32>
    %66 = arith.addf %63, %65 : vector<32x64xf32>
    %cst_41 = arith.constant 0.333333343 : f32
    %67 = vector.broadcast %cst_41 : f32 to vector<32x64xf32>
    %68 = arith.mulf %66, %67 : vector<32x64xf32>
    %69 = vector.extract_strided_slice %58 {offsets = [0, 0], sizes = [8, 64], strides = [1, 1]} : vector<16x64xf32> to vector<8x64xf32>
    %70 = vector.extract_strided_slice %68 {offsets = [0, 0], sizes = [8, 64], strides = [1, 1]} : vector<32x64xf32> to vector<8x64xf32>
    %71 = vector.extract_strided_slice %68 {offsets = [16, 0], sizes = [8, 64], strides = [1, 1]} : vector<32x64xf32> to vector<8x64xf32>
    %cst_42 = arith.constant dense<0.000000e+00> : vector<64x64xf32>
    %72 = tpu.matmul %69, %70, %cst_42 {dimension_numbers = #tpu.dot_dimension_numbers<[0], [0], [1], [1], [0, 1, 1, 1], [], []>} : vector<8x64xf32>, vector<8x64xf32>, vector<64x64xf32> -> vector<64x64xf32>
    %cst_43 = arith.constant -1.000000e+30 : f32
    %73 = vector.broadcast %cst_43 : f32 to vector<64x64xf32>
    %74 = arith.select %5, %72, %73 : vector<64x64xi1>, vector<64x64xf32>
    %cst_44 = arith.constant dense<0xFF800000> : vector<64xf32>
    %75 = vector.multi_reduction <maximumf>, %74, %cst_44 [1] : vector<64x64xf32> to vector<64xf32>
    %76 = vector.shape_cast %75 : vector<64xf32> to vector<64x1xf32>
    %77 = vector.broadcast %76 : vector<64x1xf32> to vector<64x64xf32>
    %78 = arith.subf %74, %77 : vector<64x64xf32>
    %79 = math.exp %78 : vector<64x64xf32>
    %cst_45 = arith.constant dense<0.000000e+00> : vector<64xf32>
    %80 = vector.multi_reduction <add>, %79, %cst_45 [1] : vector<64x64xf32> to vector<64xf32>
    %81 = vector.shape_cast %80 : vector<64xf32> to vector<64x1xf32>
    %82 = tpu.reciprocal %81 {approx = true} : vector<64x1xf32> -> vector<64x1xf32>
    %83 = vector.broadcast %82 : vector<64x1xf32> to vector<64x64xf32>
    %84 = arith.mulf %79, %83 : vector<64x64xf32>
    %cst_46 = arith.constant dense<0.000000e+00> : vector<8x64xf32>
    %85 = tpu.matmul %71, %84, %cst_46 {dimension_numbers = #tpu.dot_dimension_numbers<[1], [1], [0], [0], [0, 0, 1, 0], [], []>} : vector<8x64xf32>, vector<64x64xf32>, vector<8x64xf32> -> vector<8x64xf32>
    %86 = vector.extract_strided_slice %58 {offsets = [8, 0], sizes = [8, 64], strides = [1, 1]} : vector<16x64xf32> to vector<8x64xf32>
    %87 = vector.extract_strided_slice %68 {offsets = [8, 0], sizes = [8, 64], strides = [1, 1]} : vector<32x64xf32> to vector<8x64xf32>
    %88 = vector.extract_strided_slice %68 {offsets = [24, 0], sizes = [8, 64], strides = [1, 1]} : vector<32x64xf32> to vector<8x64xf32>
    %cst_47 = arith.constant dense<0.000000e+00> : vector<64x64xf32>
    %89 = tpu.matmul %86, %87, %cst_47 {dimension_numbers = #tpu.dot_dimension_numbers<[0], [0], [1], [1], [0, 1, 1, 1], [], []>} : vector<8x64xf32>, vector<8x64xf32>, vector<64x64xf32> -> vector<64x64xf32>
    %cst_48 = arith.constant -1.000000e+30 : f32
    %90 = vector.broadcast %cst_48 : f32 to vector<64x64xf32>
    %91 = arith.select %5, %89, %90 : vector<64x64xi1>, vector<64x64xf32>
    %cst_49 = arith.constant dense<0xFF800000> : vector<64xf32>
    %92 = vector.multi_reduction <maximumf>, %91, %cst_49 [1] : vector<64x64xf32> to vector<64xf32>
    %93 = vector.shape_cast %92 : vector<64xf32> to vector<64x1xf32>
    %94 = vector.broadcast %93 : vector<64x1xf32> to vector<64x64xf32>
    %95 = arith.subf %91, %94 : vector<64x64xf32>
    %96 = math.exp %95 : vector<64x64xf32>
    %cst_50 = arith.constant dense<0.000000e+00> : vector<64xf32>
    %97 = vector.multi_reduction <add>, %96, %cst_50 [1] : vector<64x64xf32> to vector<64xf32>
    %98 = vector.shape_cast %97 : vector<64xf32> to vector<64x1xf32>
    %99 = tpu.reciprocal %98 {approx = true} : vector<64x1xf32> -> vector<64x1xf32>
    %100 = vector.broadcast %99 : vector<64x1xf32> to vector<64x64xf32>
    %101 = arith.mulf %96, %100 : vector<64x64xf32>
    %cst_51 = arith.constant dense<0.000000e+00> : vector<8x64xf32>
    %102 = tpu.matmul %88, %101, %cst_51 {dimension_numbers = #tpu.dot_dimension_numbers<[1], [1], [0], [0], [0, 0, 1, 0], [], []>} : vector<8x64xf32>, vector<64x64xf32>, vector<8x64xf32> -> vector<8x64xf32>
    %103 = tpu.concatenate %85, %102 in 0 : vector<8x64xf32>, vector<8x64xf32> -> vector<16x64xf32>
    %cst_52 = arith.constant dense<0.000000e+00> : vector<16x64xf32>
    %104 = tpu.matmul %1, %103, %cst_52 {dimension_numbers = #tpu.dot_dimension_numbers<[1], [0], [0], [1], [0, 0, 1, 1], [], []>} : vector<16x16xf32>, vector<16x64xf32>, vector<16x64xf32> -> vector<16x64xf32>
    %105 = vector.broadcast %2 : vector<16x1xf32> to vector<16x64xf32>
    %106 = arith.addf %104, %105 : vector<16x64xf32>
    %c0_53 = arith.constant 0 : index
    %c0_54 = arith.constant 0 : index
    %c64_55 = arith.constant 64 : index
    %107 = vector.load %arg5[%c0_53, %c0_54, %c64_55] : memref<1x16x320xf32, #tpu.memory_space<vmem>>, vector<1x16x64xf32>
    %108 = vector.shape_cast %107 : vector<1x16x64xf32> to vector<16x64xf32>
    %109 = vector.shape_cast %106 : vector<16x64xf32> to vector<1x16x64xf32>
    tpu.vector_store %arg5[%c0_53, %c0_54, %c64_55], %109 {strides = array<i32>} : memref<1x16x320xf32, #tpu.memory_space<vmem>>, vector<1x16x64xf32>,
    %c0_56 = arith.constant 0 : index
    %c0_57 = arith.constant 0 : index
    %c128 = arith.constant 128 : index
    %110 = vector.load %arg6[%c0_56, %c0_57, %c128] : memref<1x48x320xf32, #tpu.memory_space<vmem>>, vector<1x16x64xf32>
    %111 = vector.shape_cast %110 : vector<1x16x64xf32> to vector<16x64xf32>
    %c0_58 = arith.constant 0 : index
    %c16_59 = arith.constant 16 : index
    %c128_60 = arith.constant 128 : index
    %112 = vector.load %arg6[%c0_58, %c16_59, %c128_60] : memref<1x48x320xf32, #tpu.memory_space<vmem>>, vector<1x32x64xf32>
    %113 = vector.shape_cast %112 : vector<1x32x64xf32> to vector<32x64xf32>
    %c0_61 = arith.constant 0 : index
    %c16_62 = arith.constant 16 : index
    %c0_63 = arith.constant 0 : index
    %114 = vector.load %arg6[%c0_61, %c16_62, %c0_63] : memref<1x48x320xf32, #tpu.memory_space<vmem>>, vector<1x32x64xf32>
    %115 = vector.shape_cast %114 : vector<1x32x64xf32> to vector<32x64xf32>
    %116 = arith.addf %113, %115 : vector<32x64xf32>
    %c0_64 = arith.constant 0 : index
    %c16_65 = arith.constant 16 : index
    %c64_66 = arith.constant 64 : index
    %117 = vector.load %arg6[%c0_64, %c16_65, %c64_66] : memref<1x48x320xf32, #tpu.memory_space<vmem>>, vector<1x32x64xf32>
    %118 = vector.shape_cast %117 : vector<1x32x64xf32> to vector<32x64xf32>
    %119 = arith.addf %116, %118 : vector<32x64xf32>
    %cst_67 = arith.constant 0.333333343 : f32
    %120 = vector.broadcast %cst_67 : f32 to vector<32x64xf32>
    %121 = arith.mulf %119, %120 : vector<32x64xf32>
    %122 = vector.extract_strided_slice %111 {offsets = [0, 0], sizes = [8, 64], strides = [1, 1]} : vector<16x64xf32> to vector<8x64xf32>
    %123 = vector.extract_strided_slice %121 {offsets = [0, 0], sizes = [8, 64], strides = [1, 1]} : vector<32x64xf32> to vector<8x64xf32>
    %124 = vector.extract_strided_slice %121 {offsets = [16, 0], sizes = [8, 64], strides = [1, 1]} : vector<32x64xf32> to vector<8x64xf32>
    %cst_68 = arith.constant dense<0.000000e+00> : vector<64x64xf32>
    %125 = tpu.matmul %122, %123, %cst_68 {dimension_numbers = #tpu.dot_dimension_numbers<[0], [0], [1], [1], [0, 1, 1, 1], [], []>} : vector<8x64xf32>, vector<8x64xf32>, vector<64x64xf32> -> vector<64x64xf32>
    %cst_69 = arith.constant -1.000000e+30 : f32
    %126 = vector.broadcast %cst_69 : f32 to vector<64x64xf32>
    %127 = arith.select %5, %125, %126 : vector<64x64xi1>, vector<64x64xf32>
    %cst_70 = arith.constant dense<0xFF800000> : vector<64xf32>
    %128 = vector.multi_reduction <maximumf>, %127, %cst_70 [1] : vector<64x64xf32> to vector<64xf32>
    %129 = vector.shape_cast %128 : vector<64xf32> to vector<64x1xf32>
    %130 = vector.broadcast %129 : vector<64x1xf32> to vector<64x64xf32>
    %131 = arith.subf %127, %130 : vector<64x64xf32>
    %132 = math.exp %131 : vector<64x64xf32>
    %cst_71 = arith.constant dense<0.000000e+00> : vector<64xf32>
    %133 = vector.multi_reduction <add>, %132, %cst_71 [1] : vector<64x64xf32> to vector<64xf32>
    %134 = vector.shape_cast %133 : vector<64xf32> to vector<64x1xf32>
    %135 = tpu.reciprocal %134 {approx = true} : vector<64x1xf32> -> vector<64x1xf32>
    %136 = vector.broadcast %135 : vector<64x1xf32> to vector<64x64xf32>
    %137 = arith.mulf %132, %136 : vector<64x64xf32>
    %cst_72 = arith.constant dense<0.000000e+00> : vector<8x64xf32>
    %138 = tpu.matmul %124, %137, %cst_72 {dimension_numbers = #tpu.dot_dimension_numbers<[1], [1], [0], [0], [0, 0, 1, 0], [], []>} : vector<8x64xf32>, vector<64x64xf32>, vector<8x64xf32> -> vector<8x64xf32>
    %139 = vector.extract_strided_slice %111 {offsets = [8, 0], sizes = [8, 64], strides = [1, 1]} : vector<16x64xf32> to vector<8x64xf32>
    %140 = vector.extract_strided_slice %121 {offsets = [8, 0], sizes = [8, 64], strides = [1, 1]} : vector<32x64xf32> to vector<8x64xf32>
    %141 = vector.extract_strided_slice %121 {offsets = [24, 0], sizes = [8, 64], strides = [1, 1]} : vector<32x64xf32> to vector<8x64xf32>
    %cst_73 = arith.constant dense<0.000000e+00> : vector<64x64xf32>
    %142 = tpu.matmul %139, %140, %cst_73 {dimension_numbers = #tpu.dot_dimension_numbers<[0], [0], [1], [1], [0, 1, 1, 1], [], []>} : vector<8x64xf32>, vector<8x64xf32>, vector<64x64xf32> -> vector<64x64xf32>
    %cst_74 = arith.constant -1.000000e+30 : f32
    %143 = vector.broadcast %cst_74 : f32 to vector<64x64xf32>
    %144 = arith.select %5, %142, %143 : vector<64x64xi1>, vector<64x64xf32>
    %cst_75 = arith.constant dense<0xFF800000> : vector<64xf32>
    %145 = vector.multi_reduction <maximumf>, %144, %cst_75 [1] : vector<64x64xf32> to vector<64xf32>
    %146 = vector.shape_cast %145 : vector<64xf32> to vector<64x1xf32>
    %147 = vector.broadcast %146 : vector<64x1xf32> to vector<64x64xf32>
    %148 = arith.subf %144, %147 : vector<64x64xf32>
    %149 = math.exp %148 : vector<64x64xf32>
    %cst_76 = arith.constant dense<0.000000e+00> : vector<64xf32>
    %150 = vector.multi_reduction <add>, %149, %cst_76 [1] : vector<64x64xf32> to vector<64xf32>
    %151 = vector.shape_cast %150 : vector<64xf32> to vector<64x1xf32>
    %152 = tpu.reciprocal %151 {approx = true} : vector<64x1xf32> -> vector<64x1xf32>
    %153 = vector.broadcast %152 : vector<64x1xf32> to vector<64x64xf32>
    %154 = arith.mulf %149, %153 : vector<64x64xf32>
    %cst_77 = arith.constant dense<0.000000e+00> : vector<8x64xf32>
    %155 = tpu.matmul %141, %154, %cst_77 {dimension_numbers = #tpu.dot_dimension_numbers<[1], [1], [0], [0], [0, 0, 1, 0], [], []>} : vector<8x64xf32>, vector<64x64xf32>, vector<8x64xf32> -> vector<8x64xf32>
    %156 = tpu.concatenate %138, %155 in 0 : vector<8x64xf32>, vector<8x64xf32> -> vector<16x64xf32>
    %cst_78 = arith.constant dense<0.000000e+00> : vector<16x64xf32>
    %157 = tpu.matmul %1, %156, %cst_78 {dimension_numbers = #tpu.dot_dimension_numbers<[1], [0], [0], [1], [0, 0, 1, 1], [], []>} : vector<16x16xf32>, vector<16x64xf32>, vector<16x64xf32> -> vector<16x64xf32>
    %158 = vector.broadcast %2 : vector<16x1xf32> to vector<16x64xf32>
    %159 = arith.addf %157, %158 : vector<16x64xf32>
    %c0_79 = arith.constant 0 : index
    %c0_80 = arith.constant 0 : index
    %c128_81 = arith.constant 128 : index
    %160 = vector.load %arg5[%c0_79, %c0_80, %c128_81] : memref<1x16x320xf32, #tpu.memory_space<vmem>>, vector<1x16x64xf32>
    %161 = vector.shape_cast %160 : vector<1x16x64xf32> to vector<16x64xf32>
    %162 = vector.shape_cast %159 : vector<16x64xf32> to vector<1x16x64xf32>
    tpu.vector_store %arg5[%c0_79, %c0_80, %c128_81], %162 {strides = array<i32>} : memref<1x16x320xf32, #tpu.memory_space<vmem>>, vector<1x16x64xf32>,
    %c0_82 = arith.constant 0 : index
    %c0_83 = arith.constant 0 : index
    %c192 = arith.constant 192 : index
    %163 = vector.load %arg6[%c0_82, %c0_83, %c192] : memref<1x48x320xf32, #tpu.memory_space<vmem>>, vector<1x16x64xf32>
    %164 = vector.shape_cast %163 : vector<1x16x64xf32> to vector<16x64xf32>
    %c0_84 = arith.constant 0 : index
    %c16_85 = arith.constant 16 : index
    %c192_86 = arith.constant 192 : index
    %165 = vector.load %arg6[%c0_84, %c16_85, %c192_86] : memref<1x48x320xf32, #tpu.memory_space<vmem>>, vector<1x32x64xf32>
    %166 = vector.shape_cast %165 : vector<1x32x64xf32> to vector<32x64xf32>
    %c0_87 = arith.constant 0 : index
    %c16_88 = arith.constant 16 : index
    %c0_89 = arith.constant 0 : index
    %167 = vector.load %arg6[%c0_87, %c16_88, %c0_89] : memref<1x48x320xf32, #tpu.memory_space<vmem>>, vector<1x32x64xf32>
    %168 = vector.shape_cast %167 : vector<1x32x64xf32> to vector<32x64xf32>
    %169 = arith.addf %166, %168 : vector<32x64xf32>
    %c0_90 = arith.constant 0 : index
    %c16_91 = arith.constant 16 : index
    %c128_92 = arith.constant 128 : index
    %170 = vector.load %arg6[%c0_90, %c16_91, %c128_92] : memref<1x48x320xf32, #tpu.memory_space<vmem>>, vector<1x32x64xf32>
    %171 = vector.shape_cast %170 : vector<1x32x64xf32> to vector<32x64xf32>
    %172 = arith.addf %169, %171 : vector<32x64xf32>
    %cst_93 = arith.constant 0.333333343 : f32
    %173 = vector.broadcast %cst_93 : f32 to vector<32x64xf32>
    %174 = arith.mulf %172, %173 : vector<32x64xf32>
    %175 = vector.extract_strided_slice %164 {offsets = [0, 0], sizes = [8, 64], strides = [1, 1]} : vector<16x64xf32> to vector<8x64xf32>
    %176 = vector.extract_strided_slice %174 {offsets = [0, 0], sizes = [8, 64], strides = [1, 1]} : vector<32x64xf32> to vector<8x64xf32>
    %177 = vector.extract_strided_slice %174 {offsets = [16, 0], sizes = [8, 64], strides = [1, 1]} : vector<32x64xf32> to vector<8x64xf32>
    %cst_94 = arith.constant dense<0.000000e+00> : vector<64x64xf32>
    %178 = tpu.matmul %175, %176, %cst_94 {dimension_numbers = #tpu.dot_dimension_numbers<[0], [0], [1], [1], [0, 1, 1, 1], [], []>} : vector<8x64xf32>, vector<8x64xf32>, vector<64x64xf32> -> vector<64x64xf32>
    %cst_95 = arith.constant -1.000000e+30 : f32
    %179 = vector.broadcast %cst_95 : f32 to vector<64x64xf32>
    %180 = arith.select %5, %178, %179 : vector<64x64xi1>, vector<64x64xf32>
    %cst_96 = arith.constant dense<0xFF800000> : vector<64xf32>
    %181 = vector.multi_reduction <maximumf>, %180, %cst_96 [1] : vector<64x64xf32> to vector<64xf32>
    %182 = vector.shape_cast %181 : vector<64xf32> to vector<64x1xf32>
    %183 = vector.broadcast %182 : vector<64x1xf32> to vector<64x64xf32>
    %184 = arith.subf %180, %183 : vector<64x64xf32>
    %185 = math.exp %184 : vector<64x64xf32>
    %cst_97 = arith.constant dense<0.000000e+00> : vector<64xf32>
    %186 = vector.multi_reduction <add>, %185, %cst_97 [1] : vector<64x64xf32> to vector<64xf32>
    %187 = vector.shape_cast %186 : vector<64xf32> to vector<64x1xf32>
    %188 = tpu.reciprocal %187 {approx = true} : vector<64x1xf32> -> vector<64x1xf32>
    %189 = vector.broadcast %188 : vector<64x1xf32> to vector<64x64xf32>
    %190 = arith.mulf %185, %189 : vector<64x64xf32>
    %cst_98 = arith.constant dense<0.000000e+00> : vector<8x64xf32>
    %191 = tpu.matmul %177, %190, %cst_98 {dimension_numbers = #tpu.dot_dimension_numbers<[1], [1], [0], [0], [0, 0, 1, 0], [], []>} : vector<8x64xf32>, vector<64x64xf32>, vector<8x64xf32> -> vector<8x64xf32>
    %192 = vector.extract_strided_slice %164 {offsets = [8, 0], sizes = [8, 64], strides = [1, 1]} : vector<16x64xf32> to vector<8x64xf32>
    %193 = vector.extract_strided_slice %174 {offsets = [8, 0], sizes = [8, 64], strides = [1, 1]} : vector<32x64xf32> to vector<8x64xf32>
    %194 = vector.extract_strided_slice %174 {offsets = [24, 0], sizes = [8, 64], strides = [1, 1]} : vector<32x64xf32> to vector<8x64xf32>
    %cst_99 = arith.constant dense<0.000000e+00> : vector<64x64xf32>
    %195 = tpu.matmul %192, %193, %cst_99 {dimension_numbers = #tpu.dot_dimension_numbers<[0], [0], [1], [1], [0, 1, 1, 1], [], []>} : vector<8x64xf32>, vector<8x64xf32>, vector<64x64xf32> -> vector<64x64xf32>
    %cst_100 = arith.constant -1.000000e+30 : f32
    %196 = vector.broadcast %cst_100 : f32 to vector<64x64xf32>
    %197 = arith.select %5, %195, %196 : vector<64x64xi1>, vector<64x64xf32>
    %cst_101 = arith.constant dense<0xFF800000> : vector<64xf32>
    %198 = vector.multi_reduction <maximumf>, %197, %cst_101 [1] : vector<64x64xf32> to vector<64xf32>
    %199 = vector.shape_cast %198 : vector<64xf32> to vector<64x1xf32>
    %200 = vector.broadcast %199 : vector<64x1xf32> to vector<64x64xf32>
    %201 = arith.subf %197, %200 : vector<64x64xf32>
    %202 = math.exp %201 : vector<64x64xf32>
    %cst_102 = arith.constant dense<0.000000e+00> : vector<64xf32>
    %203 = vector.multi_reduction <add>, %202, %cst_102 [1] : vector<64x64xf32> to vector<64xf32>
    %204 = vector.shape_cast %203 : vector<64xf32> to vector<64x1xf32>
    %205 = tpu.reciprocal %204 {approx = true} : vector<64x1xf32> -> vector<64x1xf32>
    %206 = vector.broadcast %205 : vector<64x1xf32> to vector<64x64xf32>
    %207 = arith.mulf %202, %206 : vector<64x64xf32>
    %cst_103 = arith.constant dense<0.000000e+00> : vector<8x64xf32>
    %208 = tpu.matmul %194, %207, %cst_103 {dimension_numbers = #tpu.dot_dimension_numbers<[1], [1], [0], [0], [0, 0, 1, 0], [], []>} : vector<8x64xf32>, vector<64x64xf32>, vector<8x64xf32> -> vector<8x64xf32>
    %209 = tpu.concatenate %191, %208 in 0 : vector<8x64xf32>, vector<8x64xf32> -> vector<16x64xf32>
    %cst_104 = arith.constant dense<0.000000e+00> : vector<16x64xf32>
    %210 = tpu.matmul %1, %209, %cst_104 {dimension_numbers = #tpu.dot_dimension_numbers<[1], [0], [0], [1], [0, 0, 1, 1], [], []>} : vector<16x16xf32>, vector<16x64xf32>, vector<16x64xf32> -> vector<16x64xf32>
    %211 = vector.broadcast %2 : vector<16x1xf32> to vector<16x64xf32>
    %212 = arith.addf %210, %211 : vector<16x64xf32>
    %c0_105 = arith.constant 0 : index
    %c0_106 = arith.constant 0 : index
    %c192_107 = arith.constant 192 : index
    %213 = vector.load %arg5[%c0_105, %c0_106, %c192_107] : memref<1x16x320xf32, #tpu.memory_space<vmem>>, vector<1x16x64xf32>
    %214 = vector.shape_cast %213 : vector<1x16x64xf32> to vector<16x64xf32>
    %215 = vector.shape_cast %212 : vector<16x64xf32> to vector<1x16x64xf32>
    tpu.vector_store %arg5[%c0_105, %c0_106, %c192_107], %215 {strides = array<i32>} : memref<1x16x320xf32, #tpu.memory_space<vmem>>, vector<1x16x64xf32>,
    %c0_108 = arith.constant 0 : index
    %c0_109 = arith.constant 0 : index
    %c256 = arith.constant 256 : index
    %216 = vector.load %arg6[%c0_108, %c0_109, %c256] : memref<1x48x320xf32, #tpu.memory_space<vmem>>, vector<1x16x64xf32>
    %217 = vector.shape_cast %216 : vector<1x16x64xf32> to vector<16x64xf32>
    %c0_110 = arith.constant 0 : index
    %c16_111 = arith.constant 16 : index
    %c256_112 = arith.constant 256 : index
    %218 = vector.load %arg6[%c0_110, %c16_111, %c256_112] : memref<1x48x320xf32, #tpu.memory_space<vmem>>, vector<1x32x64xf32>
    %219 = vector.shape_cast %218 : vector<1x32x64xf32> to vector<32x64xf32>
    %c0_113 = arith.constant 0 : index
    %c16_114 = arith.constant 16 : index
    %c0_115 = arith.constant 0 : index
    %220 = vector.load %arg6[%c0_113, %c16_114, %c0_115] : memref<1x48x320xf32, #tpu.memory_space<vmem>>, vector<1x32x64xf32>
    %221 = vector.shape_cast %220 : vector<1x32x64xf32> to vector<32x64xf32>
    %222 = arith.addf %219, %221 : vector<32x64xf32>
    %c0_116 = arith.constant 0 : index
    %c16_117 = arith.constant 16 : index
    %c192_118 = arith.constant 192 : index
    %223 = vector.load %arg6[%c0_116, %c16_117, %c192_118] : memref<1x48x320xf32, #tpu.memory_space<vmem>>, vector<1x32x64xf32>
    %224 = vector.shape_cast %223 : vector<1x32x64xf32> to vector<32x64xf32>
    %225 = arith.addf %222, %224 : vector<32x64xf32>
    %cst_119 = arith.constant 0.333333343 : f32
    %226 = vector.broadcast %cst_119 : f32 to vector<32x64xf32>
    %227 = arith.mulf %225, %226 : vector<32x64xf32>
    %228 = vector.extract_strided_slice %217 {offsets = [0, 0], sizes = [8, 64], strides = [1, 1]} : vector<16x64xf32> to vector<8x64xf32>
    %229 = vector.extract_strided_slice %227 {offsets = [0, 0], sizes = [8, 64], strides = [1, 1]} : vector<32x64xf32> to vector<8x64xf32>
    %230 = vector.extract_strided_slice %227 {offsets = [16, 0], sizes = [8, 64], strides = [1, 1]} : vector<32x64xf32> to vector<8x64xf32>
    %cst_120 = arith.constant dense<0.000000e+00> : vector<64x64xf32>
    %231 = tpu.matmul %228, %229, %cst_120 {dimension_numbers = #tpu.dot_dimension_numbers<[0], [0], [1], [1], [0, 1, 1, 1], [], []>} : vector<8x64xf32>, vector<8x64xf32>, vector<64x64xf32> -> vector<64x64xf32>
    %cst_121 = arith.constant -1.000000e+30 : f32
    %232 = vector.broadcast %cst_121 : f32 to vector<64x64xf32>
    %233 = arith.select %5, %231, %232 : vector<64x64xi1>, vector<64x64xf32>
    %cst_122 = arith.constant dense<0xFF800000> : vector<64xf32>
    %234 = vector.multi_reduction <maximumf>, %233, %cst_122 [1] : vector<64x64xf32> to vector<64xf32>
    %235 = vector.shape_cast %234 : vector<64xf32> to vector<64x1xf32>
    %236 = vector.broadcast %235 : vector<64x1xf32> to vector<64x64xf32>
    %237 = arith.subf %233, %236 : vector<64x64xf32>
    %238 = math.exp %237 : vector<64x64xf32>
    %cst_123 = arith.constant dense<0.000000e+00> : vector<64xf32>
    %239 = vector.multi_reduction <add>, %238, %cst_123 [1] : vector<64x64xf32> to vector<64xf32>
    %240 = vector.shape_cast %239 : vector<64xf32> to vector<64x1xf32>
    %241 = tpu.reciprocal %240 {approx = true} : vector<64x1xf32> -> vector<64x1xf32>
    %242 = vector.broadcast %241 : vector<64x1xf32> to vector<64x64xf32>
    %243 = arith.mulf %238, %242 : vector<64x64xf32>
    %cst_124 = arith.constant dense<0.000000e+00> : vector<8x64xf32>
    %244 = tpu.matmul %230, %243, %cst_124 {dimension_numbers = #tpu.dot_dimension_numbers<[1], [1], [0], [0], [0, 0, 1, 0], [], []>} : vector<8x64xf32>, vector<64x64xf32>, vector<8x64xf32> -> vector<8x64xf32>
    %245 = vector.extract_strided_slice %217 {offsets = [8, 0], sizes = [8, 64], strides = [1, 1]} : vector<16x64xf32> to vector<8x64xf32>
    %246 = vector.extract_strided_slice %227 {offsets = [8, 0], sizes = [8, 64], strides = [1, 1]} : vector<32x64xf32> to vector<8x64xf32>
    %247 = vector.extract_strided_slice %227 {offsets = [24, 0], sizes = [8, 64], strides = [1, 1]} : vector<32x64xf32> to vector<8x64xf32>
    %cst_125 = arith.constant dense<0.000000e+00> : vector<64x64xf32>
    %248 = tpu.matmul %245, %246, %cst_125 {dimension_numbers = #tpu.dot_dimension_numbers<[0], [0], [1], [1], [0, 1, 1, 1], [], []>} : vector<8x64xf32>, vector<8x64xf32>, vector<64x64xf32> -> vector<64x64xf32>
    %cst_126 = arith.constant -1.000000e+30 : f32
    %249 = vector.broadcast %cst_126 : f32 to vector<64x64xf32>
    %250 = arith.select %5, %248, %249 : vector<64x64xi1>, vector<64x64xf32>
    %cst_127 = arith.constant dense<0xFF800000> : vector<64xf32>
    %251 = vector.multi_reduction <maximumf>, %250, %cst_127 [1] : vector<64x64xf32> to vector<64xf32>
    %252 = vector.shape_cast %251 : vector<64xf32> to vector<64x1xf32>
    %253 = vector.broadcast %252 : vector<64x1xf32> to vector<64x64xf32>
    %254 = arith.subf %250, %253 : vector<64x64xf32>
    %255 = math.exp %254 : vector<64x64xf32>
    %cst_128 = arith.constant dense<0.000000e+00> : vector<64xf32>
    %256 = vector.multi_reduction <add>, %255, %cst_128 [1] : vector<64x64xf32> to vector<64xf32>
    %257 = vector.shape_cast %256 : vector<64xf32> to vector<64x1xf32>
    %258 = tpu.reciprocal %257 {approx = true} : vector<64x1xf32> -> vector<64x1xf32>
    %259 = vector.broadcast %258 : vector<64x1xf32> to vector<64x64xf32>
    %260 = arith.mulf %255, %259 : vector<64x64xf32>
    %cst_129 = arith.constant dense<0.000000e+00> : vector<8x64xf32>
    %261 = tpu.matmul %247, %260, %cst_129 {dimension_numbers = #tpu.dot_dimension_numbers<[1], [1], [0], [0], [0, 0, 1, 0], [], []>} : vector<8x64xf32>, vector<64x64xf32>, vector<8x64xf32> -> vector<8x64xf32>
    %262 = tpu.concatenate %244, %261 in 0 : vector<8x64xf32>, vector<8x64xf32> -> vector<16x64xf32>
    %cst_130 = arith.constant dense<0.000000e+00> : vector<16x64xf32>
    %263 = tpu.matmul %1, %262, %cst_130 {dimension_numbers = #tpu.dot_dimension_numbers<[1], [0], [0], [1], [0, 0, 1, 1], [], []>} : vector<16x16xf32>, vector<16x64xf32>, vector<16x64xf32> -> vector<16x64xf32>
    %264 = vector.broadcast %2 : vector<16x1xf32> to vector<16x64xf32>
    %265 = arith.addf %263, %264 : vector<16x64xf32>
    %c0_131 = arith.constant 0 : index
    %c0_132 = arith.constant 0 : index
    %c256_133 = arith.constant 256 : index
    %266 = vector.load %arg5[%c0_131, %c0_132, %c256_133] : memref<1x16x320xf32, #tpu.memory_space<vmem>>, vector<1x16x64xf32>
    %267 = vector.shape_cast %266 : vector<1x16x64xf32> to vector<16x64xf32>
    %268 = vector.shape_cast %265 : vector<16x64xf32> to vector<1x16x64xf32>
    tpu.vector_store %arg5[%c0_131, %c0_132, %c256_133], %268 {strides = array<i32>} : memref<1x16x320xf32, #tpu.memory_space<vmem>>, vector<1x16x64xf32>,
    return
  }
  func.func @transform_0(%arg0: i32) -> (i32, i32, i32) {
    %c0_i32 = arith.constant 0 : i32
    %c0_i32_0 = arith.constant 0 : i32
    %c0_i32_1 = arith.constant 0 : i32
    return %arg0, %c0_i32, %c0_i32_0 : i32, i32, i32
  }
  func.func @transform_1(%arg0: i32) -> (i32, i32) {
    %c0_i32 = arith.constant 0 : i32
    %c0_i32_0 = arith.constant 0 : i32
    %c0_i32_1 = arith.constant 0 : i32
    return %c0_i32, %c0_i32_0 : i32, i32
  }
  func.func @transform_2(%arg0: i32) -> (i32, i32) {
    %c0_i32 = arith.constant 0 : i32
    %c0_i32_0 = arith.constant 0 : i32
    %c0_i32_1 = arith.constant 0 : i32
    return %c0_i32, %c0_i32_0 : i32, i32
  }
  func.func @transform_3(%arg0: i32) -> (i32, i32) {
    %c0_i32 = arith.constant 0 : i32
    %c0_i32_0 = arith.constant 0 : i32
    %c0_i32_1 = arith.constant 0 : i32
    return %c0_i32, %c0_i32_0 : i32, i32
  }
  func.func @transform_4(%arg0: i32) -> (i32, i32, i32) {
    %c0_i32 = arith.constant 0 : i32
    %c0_i32_0 = arith.constant 0 : i32
    %c0_i32_1 = arith.constant 0 : i32
    return %arg0, %c0_i32, %c0_i32_0 : i32, i32, i32
  }
}

</mosaic_0001>

<bundles_post_ra>
// kernel: tpu_custom_call.1
= control target key start
LH: loop header
LB: loop body
LE: loop exit
PB: predicated region body
PF: predicated region fallthrough
CT: control target
= control target key end

     0   :  { %9 = vsyncpa [#allocation4], 0  ;;  %s7556_s0 = inlined_call_operand.hbm [shape: f32[2,16,320], index: 0, kind: input, shape index: {}]   ;;  %s7557_s1 = inlined_call_operand.vmem [shape: f32[48,16], index: 1, kind: input, shape index: {}]   ;;  %s7558_s2 = inlined_call_operand.vmem [shape: f32[16,16], index: 2, kind: input, shape index: {}]   ;;  %s7559_s3 = inlined_call_operand.vmem [shape: f32[16,1], index: 3, kind: input, shape index: {}]   ;;  %s7560_s4 = inlined_call_operand.hbm [shape: f32[2,16,320], index: 4, kind: output, shape index: {}]  }
   0x1   :  { %11 = vsyncpa [#allocation4 + $0x1], 0 }
   0x2   :  { %12 = vsyncpa [#allocation5], 0 }
   0x3   :  { %14 = vsyncpa [#allocation5 + $0x1], 0  ;;  %s6030_s15 = smov 0   ;;  %s6032_s16 = smov 0  }
   0x4   :  { %s6034_s17 = smov 0   ;;  %s6036_s18 = smov 0  }
   0x5 LB: > { %s6051_s19 = sadd.s32 4294967295, %s5993_s18   ;;  %s4729_s20 = sadd.s32 4294967294, %s5993_s18   ;;  %s5993_s18 = sphi %s6036_s18, %s7574_s18   ;;  %s5989_s17 = sphi %s6034_s17, %s7573_s17   ;;  %s5985_s16 = sphi %s6032_s16, %s7572_s16   ;;  %s5981_s15 = sphi %s6030_s15, %s7571_s15  }
   0x6   : > { %s6055_s21 = sadd.s32 1, %s5993_s18   ;;  %s27_s22 = sadd.s32 1, %s5989_s17 }
   0x7   : > { %s24_s23 = ssub.s32 %s5993_s18, %s6055_s21  ;;  %p34_p0 = scmp.ne.s32.totalorder %s5989_s17, %s5985_s16 }
   0x8   : > { %p25_p1 = scmp.eq.s32.totalorder %s24_s23, 0  ;;  %p35_p2 = scmp.eq.s32.totalorder %s5993_s18, 0 }
   0x9   : > { %p40_p3 = scmp.ne.s32.totalorder %s5985_s16, %s5981_s15  ;;  %p41_p4 = scmp.eq.s32.totalorder %s6051_s19, 0 }
   0xa   : > { %s6067_s24 = scalar_select %p25_p1, %s5989_s17, %s27_s22  }
   0xb   : > { %p36_p5 = por %p35_p2, %p34_p0  ;;  %p6069_p6 = por %p41_p4, %p40_p3 }
   0xc   : > { %p127_p7 = scmp.eq.s32.totalorder %s6051_s19, 1  ;;  %p133_p8 = scmp.eq.s32.totalorder %s4729_s20, 1 }
   0xd   : > { %s7563_s25 = scalar_select %p6069_p6, 1, 0 }
   0xe   : > { %p5531_p10 = scmp.lt.s32.totalorder %s5993_s18, 2  ;;  %p6076_p11 = por %p127_p7, %p34_p0 }
   0xf   : > { %p6080_p12 = por %p133_p8, %p40_p3  ;;  %s162_s28 = sand.u32 1, %s5989_s17  }
  0x10   : > { %s7564_s26 = scalar_select %p6076_p11, 1, 0 }
  0x11   : > { %s7565_s27 = scalar_select %p6080_p12, 1, 0 }
  0x12   : > { %s5516_s29 = smul.u32 768, %s5993_s18  ;;  %p6091_p13 = pnand %p5531_p10, %p36_p5 }
  0x13   : > { %s5515_s30 = smul.u32 48, %s162_s28  ;;  %s6097_s11 = scalar_lea.sflag [#allocation4], %s162_s28 }
  0x14   : > { %s6089_s7 = scalar_lea.hbm %s7556_s0, %s5516_s29  ;;  %p5903_p1 = pneg %p6091_p13 }
  0x15   : > { %s166_s9 = scalar_lea.vmem [#allocation3], %s5515_s30  ;;  %s5901_s12 = scalar_lea.hbm %s6089_s7, 768 }
  0x16   : > { %s173_s10 = sshll.u32 %s166_s9, 4  ;;  %p5902_p0 = scmp.ne.s32.totalorder %s6089_s7, %s5901_s12  ;;  %s6095_s10 = int_to_ptr.vmem [resolvable:$true] %s173_s10 }
  0x17   : > { %s5906_s20 = scalar_lea.hbm %s7556_s0, 1536  ;;  %p5907_p4 = scmp.lt.s32.totalorder %s6089_s7, %s7556_s0 }
  0x18   : > { %p5904_p2 = pnand %p5903_p1, %p5902_p0  ;;  %p5908_p5 = scmp.lt.s32.totalorder %s5906_s20, %s5901_s12 }
  0x1a   : > { %p5905_p3 = pneg %p5904_p2  ;;  %p5909_p7 = por %p5908_p5, %p5907_p4 }
  0x1c   : > { %p5910_p8 = pnand %p5909_p7, %p5905_p3 }
  0x1e   : > { %5913 = shalt.err (!%p5910_p8)
}
  0x1f   : > { %s5914_s28 = scalar_lea.vmem %s6095_s10, 768  ;;  %s5995_s29 = smov [#allocation3]  }
  0x20   : > { %p5915_p10 = scmp.ne.s32.totalorder %s6095_s10, %s5914_s28  ;;  %s5919_s30 = sshll.u32 %s5995_s29, 4  ;;  %s5920_s30 = int_to_ptr.vmem [resolvable:$false] %s5919_s30 }
  0x21   : > { %s5921_s5 = scalar_lea.vmem %s5920_s30, 1536  ;;  %p5922_p2 = scmp.lt.s32.totalorder %s6095_s10, %s5920_s30 }
  0x22   : > { %p5917_p9 = pnand %p5915_p10, %p5903_p1  ;;  %p5923_p12 = scmp.lt.s32.totalorder %s5921_s5, %s5914_s28 }
  0x24   : > { %p5918_p0 = pneg %p5917_p9  ;;  %p5924_p11 = por %p5923_p12, %p5922_p2 }
  0x26   : > { %p5925_p6 = pnand %p5924_p11, %p5918_p0 }
  0x28   : > { %5928 = shalt.err (!%p5925_p6)
}
  0x29   : > { %s5996_s6 = smov 384   ;;  %s5997_s9 = smov 24  }
  0x2a   : > { %5526 = dma.hbm_to_vmem [thread:$0]  (!%p6091_p13), %s6089_s7, 768, %s6095_s10, %s6097_s11, %s5996_s6, %s5996_s6, %s5997_s9  }
  0x2b   : > { %p4733_p9 = scmp.ge.s32.totalorder %s5993_s18, 1  ;;  %p181_p1 = scmp.lt.s32.totalorder %s5993_s18, 3 }
  0x2d   : > { %p182_p3 = pnand %p4733_p9, %p181_p1 }
  0x2e   : > { %s6121_s12 = sand.u32 (!%p182_p3), 1, %s5985_s16   ;;  %p7567_p6 = scmp.ne.s32.totalorder (!%p182_p3), %s7563_s25, 0 }
  0x2f   : > { %185 = sbr.rel (%p182_p3) target bundleno = 4425 (0x1149), region = 36  ;;  %s188_s14 = scalar_lea.sflag (!%p182_p3), [#allocation4], %s6121_s12 }
  0x30   : > { %s5517_s13 = smul.u32 (!%p182_p3), 48, %s6121_s12 }
  0x32   : > { %s191_s20 = scalar_lea.vmem (!%p182_p3), [#allocation3], %s5517_s13 }
  0x34   : > { %5972 = dma.done.wait (%p7567_p6), %s188_s14, 768  }
  0x35   : > { %5974 = vsyncadd (%p7567_p6), %s188_s14, 4294966528  ;;  %v5998_v0 = vmov 0.0   ;;  %v233_v1 = vld [vmem:[%s191_s20 + $0x20] sm:$0xff]  ;;  %v232_v2 = vld [vmem:[%s191_s20 + $0x18] sm:$0xff]  ;;  %vm235_vm0 = vcmask 130048   ;;  %vm452_vm1 = vcmask 523264   ;;  %v226_v46 = vlaneseq }
  0x36   : > { %318 = vmatprep.mubr.f32.mxu0 %v5998_v0  ;;  %v230_v3 = vld [vmem:[%s191_s20 + $0x8] sm:$0xff]  ;;  %282 = vmatprep.subr.mxu0 %v233_v1  ;;  %v229_v4 = vld [vmem:[%s191_s20] sm:$0xff]  ;;  %v231_v7 = vld [vmem:[%s191_s20 + $0x10] sm:$0xff]  ;;  %vm507_vm2 = vcmask 64512   ;;  %s5999_s9 = smov 64   ;;  %vm6000_vm4 = vmmov 0  }
  0x37   : > { %v216_v5 = vld [vmem:[%s7557_s1] sm:$0xff]  ;;  %283 = vmatpush1.msra.mxu0 %v232_v2  ;;  %v234_v6 = vld [vmem:[%s191_s20 + $0x28] sm:$0xff]  ;;  %v218_v9 = vld [vmem:[%s7557_s1 + $0x10] sm:$0xff]  ;;  %v6213_v48 = vand.u32 127, %v226_v46  ;;  %s7418_s29 = scalar_lea.vmem [#allocation6], %s5517_s13  ;;  %vm2122_vm5 = vcmask 1048064  }
  0x38   : > { %5141 = vmatprep.mubr.msk.f32.mxu1 %vm235_vm0, %v216_v5  ;;  %284 = vmatprep.subr.mxu0 %v230_v3  ;;  %v217_v8 = vld [vmem:[%s7557_s1 + $0x8] sm:$0xff]  ;;  %v219_v10 = vld [vmem:[%s7557_s1 + $0x18] sm:$0xff]  ;;  %v220_v11 = vld [vmem:[%s7557_s1 + $0x20] sm:$0xff]  ;;  %s5518_s20 = smul.u32 768, %s6051_s19  ;;  %s4656_s7 = sshll.u32 %s7418_s29, 4  ;;  %s7508_s7 = int_to_ptr.vmem [resolvable:$true] %s4656_s7 }
  0x39   : > { %5137 = vmatprep.subr.mxu1 %v234_v6  ;;  %285 = vmatpush1.msra.mxu0 %v229_v4  ;;  %v221_v12 = vld [vmem:[%s7557_s1 + $0x28] sm:$0xff]  ;;  %vm228_vm3 = vcmp.lt.s32.totalorder %v6213_v48, 62  ;;  %s4643_s19 = scalar_lea.sflag [#allocation5], %s6121_s12  ;;  %s5929_s11 = scalar_lea.vmem %s7508_s7, 768 }
  0x3a   : > { %5138 = vmatpush3.msra.mxu1 %v234_v6  ;;  %4734 = vmatmul.mubr.msk.f32.vlgmr.msra.gmra.mxu0 %vm235_vm0, %v216_v5  ;;  %v225_v48 = vld [vmem:[%s7559_s3 + $0x8] sm:$0xff]  ;;  %s7506_s10 = scalar_lea.hbm %s7560_s4, %s5518_s20  ;;  %p5930_p11 = scmp.ne.s32.totalorder %s7508_s7, %s5929_s11 }
  0x3b   : > { %5139 = vmatprep.subr.mxu1 %v231_v7  ;;  %324 = vmatprep.mubr.f32.mxu0 %v5998_v0  ;;  %p7568_p12 = scmp.ne.s32.totalorder %s7564_s26, 0  ;;  %s6002_s22 = smov [#allocation6]  }
  0x3c   : > { %5140 = vmatpush3.msra.mxu1 %v231_v7  ;;  %5164 = vmatprep.subr.mxu0 %v5998_v0  ;;  %s5933_s23 = sshll.u32 %s6002_s22, 4  ;;  %s5934_s23 = int_to_ptr.vmem [resolvable:$false] %s5933_s23 }
  0x3d   : > { %5142 = vmatmul.mubr.msk.f32.vlgmr.msra.gmra.mxu1 %vm235_vm0, %v217_v8  ;;  %p5931_p13 = pnand %p5930_p11, %p7568_p12  ;;  %s5935_s28 = scalar_lea.vmem %s5934_s23, 1536 }
  0x3e   : > { %5144 = vmatprep.mubr.msk.f32.mxu1 %vm235_vm0, %v218_v9  ;;  %4735 = vmatmul.mubr.msk.f32.gmra.mxu0 %vm235_vm0, %v217_v8  ;;  %p5936_p5 = scmp.lt.s32.totalorder %s7508_s7, %s5934_s23  ;;  %p5937_p7 = scmp.lt.s32.totalorder %s5935_s28, %s5929_s11 }
  0x3f   : > { %330 = vmatprep.mubr.f32.mxu0 %v5998_v0  ;;  %p5932_p4 = pneg %p5931_p13 }
  0x40   : > { %p5938_p8 = por %p5937_p7, %p5936_p5 }
  0x41   : > { %5145 = vmatmul.mubr.msk.f32.gmra.mxu1 %vm235_vm0, %v219_v10 }
  0x42   : > { %4736 = vmatmul.mubr.msk.f32.gmra.mxu0 %vm235_vm0, %v218_v9  ;;  %5147 = vmatprep.mubr.msk.f32.mxu1 %vm235_vm0, %v220_v11  ;;  %p5939_p10 = pnand %p5938_p8, %p5932_p4 }
  0x43   : > { %336 = vmatprep.mubr.f32.mxu0 %v5998_v0 }
  0x45   : > { %5148 = vmatmul.mubr.msk.f32.gmra.mxu1 %vm235_vm0, %v221_v12 }
  0x46   : > { %4737 = vmatmul.mubr.msk.f32.gmra.mxu0 %vm235_vm0, %v219_v10 }
  0x47   : > { %342 = vmatprep.mubr.f32.mxu0 %v5998_v0 }
  0x4a   : > { %4738 = vmatmul.mubr.msk.f32.gmra.mxu0 %vm235_vm0, %v220_v11 }
  0x4b   : > { %348 = vmatprep.mubr.f32.mxu0 %v5998_v0 }
  0x4e   : > { %4739 = vmatmul.mubr.msk.f32.gmra.mxu0 %vm235_vm0, %v221_v12 }
  0x4f   : > { %5180 = vmatprep.mubr.msk.f32.mxu0 %vm6000_vm4, %v5998_v0 }
  0xfa   : > { %v6168_v13 = vpop.f32.mrf.mxu0 }
  0xfb   : > { %475 = vxpose.xlu0.b32.start.end [1/1] (short) (narrow) %v6168_v13, 64 }
  0xfc   : > { %v322_v14 = vpop.f32.mrf.mxu0 }
  0xfd   : > { %v5143_v15 = vpop.f32.mrf.mxu1  ;;  %451 = vst [vmem:[#allocation2 + $0x8] sm:$0xff] %v322_v14 }
  0xfe   : > { %456 = vst.msk [vmem:[#allocation2 + $0x28] sm:$0xff] %vm452_vm1, %v5143_v15  ;;  %v6172_v16 = vpop.f32.mrf.mxu0 }
  0xff   : > { %v421_v17 = vpop.f32.mrf.mxu1 }
 0x100   : > { %453 = vst.msk [vmem:[#allocation2 + $0x10] sm:$0xff] %vm452_vm1, %v421_v17  ;;  %v328_v18 = vpop.f32.mrf.mxu0 }
 0x101   : > { %v5146_v19 = vpop.f32.mrf.mxu1  ;;  %455 = vst [vmem:[#allocation2 + $0x20] sm:$0xff] %v328_v18 }
 0x102   : > { %462 = vst.msk [vmem:[#allocation2 + $0x58] sm:$0xff] %vm452_vm1, %v5146_v19  ;;  %v6176_v20 = vpop.f32.mrf.mxu0 }
 0x103   : > { %v431_v21 = vpop.f32.mrf.mxu1  ;;  %457 = vst [vmem:[#allocation2 + $0x30] sm:$0xff] %v6176_v20  ;;  %5150 = vmatprep.subr.mxu1 %v6176_v20 }
 0x104   : > { %459 = vst.msk [vmem:[#allocation2 + $0x40] sm:$0xff] %vm452_vm1, %v431_v21  ;;  %5151 = vmatpush3.msra.mxu1 %v6176_v20  ;;  %v334_v22 = vpop.f32.mrf.mxu0 }
 0x105   : > { %458 = vst [vmem:[#allocation2 + $0x38] sm:$0xff] %v334_v22  ;;  %v5149_v25 = vpop.f32.mrf.mxu1 }
 0x106   : > { %v6182_v23 = vpop.f32.mrf.mxu0  ;;  %468 = vst.msk [vmem:[#allocation2 + $0x88] sm:$0xff] %vm452_vm1, %v5149_v25 }
 0x107   : > { %460 = vst [vmem:[#allocation2 + $0x48] sm:$0xff] %v6182_v23  ;;  %5183 = vmatprep.subr.mxu1 %v6182_v23  ;;  %v441_v26 = vpop.f32.mrf.mxu1 }
 0x108   : > { %v340_v24 = vpop.f32.mrf.mxu0  ;;  %465 = vst.msk [vmem:[#allocation2 + $0x70] sm:$0xff] %vm452_vm1, %v441_v26 }
 0x109   : > { %461 = vst [vmem:[#allocation2 + $0x50] sm:$0xff] %v340_v24 }
 0x10a   : > { %v6207_v43 = vpop.f32.mrf.mxu0 }
 0x10b   : > { %463 = vst [vmem:[#allocation2 + $0x60] sm:$0xff] %v6207_v43 }
 0x10c   : > { %v346_v44 = vpop.f32.mrf.mxu0 }
 0x10d   : > { %464 = vst [vmem:[#allocation2 + $0x68] sm:$0xff] %v346_v44 }
 0x10e   : > { %v6210_v45 = vpop.f32.mrf.mxu0 }
 0x10f   : > { %466 = vst [vmem:[#allocation2 + $0x78] sm:$0xff] %v6210_v45 }
 0x118   : > { %830 = vxpose.xlu0.b32.start.end [1/1] (short) (narrow) %v6172_v16, 64 }
 0x177   : > { %v491_v27 = vpop.trf.xlu0 }
 0x178   : > { %5152 = vmatprep.mubr.msk.f32.mxu1 %vm507_vm2, %v491_v27 }
 0x17b   : > { %v492_v28 = vpop.trf.xlu0 }
 0x17c   : > { %5153 = vmatmul.mubr.msk.f32.vlgmr.msra.gmra.mxu1 %vm507_vm2, %v492_v28 }
 0x17d   : > { %5184 = vmatpush3.msra.mxu1 %v6182_v23 }
 0x17e   : > { %5197 = vmatprep.subr.mxu1 %v5998_v0 }
 0x17f   : > { %v493_v29 = vpop.trf.xlu0 }
 0x180   : > { %5155 = vmatprep.mubr.msk.f32.mxu1 %vm507_vm2, %v493_v29 }
 0x183   : > { %v494_v30 = vpop.trf.xlu0 }
 0x184   : > { %5156 = vmatmul.mubr.msk.f32.gmra.mxu1 %vm507_vm2, %v494_v30 }
 0x187   : > { %v495_v31 = vpop.trf.xlu0 }
 0x188   : > { %5158 = vmatprep.mubr.msk.f32.mxu1 %vm507_vm2, %v495_v31 }
 0x18b   : > { %v496_v32 = vpop.trf.xlu0 }
 0x18c   : > { %5159 = vmatmul.mubr.msk.f32.gmra.mxu1 %vm507_vm2, %v496_v32 }
 0x18f   : > { %v497_v33 = vpop.trf.xlu0 }
 0x190   : > { %5161 = vmatprep.mubr.msk.f32.mxu1 %vm507_vm2, %v497_v33 }
 0x193   : > { %v498_v34 = vpop.trf.xlu0 }
 0x194   : > { %5162 = vmatmul.mubr.msk.f32.gmra.mxu1 %vm507_vm2, %v498_v34 }
 0x197   : > { %v846_v35 = vpop.trf.xlu0 }
 0x198   : > { %5185 = vmatprep.mubr.msk.f32.mxu1 %vm507_vm2, %v846_v35 }
 0x19b   : > { %v847_v36 = vpop.trf.xlu0 }
 0x19c   : > { %5186 = vmatmul.mubr.msk.f32.vlgmr.msra.gmra.mxu1 %vm507_vm2, %v847_v36 }
 0x19f   : > { %v848_v37 = vpop.trf.xlu0 }
 0x1a0   : > { %5188 = vmatprep.mubr.msk.f32.mxu1 %vm507_vm2, %v848_v37 }
 0x1a3   : > { %v849_v38 = vpop.trf.xlu0 }
 0x1a4   : > { %5189 = vmatmul.mubr.msk.f32.gmra.mxu1 %vm507_vm2, %v849_v38 }
 0x1a7   : > { %v850_v39 = vpop.trf.xlu0 }
 0x1a8   : > { %5191 = vmatprep.mubr.msk.f32.mxu1 %vm507_vm2, %v850_v39 }
 0x1ab   : > { %v851_v40 = vpop.trf.xlu0 }
 0x1ac   : > { %5192 = vmatmul.mubr.msk.f32.gmra.mxu1 %vm507_vm2, %v851_v40 }
 0x1af   : > { %v852_v41 = vpop.trf.xlu0 }
 0x1b0   : > { %5194 = vmatprep.mubr.msk.f32.mxu1 %vm507_vm2, %v852_v41 }
 0x1b3   : > { %v853_v42 = vpop.trf.xlu0 }
 0x1b4   : > { %5195 = vmatmul.mubr.msk.f32.gmra.mxu1 %vm507_vm2, %v853_v42 }
 0x1b5   : > { %5213 = vmatprep.mubr.msk.f32.mxu1 %vm6000_vm4, %v5998_v0 }
 0x23c   : > { %v5154_v47 = vpop.f32.mrf.mxu1 }
 0x23d   : > { %v6278_v31 = vsel %vm228_vm3, %v5154_v47, -1e+30 }
 0x23e   : > { %v598_v49 = vpop.f32.mrf.mxu1  ;;  %v648_v32 = vsel %vm452_vm1, %v6278_v31, -inf }
 0x23f   : > { %v6290_v35 = vsel %vm228_vm3, %v598_v49, -1e+30 }
 0x240   : > { %v645_v36 = vsel %vm452_vm1, %v6290_v35, -inf }
 0x244   : > { %v5157_v50 = vpop.f32.mrf.mxu1 }
 0x245   : > { %v6218_v51 = vsel %vm228_vm3, %v5157_v50, -1e+30 }
 0x246   : > { %v654_v52 = vsel %vm452_vm1, %v6218_v51, -inf  ;;  %v608_v53 = vpop.f32.mrf.mxu1 }
 0x247   : > { %655 = vmax.xlane.f32.xlu0 %v654_v52  ;;  %v6266_v27 = vsel %vm228_vm3, %v608_v53, -1e+30 }
 0x248   : > { %v651_v28 = vsel %vm452_vm1, %v6266_v27, -inf }
 0x24c   : > { %v5160_v54 = vpop.f32.mrf.mxu1 }
 0x24d   : > { %v642_v55 = vsel %vm228_vm3, %v5160_v54, -1e+30 }
 0x24e   : > { %v618_v56 = vpop.f32.mrf.mxu1  ;;  %v660_v57 = vsel %vm452_vm1, %v642_v55, -inf }
 0x24f   : > { %v6227_v58 = vsel %vm228_vm3, %v618_v56, -1e+30  ;;  %661 = vmax.xlane.f32.xlu1 %v660_v57 }
 0x250   : > { %v657_v59 = vsel %vm452_vm1, %v6227_v58, -inf }
 0x253   : > { %658 = vmax.xlane.f32.xlu1 %v657_v59 }
 0x254   : > { %v5163_v60 = vpop.f32.mrf.mxu1 }
 0x255   : > { %v644_v61 = vsel %vm228_vm3, %v5163_v60, -1e+30 }
 0x256   : > { %v628_v62 = vpop.f32.mrf.mxu1  ;;  %v666_v63 = vsel %vm452_vm1, %v644_v61, -inf }
 0x257   : > { %v643_v1 = vsel %vm228_vm3, %v628_v62, -1e+30  ;;  %667 = vmax.xlane.f32.xlu1 %v666_v63 }
 0x258   : > { %v663_v2 = vsel %vm452_vm1, %v643_v1, -inf }
 0x25b   : > { %664 = vmax.xlane.f32.xlu1 %v663_v2 }
 0x25c   : > { %v5187_v3 = vpop.f32.mrf.mxu1 }
 0x25d   : > { %v6272_v29 = vsel %vm228_vm3, %v5187_v3, -1e+30 }
 0x25e   : > { %v952_v4 = vpop.f32.mrf.mxu1  ;;  %v1002_v30 = vsel %vm452_vm1, %v6272_v29, -inf }
 0x25f   : > { %v6284_v33 = vsel %vm228_vm3, %v952_v4, -1e+30 }
 0x260   : > { %v999_v34 = vsel %vm452_vm1, %v6284_v33, -inf }
 0x264   : > { %v5190_v5 = vpop.f32.mrf.mxu1 }
 0x265   : > { %v6254_v22 = vsel %vm228_vm3, %v5190_v5, -1e+30 }
 0x266   : > { %v962_v6 = vpop.f32.mrf.mxu1  ;;  %v1008_v24 = vsel %vm452_vm1, %v6254_v22, -inf }
 0x267   : > { %v6260_v25 = vsel %vm228_vm3, %v962_v6, -1e+30 }
 0x268   : > { %v1005_v26 = vsel %vm452_vm1, %v6260_v25, -inf }
 0x26c   : > { %v5193_v7 = vpop.f32.mrf.mxu1 }
 0x26d   : > { %v996_v8 = vsel %vm228_vm3, %v5193_v7, -1e+30 }
 0x26e   : > { %v972_v9 = vpop.f32.mrf.mxu1  ;;  %v1014_v10 = vsel %vm452_vm1, %v996_v8, -inf }
 0x26f   : > { %v995_v11 = vsel %vm228_vm3, %v972_v9, -1e+30  ;;  %1015 = vmax.xlane.f32.xlu1 %v1014_v10 }
 0x270   : > { %v1011_v12 = vsel %vm452_vm1, %v995_v11, -inf }
 0x273   : > { %1012 = vmax.xlane.f32.xlu1 %v1011_v12 }
 0x274   : > { %v5196_v14 = vpop.f32.mrf.mxu1 }
 0x275   : > { %v998_v15 = vsel %vm228_vm3, %v5196_v14, -1e+30 }
 0x276   : > { %v982_v17 = vpop.f32.mrf.mxu1  ;;  %v1020_v18 = vsel %vm452_vm1, %v998_v15, -inf }
 0x277   : > { %v6248_v19 = vsel %vm228_vm3, %v982_v17, -1e+30  ;;  %1021 = vmax.xlane.f32.xlu1 %v1020_v18 }
 0x278   : > { %v1017_v21 = vsel %vm452_vm1, %v6248_v19, -inf }
 0x27b   : > { %1018 = vmax.xlane.f32.xlu1 %v1017_v21 }
 0x27f   : > { %1009 = vmax.xlane.f32.xlu1 %v1008_v24 }
 0x283   : > { %1006 = vmax.xlane.f32.xlu1 %v1005_v26 }
 0x287   : > { %652 = vmax.xlane.f32.xlu1 %v651_v28 }
 0x28b   : > { %1003 = vmax.xlane.f32.xlu1 %v1002_v30 }
 0x28f   : > { %649 = vmax.xlane.f32.xlu1 %v648_v32 }
 0x293   : > { %1000 = vmax.xlane.f32.xlu1 %v999_v34 }
 0x297   : > { %646 = vmax.xlane.f32.xlu1 %v645_v36 }
 0x2d0   : > { %v656_v10 = vpop.xlane.xlu0 %655 }
 0x2d8   : > { %v662_v37 = vpop.xlane.xlu1 %661 }
 0x2d9   : > { %v674_v38 = vsub.f32 %v642_v55, %v662_v37 }
 0x2db   : > { %v687_v39 = vmul.f32 1.442695, %v674_v38 }
 0x2dc   : > { %v659_v40 = vpop.xlane.xlu1 %658 }
 0x2dd   : > { %5575 = vpow2.f32 %v687_v39  ;;  %v673_v3 = vsub.f32 %v6227_v58, %v659_v40 }
 0x2df   : > { %v685_v7 = vmul.f32 1.442695, %v673_v3 }
 0x2e0   : > { %v668_v41 = vpop.xlane.xlu1 %667 }
 0x2e1   : > { %v676_v42 = vsub.f32 %v644_v61, %v668_v41 }
 0x2e3   : > { %v691_v44 = vmul.f32 1.442695, %v676_v42 }
 0x2e4   : > { %v665_v46 = vpop.xlane.xlu1 %664 }
 0x2e5   : > { %5577 = vpow2.f32 %v691_v44  ;;  %v675_v47 = vsub.f32 %v643_v1, %v665_v46 }
 0x2e7   : > { %v689_v50 = vmul.f32 1.442695, %v675_v47 }
 0x2e9   : > { %5579 = vpow2.f32 %v689_v50 }
 0x2ea   : > { %v6294_v49 = vpop.eup %5575 }
 0x2eb   : > { %v708_v52 = vsel %vm452_vm1, %v6294_v49, 0.0 }
 0x2ec   : > { %709 = vadd.xlane.f32.xlu1 %v708_v52 }
 0x2f2   : > { %v6298_v53 = vpop.eup %5577 }
 0x2f3   : > { %v714_v54 = vsel %vm452_vm1, %v6298_v53, 0.0 }
 0x2f4   : > { %715 = vadd.xlane.f32.xlu1 %v714_v54 }
 0x2f6   : > { %v6302_v55 = vpop.eup %5579 }
 0x2f7   : > { %v711_v56 = vsel %vm452_vm1, %v6302_v55, 0.0 }
 0x2f8   : > { %v1016_v57 = vpop.xlane.xlu1 %1015  ;;  %712 = vadd.xlane.f32.xlu1 %v711_v56 }
 0x2f9   : > { %v1028_v59 = vsub.f32 %v996_v8, %v1016_v57 }
 0x2fb   : > { %v1041_v60 = vmul.f32 1.442695, %v1028_v59 }
 0x2fc   : > { %v1013_v61 = vpop.xlane.xlu1 %1012 }
 0x2fd   : > { %5581 = vpow2.f32 %v1041_v60  ;;  %v1027_v62 = vsub.f32 %v995_v11, %v1013_v61  ;;  %v672_v11 = vsub.f32 %v6218_v51, %v656_v10 }
 0x2ff   : > { %v1039_v63 = vmul.f32 1.442695, %v1027_v62 }
 0x300   : > { %v1022_v1 = vpop.xlane.xlu1 %1021 }
 0x301   : > { %5583 = vpow2.f32 %v1039_v63  ;;  %v1030_v2 = vsub.f32 %v998_v15, %v1022_v1 }
 0x303   : > { %v1045_v4 = vmul.f32 1.442695, %v1030_v2 }
 0x304   : > { %v1019_v5 = vpop.xlane.xlu1 %1018 }
 0x305   : > { %5585 = vpow2.f32 %v1045_v4  ;;  %v1029_v6 = vsub.f32 %v6248_v19, %v1019_v5  ;;  %v683_v19 = vmul.f32 1.442695, %v672_v11 }
 0x307   : > { %v1043_v9 = vmul.f32 1.442695, %v1029_v6  ;;  %v352_v6 = vpop.f32.mrf.mxu0 }
 0x308   : > { %v1010_v12 = vpop.xlane.xlu1 %1009  ;;  %467 = vst [vmem:[#allocation2 + $0x80] sm:$0xff] %v352_v6  ;;  %v6437_v6 = vld [vmem:[%s7558_s2] sm:$0xff] }
 0x309   : > { %5587 = vpow2.f32 %v1043_v9  ;;  %v1026_v8 = vsub.f32 %v6254_v22, %v1010_v12 }
 0x30a   : > { %v6309_v14 = vpop.eup %5581  ;;  %5589 = vpow2.f32 %v685_v7 }
 0x30b   : > { %v1037_v15 = vmul.f32 1.442695, %v1026_v8  ;;  %v1062_v58 = vsel %vm452_vm1, %v6309_v14, 0.0 }
 0x30c   : > { %1063 = vadd.xlane.f32.xlu1 %v1062_v58  ;;  %v1007_v17 = vpop.xlane.xlu1 %1006 }
 0x30d   : > { %5591 = vpow2.f32 %v1037_v15  ;;  %v1025_v21 = vsub.f32 %v6260_v25, %v1007_v17 }
 0x30e   : > { %v6314_v18 = vpop.eup %5583  ;;  %5593 = vpow2.f32 %v683_v19 }
 0x30f   : > { %v1059_v22 = vsel %vm452_vm1, %v6314_v18, 0.0  ;;  %v1035_v51 = vmul.f32 1.442695, %v1025_v21 }
 0x310   : > { %1060 = vadd.xlane.f32.xlu1 %v1059_v22  ;;  %v653_v24 = vpop.xlane.xlu1 %652 }
 0x311   : > { %v671_v28 = vsub.f32 %v6266_v27, %v653_v24  ;;  %5595 = vpow2.f32 %v1035_v51 }
 0x312   : > { %v6319_v26 = vpop.eup %5585 }
 0x313   : > { %v1068_v30 = vsel %vm452_vm1, %v6319_v26, 0.0  ;;  %v681_v25 = vmul.f32 1.442695, %v671_v28 }
 0x314   : > { %1069 = vadd.xlane.f32.xlu1 %v1068_v30  ;;  %v1004_v32 = vpop.xlane.xlu1 %1003 }
 0x315   : > { %v1024_v34 = vsub.f32 %v6272_v29, %v1004_v32 }
 0x316   : > { %v6325_v36 = vpop.eup %5587 }
 0x317   : > { %v1033_v37 = vmul.f32 1.442695, %v1024_v34  ;;  %v1065_v38 = vsel %vm452_vm1, %v6325_v36, 0.0  ;;  %v6329_v39 = vpop.eup %5589 }
 0x318   : > { %1066 = vadd.xlane.f32.xlu1 %v1065_v38  ;;  %v650_v40 = vpop.xlane.xlu1 %649  ;;  %v705_v29 = vsel %vm452_vm1, %v6329_v39, 0.0 }
 0x319   : > { %5597 = vpow2.f32 %v1033_v37  ;;  %v670_v27 = vsub.f32 %v6278_v31, %v650_v40 }
 0x31a   : > { %5599 = vpow2.f32 %v681_v25  ;;  %v6334_v42 = vpop.eup %5591 }
 0x31b   : > { %v679_v41 = vmul.f32 1.442695, %v670_v27  ;;  %v1056_v50 = vsel %vm452_vm1, %v6334_v42, 0.0  ;;  %v6339_v52 = vpop.eup %5593 }
 0x31c   : > { %706 = vadd.xlane.f32.xlu1 %v705_v29  ;;  %v1001_v44 = vpop.xlane.xlu1 %1000  ;;  %v702_v57 = vsel %vm452_vm1, %v6339_v52, 0.0 }
 0x31d   : > { %v1023_v46 = vsub.f32 %v6284_v33, %v1001_v44  ;;  %5601 = vpow2.f32 %v679_v41 }
 0x31e   : > { %v6344_v59 = vpop.eup %5595 }
 0x31f   : > { %v1031_v47 = vmul.f32 1.442695, %v1023_v46  ;;  %v1053_v60 = vsel %vm452_vm1, %v6344_v59, 0.0 }
 0x320   : > { %1057 = vadd.xlane.f32.xlu1 %v1056_v50  ;;  %v647_v31 = vpop.xlane.xlu1 %646 }
 0x321   : > { %5603 = vpow2.f32 %v1031_v47  ;;  %v669_v54 = vsub.f32 %v6290_v35, %v647_v31 }
 0x323   : > { %v677_v56 = vmul.f32 1.442695, %v669_v54 }
 0x324   : > { %703 = vadd.xlane.f32.xlu1 %v702_v57 }
 0x325   : > { %5605 = vpow2.f32 %v677_v56 }
 0x326   : > { %v6346_v33 = vpop.eup %5597 }
 0x327   : > { %v1050_v61 = vsel %vm452_vm1, %v6346_v33, 0.0  ;;  %v6352_v62 = vpop.eup %5599 }
 0x328   : > { %1054 = vadd.xlane.f32.xlu1 %v1053_v60  ;;  %1051 = vadd.xlane.f32.xlu0 %v1050_v61  ;;  %v699_v35 = vsel %vm452_vm1, %v6352_v62, 0.0 }
 0x32a   : > { %v6356_v63 = vpop.eup %5601 }
 0x32b   : > { %v696_v2 = vsel %vm452_vm1, %v6356_v63, 0.0 }
 0x32c   : > { %700 = vadd.xlane.f32.xlu1 %v699_v35 }
 0x32e   : > { %v6358_v1 = vpop.eup %5603 }
 0x32f   : > { %v1047_v3 = vsel %vm452_vm1, %v6358_v1, 0.0 }
 0x330   : > { %697 = vadd.xlane.f32.xlu1 %v696_v2  ;;  %1048 = vadd.xlane.f32.xlu0 %v1047_v3 }
 0x332   : > { %v6364_v4 = vpop.eup %5605 }
 0x333   : > { %v693_v5 = vsel %vm452_vm1, %v6364_v4, 0.0 }
 0x334   : > { %694 = vadd.xlane.f32.xlu1 %v693_v5 }
 0x345   : > { %1287 = vrot.lane.b32.xlu1 %v6176_v20, %s5999_s9 }
 0x346   : > { %1289 = vrot.lane.b32.xlu0 %v6182_v23, %s5999_s9 }
 0x349   : > { %1676 = vrot.lane.b32.xlu1 %v6172_v16, %s5999_s9 }
 0x34a   : > { %1312 = vrot.lane.b32.xlu0 %v6168_v13, %s5999_s9 }
 0x375   : > { %v710_v7 = vpop.xlane.xlu1 %709 }
 0x37d   : > { %v716_v9 = vpop.xlane.xlu1 %715 }
 0x37e   : > { %5607 = vrcp.f32 %v716_v9 }
 0x381   : > { %v713_v10 = vpop.xlane.xlu1 %712 }
 0x382   : > { %5609 = vrcp.f32 %v713_v10 }
 0x383   : > { %5611 = vrcp.f32 %v710_v7 }
 0x38b   : > { %v5608_v12 = vpop.eup %5607 }
 0x38c   : > { %v732_v8 = vmul.f32 %v5608_v12, %v6298_v53 }
 0x38e   : > { %5165 = vmatpush3.xpose.msk.msra.mxu0 %vm452_vm1, %v732_v8 }
 0x38f   : > { %v5610_v16 = vpop.eup %5609  ;;  %5166 = vmatprep.subr.mxu0 %v5998_v0 }
 0x390   : > { %v731_v13 = vmul.f32 %v5610_v16, %v6302_v55  ;;  %v5612_v11 = vpop.eup %5611 }
 0x391   : > { %v730_v15 = vmul.f32 %v5612_v11, %v6294_v49 }
 0x392   : > { %5167 = vmatpush3.xpose.msk.msra.mxu0 %vm452_vm1, %v731_v13 }
 0x393   : > { %5168 = vmatprep.subr.mxu0 %v5998_v0 }
 0x395   : > { %v1064_v58 = vpop.xlane.xlu1 %1063 }
 0x396   : > { %5169 = vmatpush3.xpose.msk.msra.mxu0 %vm452_vm1, %v730_v15 }
 0x397   : > { %5170 = vmatprep.subr.mxu0 %v5998_v0 }
 0x399   : > { %v1061_v53 = vpop.xlane.xlu1 %1060 }
 0x39d   : > { %v1070_v17 = vpop.xlane.xlu1 %1069 }
 0x39e   : > { %5613 = vrcp.f32 %v1070_v17 }
 0x3a1   : > { %v1067_v19 = vpop.xlane.xlu1 %1066 }
 0x3a2   : > { %5615 = vrcp.f32 %v1067_v19 }
 0x3a3   : > { %5617 = vrcp.f32 %v1064_v58 }
 0x3a5   : > { %v707_v21 = vpop.xlane.xlu1 %706 }
 0x3a6   : > { %5619 = vrcp.f32 %v707_v21 }
 0x3a7   : > { %5621 = vrcp.f32 %v1061_v53 }
 0x3a9   : > { %v1058_v55 = vpop.xlane.xlu1 %1057 }
 0x3aa   : > { %5623 = vrcp.f32 %v1058_v55 }
 0x3ab   : > { %v5614_v22 = vpop.eup %5613 }
 0x3ac   : > { %v1086_v24 = vmul.f32 %v5614_v22, %v6319_v26 }
 0x3ad   : > { %v704_v49 = vpop.xlane.xlu1 %703 }
 0x3ae   : > { %5625 = vrcp.f32 %v704_v49  ;;  %5198 = vmatpush3.xpose.msk.msra.mxu1 %vm452_vm1, %v1086_v24  ;;  %v6455_v49 = vld [vmem:[%s7558_s2 + $0x8] sm:$0xff] }
 0x3af   : > { %v5616_v51 = vpop.eup %5615  ;;  %5199 = vmatprep.subr.mxu1 %v5998_v0 }
 0x3b0   : > { %v1085_v28 = vmul.f32 %v5616_v51, %v6325_v36  ;;  %v5618_v30 = vpop.eup %5617 }
 0x3b1   : > { %v1055_v32 = vpop.xlane.xlu1 %1054  ;;  %v1052_v34 = vpop.xlane.xlu0 %1051  ;;  %v1084_v37 = vmul.f32 %v5618_v30, %v6309_v14 }
 0x3b2   : > { %5200 = vmatpush3.xpose.msk.msra.mxu1 %vm452_vm1, %v1085_v28  ;;  %5627 = vrcp.f32 %v1055_v32 }
 0x3b3   : > { %v5620_v25 = vpop.eup %5619  ;;  %5201 = vmatprep.subr.mxu1 %v5998_v0  ;;  %5629 = vrcp.f32 %v1052_v34 }
 0x3b4   : > { %v729_v26 = vmul.f32 %v5620_v25, %v6329_v39  ;;  %v5622_v38 = vpop.eup %5621 }
 0x3b5   : > { %v701_v40 = vpop.xlane.xlu1 %700  ;;  %v1083_v36 = vmul.f32 %v5622_v38, %v6314_v18 }
 0x3b6   : > { %5631 = vrcp.f32 %v701_v40  ;;  %5171 = vmatpush3.xpose.msk.msra.mxu0 %vm452_vm1, %v729_v26  ;;  %5202 = vmatpush3.xpose.msk.msra.mxu1 %vm452_vm1, %v1084_v37 }
 0x3b7   : > { %5203 = vmatprep.subr.mxu1 %v5998_v0  ;;  %5172 = vmatprep.subr.mxu0 %v5998_v0  ;;  %v5624_v27 = vpop.eup %5623 }
 0x3b8   : > { %v1082_v44 = vmul.f32 %v5624_v27, %v6334_v42 }
 0x3b9   : > { %v1049_v41 = vpop.xlane.xlu0 %1048  ;;  %v698_v29 = vpop.xlane.xlu1 %697 }
 0x3ba   : > { %5633 = vrcp.f32 %v1049_v41  ;;  %5204 = vmatpush3.xpose.msk.msra.mxu1 %vm452_vm1, %v1083_v36 }
 0x3bb   : > { %v5626_v14 = vpop.eup %5625  ;;  %5635 = vrcp.f32 %v698_v29  ;;  %5205 = vmatprep.subr.mxu1 %v5998_v0 }
 0x3bc   : > { %v728_v39 = vmul.f32 %v5626_v14, %v6339_v52 }
 0x3bd   : > { %v1290_v46 = vpop.permute.xlu0 %1289  ;;  %v695_v47 = vpop.xlane.xlu1 %694 }
 0x3be   : > { %v1300_v50 = vadd.f32 %v1290_v46, %v6182_v23  ;;  %5637 = vrcp.f32 %v695_v47  ;;  %5173 = vmatpush3.xpose.msk.msra.mxu0 %vm452_vm1, %v728_v39  ;;  %5206 = vmatpush3.xpose.msk.msra.mxu1 %vm452_vm1, %v1082_v44 }
 0x3bf   : > { %5207 = vmatprep.subr.mxu1 %v5998_v0  ;;  %5174 = vmatprep.subr.mxu0 %v5998_v0  ;;  %v5628_v18 = vpop.eup %5627 }
 0x3c0   : > { %v1304_v31 = vadd.f32 %v1300_v50, %v1290_v46  ;;  %v1081_v52 = vmul.f32 %v5628_v18, %v6344_v59  ;;  %v5630_v56 = vpop.eup %5629 }
 0x3c1   : > { %v1288_v54 = vpop.permute.xlu1 %1287  ;;  %v1080_v35 = vmul.f32 %v5630_v56, %v6346_v33 }
 0x3c2   : > { %v1299_v42 = vadd.f32 %v1288_v54, %v6176_v20  ;;  %v1308_v57 = vmul.f32 0.33333334, %v1304_v31  ;;  %5208 = vmatpush3.xpose.msk.msra.mxu1 %vm452_vm1, %v1081_v52 }
 0x3c3   : > { %v5632_v60 = vpop.eup %5631  ;;  %5209 = vmatprep.subr.mxu1 %v5998_v0 }
 0x3c4   : > { %v1303_v23 = vadd.f32 %v1299_v42, %v1288_v54  ;;  %1712 = vrot.lane.b32.xlu1 %v1308_v57, %s5999_s9  ;;  %v727_v61 = vmul.f32 %v5632_v60, %v6352_v62 }
 0x3c6   : > { %5175 = vmatpush3.xpose.msk.msra.mxu0 %vm452_vm1, %v727_v61  ;;  %v1307_v2 = vmul.f32 0.33333334, %v1303_v23  ;;  %5210 = vmatpush3.xpose.msk.msra.mxu1 %vm452_vm1, %v1080_v35 }
 0x3c7   : > { %v5634_v59 = vpop.eup %5633  ;;  %5176 = vmatprep.subr.mxu0 %v5998_v0  ;;  %5211 = vmatprep.subr.mxu1 %v5998_v0 }
 0x3c8   : > { %v5636_v20 = vpop.eup %5635  ;;  %1348 = vrot.lane.b32.xlu0 %v1307_v2, %s5999_s9  ;;  %v1079_v3 = vmul.f32 %v5634_v59, %v6358_v1  ;;  %v1313_v1 = vpop.permute.xlu0 %1312 }
 0x3c9   : > { %v726_v5 = vmul.f32 %v5636_v20, %v6356_v63  ;;  %v1677_v63 = vpop.permute.xlu1 %1676 }
 0x3ca   : > { %5212 = vmatpush3.xpose.msk.msra.mxu1 %vm452_vm1, %v1079_v3 }
 0x3cb   : > { %v5638_v62 = vpop.eup %5637  ;;  %5177 = vmatpush3.xpose.msk.msra.mxu0 %vm452_vm1, %v726_v5 }
 0x3cc   : > { %5178 = vmatprep.subr.mxu0 %v5998_v0  ;;  %v725_v33 = vmul.f32 %v5638_v62, %v6364_v4 }
 0x3cd   : > { %5214 = vmatmul.mubr.msk.f32.vlgmr.msra.gmra.mxu1 %vm452_vm1, %v6210_v45 }
 0x3cf   : > { %5179 = vmatpush3.xpose.msk.msra.mxu0 %vm452_vm1, %v725_v33 }
 0x3d2   : > { %5181 = vmatmul.mubr.msk.f32.vlgmr.msra.gmra.mxu0 %vm452_vm1, %v6207_v43 }
 0x3d3   : > { %5220 = vmatprep.mubr.msk.f32.mxu0 %vm235_vm0, %v6437_v6 }
 0x3e6   : > { %1315 = vxpose.xlu0.b32.start.end [1/1] (short) (narrow) %v1313_v1, 64 }
 0x3ed   : > { %1679 = vxpose.xlu1.b32.start.end [1/1] (short) (narrow) %v1677_v63, 64 }
 0x436   : > { %v1713_v4 = vpop.permute.xlu1 %1712 }
 0x437   : > { %5256 = vmatprep.subr.mxu1 %v1713_v4 }
 0x438   : > { %5257 = vmatpush3.msra.mxu1 %v1713_v4 }
 0x439   : > { %5270 = vmatprep.subr.mxu1 %v5998_v0 }
 0x43a   : > { %v1349_v12 = vpop.permute.xlu0 %1348 }
 0x462   : > { %v1331_v16 = vpop.trf.xlu0 }
 0x466   : > { %v1332_v15 = vpop.trf.xlu0 }
 0x469   : > { %v1695_v7 = vpop.trf.xlu1 }
 0x46a   : > { %5258 = vmatprep.mubr.msk.f32.mxu1 %vm507_vm2, %v1695_v7  ;;  %v1333_v53 = vpop.trf.xlu0 }
 0x46d   : > { %v1696_v9 = vpop.trf.xlu1 }
 0x46e   : > { %5259 = vmatmul.mubr.msk.f32.vlgmr.msra.gmra.mxu1 %vm507_vm2, %v1696_v9  ;;  %v1334_v19 = vpop.trf.xlu0 }
 0x471   : > { %v1697_v10 = vpop.trf.xlu1 }
 0x472   : > { %5261 = vmatprep.mubr.msk.f32.mxu1 %vm507_vm2, %v1697_v10  ;;  %v1335_v22 = vpop.trf.xlu0 }
 0x475   : > { %v1698_v8 = vpop.trf.xlu1 }
 0x476   : > { %5262 = vmatmul.mubr.msk.f32.gmra.mxu1 %vm507_vm2, %v1698_v8  ;;  %v1336_v28 = vpop.trf.xlu0 }
 0x479   : > { %v1699_v13 = vpop.trf.xlu1 }
 0x47a   : > { %5264 = vmatprep.mubr.msk.f32.mxu1 %vm507_vm2, %v1699_v13  ;;  %v1337_v30 = vpop.trf.xlu0 }
 0x47d   : > { %v1700_v11 = vpop.trf.xlu1 }
 0x47e   : > { %5265 = vmatmul.mubr.msk.f32.gmra.mxu1 %vm507_vm2, %v1700_v11  ;;  %v1338_v32 = vpop.trf.xlu0 }
 0x481   : > { %v1701_v58 = vpop.trf.xlu1 }
 0x482   : > { %5267 = vmatprep.mubr.msk.f32.mxu1 %vm507_vm2, %v1701_v58 }
 0x485   : > { %v1702_v17 = vpop.trf.xlu1 }
 0x486   : > { %5268 = vmatmul.mubr.msk.f32.gmra.mxu1 %vm507_vm2, %v1702_v17 }
 0x487   : > { %5286 = vmatprep.mubr.msk.f32.mxu1 %vm6000_vm4, %v5998_v0 }
 0x48d   : > { %v1180_v21 = vpop.f32.mrf.mxu1 }
 0x48e   : > { %5216 = vmatprep.subr.mxu0 %v1180_v21 }
 0x48f   : > { %v5215_v55 = vpop.f32.mrf.mxu1  ;;  %5217 = vmatpush3.msra.mxu0 %v1180_v21 }
 0x492   : > { %v826_v24 = vpop.f32.mrf.mxu0 }
 0x493   : > { %5218 = vmatprep.subr.mxu0 %v826_v24 }
 0x494   : > { %v5182_v51 = vpop.f32.mrf.mxu0  ;;  %5219 = vmatpush3.msra.mxu0 %v826_v24 }
 0x495   : > { %5221 = vmatmul.mubr.msk.f32.vlgmr.msra.gmra.mxu0 %vm235_vm0, %v6455_v49  ;;  %5223 = vmatprep.subr.mxu0 %v1349_v12 }
 0x496   : > { %5224 = vmatpush3.msra.mxu0 %v1349_v12  ;;  %5225 = vmatprep.mubr.msk.f32.mxu0 %vm507_vm2, %v1331_v16 }
 0x497   : > { %5237 = vmatprep.subr.mxu0 %v5998_v0 }
 0x499   : > { %5226 = vmatmul.mubr.msk.f32.vlgmr.msra.gmra.mxu0 %vm507_vm2, %v1332_v15 }
 0x49a   : > { %5228 = vmatprep.mubr.msk.f32.mxu0 %vm507_vm2, %v1333_v53 }
 0x49d   : > { %5229 = vmatmul.mubr.msk.f32.gmra.mxu0 %vm507_vm2, %v1334_v19 }
 0x49e   : > { %5231 = vmatprep.mubr.msk.f32.mxu0 %vm507_vm2, %v1335_v22 }
 0x4a1   : > { %5232 = vmatmul.mubr.msk.f32.gmra.mxu0 %vm507_vm2, %v1336_v28 }
 0x4a2   : > { %5234 = vmatprep.mubr.msk.f32.mxu0 %vm507_vm2, %v1337_v30 }
 0x4a5   : > { %5235 = vmatmul.mubr.msk.f32.gmra.mxu0 %vm507_vm2, %v1338_v32 }
 0x4a6   : > { %5253 = vmatprep.mubr.msk.f32.mxu0 %vm6000_vm4, %v5998_v0 }
 0x52e   : > { %v5260_v34 = vpop.f32.mrf.mxu1 }
 0x52f   : > { %v6512_v23 = vsel %vm228_vm3, %v5260_v34, -1e+30 }
 0x530   : > { %v1805_v25 = vpop.f32.mrf.mxu1  ;;  %v1855_v2 = vsel %vm452_vm1, %v6512_v23, -inf }
 0x531   : > { %v6518_v59 = vsel %vm228_vm3, %v1805_v25, -1e+30 }
 0x532   : > { %v1852_v5 = vsel %vm452_vm1, %v6518_v59, -inf }
 0x536   : > { %v5263_v26 = vpop.f32.mrf.mxu1 }
 0x537   : > { %v6496_v18 = vsel %vm228_vm3, %v5263_v26, -1e+30 }
 0x538   : > { %v1815_v37 = vpop.f32.mrf.mxu1  ;;  %v1861_v54 = vsel %vm452_vm1, %v6496_v18, -inf }
 0x539   : > { %v6506_v56 = vsel %vm228_vm3, %v1815_v37, -1e+30 }
 0x53a   : > { %v1858_v60 = vsel %vm452_vm1, %v6506_v56, -inf }
 0x53e   : > { %v5266_v38 = vpop.f32.mrf.mxu1 }
 0x53f   : > { %v6484_v44 = vsel %vm228_vm3, %v5266_v38, -1e+30 }
 0x540   : > { %v1825_v40 = vpop.f32.mrf.mxu1  ;;  %v1867_v46 = vsel %vm452_vm1, %v6484_v44, -inf }
 0x541   : > { %v6490_v47 = vsel %vm228_vm3, %v1825_v40, -1e+30 }
 0x542   : > { %v1864_v50 = vsel %vm452_vm1, %v6490_v47, -inf }
 0x546   : > { %v5269_v36 = vpop.f32.mrf.mxu1 }
 0x547   : > { %v6472_v27 = vsel %vm228_vm3, %v5269_v36, -1e+30 }
 0x548   : > { %v1873_v41 = vsel %vm452_vm1, %v6472_v27, -inf  ;;  %v1835_v29 = vpop.f32.mrf.mxu1 }
 0x549   : > { %1874 = vmax.xlane.f32.xlu0 %v1873_v41  ;;  %v6478_v14 = vsel %vm228_vm3, %v1835_v29, -1e+30 }
 0x54a   : > { %v1870_v39 = vsel %vm452_vm1, %v6478_v14, -inf }
 0x54d   : > { %1871 = vmax.xlane.f32.xlu0 %v1870_v39 }
 0x551   : > { %1868 = vmax.xlane.f32.xlu0 %v1867_v46 }
 0x555   : > { %v6498_v31 = vpop.f32.mrf.mxu0  ;;  %1865 = vmax.xlane.f32.xlu0 %v1864_v50 }
 0x557   : > { %v6502_v52 = vpop.f32.mrf.mxu0 }
 0x559   : > { %v5227_v42 = vpop.f32.mrf.mxu0  ;;  %1862 = vmax.xlane.f32.xlu0 %v1861_v54 }
 0x55a   : > { %v6550_v58 = vsel %vm228_vm3, %v5227_v42, -1e+30 }
 0x55b   : > { %v1441_v57 = vpop.f32.mrf.mxu0  ;;  %v1491_v53 = vsel %vm452_vm1, %v6550_v58, -inf }
 0x55c   : > { %v6556_v17 = vsel %vm228_vm3, %v1441_v57, -1e+30 }
 0x55d   : > { %v5230_v61 = vpop.f32.mrf.mxu0  ;;  %1859 = vmax.xlane.f32.xlu0 %v1858_v60  ;;  %v1488_v19 = vsel %vm452_vm1, %v6556_v17, -inf }
 0x55e   : > { %v6536_v16 = vsel %vm228_vm3, %v5230_v61, -1e+30 }
 0x55f   : > { %v1451_v35 = vpop.f32.mrf.mxu0  ;;  %v1497_v13 = vsel %vm452_vm1, %v6536_v16, -inf }
 0x560   : > { %v6542_v11 = vsel %vm228_vm3, %v1451_v35, -1e+30 }
 0x561   : > { %v5233_v20 = vpop.f32.mrf.mxu0  ;;  %1856 = vmax.xlane.f32.xlu0 %v1855_v2  ;;  %v1494_v15 = vsel %vm452_vm1, %v6542_v11, -inf }
 0x562   : > { %v1485_v9 = vsel %vm228_vm3, %v5233_v20, -1e+30 }
 0x563   : > { %v1461_v3 = vpop.f32.mrf.mxu0  ;;  %v1503_v10 = vsel %vm452_vm1, %v1485_v9, -inf }
 0x564   : > { %v1484_v12 = vsel %vm228_vm3, %v1461_v3, -1e+30 }
 0x565   : > { %v5236_v62 = vpop.f32.mrf.mxu0  ;;  %1853 = vmax.xlane.f32.xlu0 %v1852_v5  ;;  %v1500_v8 = vsel %vm452_vm1, %v1484_v12, -inf }
 0x566   : > { %v1487_v33 = vsel %vm228_vm3, %v5236_v62, -1e+30 }
 0x567   : > { %v1471_v1 = vpop.f32.mrf.mxu0  ;;  %v1509_v63 = vsel %vm452_vm1, %v1487_v33, -inf }
 0x568   : > { %v1486_v4 = vsel %vm228_vm3, %v1471_v1, -1e+30  ;;  %1510 = vmax.xlane.f32.xlu1 %v1509_v63 }
 0x569   : > { %v1506_v7 = vsel %vm452_vm1, %v1486_v4, -inf }
 0x56c   : > { %1507 = vmax.xlane.f32.xlu1 %v1506_v7 }
 0x570   : > { %1504 = vmax.xlane.f32.xlu1 %v1503_v10 }
 0x574   : > { %1501 = vmax.xlane.f32.xlu1 %v1500_v8 }
 0x578   : > { %1498 = vmax.xlane.f32.xlu1 %v1497_v13 }
 0x57b   : > { %1293 = vrot.lane.b32.xlu0 %v6210_v45, %s5999_s9 }
 0x57c   : > { %1495 = vmax.xlane.f32.xlu1 %v1494_v15 }
 0x580   : > { %1492 = vmax.xlane.f32.xlu1 %v1491_v53 }
 0x584   : > { %1489 = vmax.xlane.f32.xlu1 %v1488_v19 }
 0x595   : > { %1291 = vrot.lane.b32.xlu1 %v6207_v43, %s5999_s9 }
 0x5d2   : > { %v1875_v45 = vpop.xlane.xlu0 %1874 }
 0x5d3   : > { %v1883_v21 = vsub.f32 %v6472_v27, %v1875_v45 }
 0x5d5   : > { %v1898_v55 = vmul.f32 1.442695, %v1883_v21 }
 0x5d6   : > { %v1872_v22 = vpop.xlane.xlu0 %1871 }
 0x5d7   : > { %5639 = vpow2.f32 %v1898_v55  ;;  %v1882_v32 = vsub.f32 %v6478_v14, %v1872_v22 }
 0x5d9   : > { %v1896_v43 = vmul.f32 1.442695, %v1882_v32 }
 0x5da   : > { %v1869_v28 = vpop.xlane.xlu0 %1868 }
 0x5db   : > { %v1881_v37 = vsub.f32 %v6484_v44, %v1869_v28 }
 0x5dd   : > { %v1894_v27 = vmul.f32 1.442695, %v1881_v37 }
 0x5de   : > { %v1866_v30 = vpop.xlane.xlu0 %1865 }
 0x5df   : > { %v1880_v36 = vsub.f32 %v6490_v47, %v1866_v30 }
 0x5e1   : > { %v1892_v50 = vmul.f32 1.442695, %v1880_v36 }
 0x5e2   : > { %v1863_v25 = vpop.xlane.xlu0 %1862 }
 0x5e3   : > { %v1879_v14 = vsub.f32 %v6496_v18, %v1863_v25 }
 0x5e4   : > { %v6563_v24 = vpop.eup %5639 }
 0x5e5   : > { %v1921_v51 = vsel %vm452_vm1, %v6563_v24, 0.0  ;;  %v1890_v61 = vmul.f32 1.442695, %v1879_v14 }
 0x5e6   : > { %1922 = vadd.xlane.f32.xlu1 %v1921_v51  ;;  %v1860_v41 = vpop.xlane.xlu0 %1859 }
 0x5e7   : > { %v1878_v47 = vsub.f32 %v6506_v56, %v1860_v41 }
 0x5e9   : > { %v1888_v18 = vmul.f32 1.442695, %v1878_v47 }
 0x5ea   : > { %v1857_v60 = vpop.xlane.xlu0 %1856 }
 0x5eb   : > { %v1877_v5 = vsub.f32 %v6512_v23, %v1857_v60  ;;  %v5896_v60 = vld [vmem:[#allocation2 + $0x78] sm:$0xff] }
 0x5ed   : > { %v1886_v7 = vmul.f32 1.442695, %v1877_v5  ;;  %v6648_v5 = vld [vmem:[#allocation2 + $0x8] sm:$0xff] }
 0x5ee   : > { %v1854_v62 = vpop.xlane.xlu0 %1853 }
 0x5f1   : > { %v1511_v34 = vpop.xlane.xlu1 %1510 }
 0x5f2   : > { %v1519_v26 = vsub.f32 %v1487_v33, %v1511_v34 }
 0x5f4   : > { %v1534_v38 = vmul.f32 1.442695, %v1519_v26 }
 0x5f5   : > { %v1508_v40 = vpop.xlane.xlu1 %1507 }
 0x5f6   : > { %5641 = vpow2.f32 %v1534_v38  ;;  %v1518_v29 = vsub.f32 %v1486_v4, %v1508_v40 }
 0x5f7   : > { %5643 = vpow2.f32 %v1896_v43 }
 0x5f8   : > { %5645 = vpow2.f32 %v1894_v27  ;;  %v1532_v54 = vmul.f32 1.442695, %v1518_v29 }
 0x5f9   : > { %v1505_v39 = vpop.xlane.xlu1 %1504 }
 0x5fa   : > { %v1517_v46 = vsub.f32 %v1485_v9, %v1505_v39  ;;  %v1876_v9 = vsub.f32 %v6518_v59, %v1854_v62  ;;  %v6651_v62 = vld [vmem:[#allocation2 + $0x20] sm:$0xff] }
 0x5fc   : > { %v1530_v42 = vmul.f32 1.442695, %v1517_v46  ;;  %v1884_v15 = vmul.f32 1.442695, %v1876_v9 }
 0x5fd   : > { %v1502_v57 = vpop.xlane.xlu1 %1501 }
 0x5fe   : > { %5647 = vpow2.f32 %v1530_v42  ;;  %v1516_v44 = vsub.f32 %v1484_v12, %v1502_v57  ;;  %v5895_v42 = vld [vmem:[#allocation2 + $0x60] sm:$0xff] }
 0x5ff   : > { %5649 = vpow2.f32 %v1892_v50 }
 0x600   : > { %5651 = vpow2.f32 %v1532_v54  ;;  %v1528_v35 = vmul.f32 1.442695, %v1516_v44  ;;  %v1294_v54 = vpop.permute.xlu0 %1293 }
 0x601   : > { %v1499_v2 = vpop.xlane.xlu1 %1498  ;;  %5653 = vpow2.f32 %v1890_v61  ;;  %v1302_v44 = vadd.f32 %v5896_v60, %v1294_v54 }
 0x602   : > { %v1515_v20 = vsub.f32 %v6536_v16, %v1499_v2  ;;  %5655 = vpow2.f32 %v1528_v35 }
 0x603   : > { %v6573_v3 = vpop.eup %5641  ;;  %5657 = vpow2.f32 %v1888_v18  ;;  %v1306_v47 = vadd.f32 %v1302_v44, %v1294_v54  ;;  %v6644_v18 = vld [vmem:[#allocation2 + $0x30] sm:$0xff] }
 0x604   : > { %v1526_v33 = vmul.f32 1.442695, %v1515_v20  ;;  %v1557_v1 = vsel %vm452_vm1, %v6573_v3, 0.0  ;;  %v6578_v63 = vpop.eup %5643  ;;  %v6640_v20 = vld [vmem:[#allocation2 + $0x48] sm:$0xff] }
 0x605   : > { %1558 = vadd.xlane.f32.xlu0 %v1557_v1  ;;  %v1496_v56 = vpop.xlane.xlu1 %1495  ;;  %v1918_v23 = vsel %vm452_vm1, %v6578_v63, 0.0  ;;  %v6584_v12 = vpop.eup %5645  ;;  %v1310_v2 = vmul.f32 0.33333334, %v1306_v47 }
 0x606   : > { %v1514_v4 = vsub.f32 %v6542_v11, %v1496_v56  ;;  %5659 = vpow2.f32 %v1526_v33  ;;  %v1915_v59 = vsel %vm452_vm1, %v6584_v12, 0.0 }
 0x607   : > { %5661 = vpow2.f32 %v1886_v7 }
 0x608   : > { %v1524_v10 = vmul.f32 1.442695, %v1514_v4 }
 0x609   : > { %1919 = vadd.xlane.f32.xlu0 %v1918_v23  ;;  %v1493_v8 = vpop.xlane.xlu1 %1492 }
 0x60a   : > { %v1513_v16 = vsub.f32 %v6550_v58, %v1493_v8  ;;  %5663 = vpow2.f32 %v1524_v10 }
 0x60b   : > { %v6587_v13 = vpop.eup %5647  ;;  %5665 = vpow2.f32 %v1884_v15 }
 0x60c   : > { %v6589_v11 = vpop.eup %5649  ;;  %v1522_v53 = vmul.f32 1.442695, %v1513_v16  ;;  %v1551_v19 = vsel %vm452_vm1, %v6587_v13, 0.0 }
 0x60d   : > { %v6595_v45 = vpop.eup %5651  ;;  %1916 = vadd.xlane.f32.xlu0 %v1915_v59  ;;  %1552 = vadd.xlane.f32.xlu1 %v1551_v19  ;;  %v1490_v21 = vpop.xlane.xlu1 %1489  ;;  %v1912_v51 = vsel %vm452_vm1, %v6589_v11, 0.0 }
 0x60e   : > { %v1512_v58 = vsub.f32 %v6556_v17, %v1490_v21  ;;  %v6598_v55 = vpop.eup %5653  ;;  %5667 = vpow2.f32 %v1522_v53  ;;  %v1554_v28 = vsel %vm452_vm1, %v6595_v45, 0.0 }
 0x60f   : > { %v6604_v30 = vpop.eup %5655  ;;  %v1909_v17 = vsel %vm452_vm1, %v6598_v55, 0.0 }
 0x610   : > { %v1520_v22 = vmul.f32 1.442695, %v1512_v58  ;;  %v6606_v32 = vpop.eup %5657  ;;  %v1548_v34 = vsel %vm452_vm1, %v6604_v30, 0.0 }
 0x611   : > { %1913 = vadd.xlane.f32.xlu0 %v1912_v51  ;;  %1555 = vadd.xlane.f32.xlu1 %v1554_v28  ;;  %v1906_v43 = vsel %vm452_vm1, %v6606_v32, 0.0  ;;  %v1292_v14 = vpop.permute.xlu1 %1291 }
 0x612   : > { %5669 = vpow2.f32 %v1520_v22  ;;  %v1301_v57 = vadd.f32 %v5895_v42, %v1292_v14  ;;  %v6680_v42 = vld [vmem:[#allocation2 + $0x50] sm:$0xff] }
 0x613   : > { %v6612_v25 = vpop.eup %5659  ;;  %v2136_v60 = vadd.f32 %v6640_v20, %v6680_v42 }
 0x614   : > { %v6614_v26 = vpop.eup %5661  ;;  %v1545_v37 = vsel %vm452_vm1, %v6612_v25, 0.0  ;;  %v1305_v61 = vadd.f32 %v1301_v57, %v1292_v14 }
 0x615   : > { %1910 = vadd.xlane.f32.xlu0 %v1909_v17  ;;  %1549 = vadd.xlane.f32.xlu1 %v1548_v34  ;;  %v1903_v36 = vsel %vm452_vm1, %v6614_v26, 0.0 }
 0x616   : > { %v1309_v35 = vmul.f32 0.33333334, %v1305_v61 }
 0x617   : > { %v6620_v38 = vpop.eup %5663 }
 0x618   : > { %v6622_v40 = vpop.eup %5665  ;;  %v1542_v27 = vsel %vm452_vm1, %v6620_v38, 0.0 }
 0x619   : > { %1907 = vadd.xlane.f32.xlu0 %v1906_v43  ;;  %1546 = vadd.xlane.f32.xlu1 %v1545_v37  ;;  %v1900_v29 = vsel %vm452_vm1, %v6622_v40, 0.0 }
 0x61b   : > { %v6628_v41 = vpop.eup %5667 }
 0x61c   : > { %v1539_v39 = vsel %vm452_vm1, %v6628_v41, 0.0 }
 0x61d   : > { %1904 = vadd.xlane.f32.xlu0 %v1903_v36  ;;  %1543 = vadd.xlane.f32.xlu1 %v1542_v27 }
 0x61f   : > { %v6634_v46 = vpop.eup %5669 }
 0x620   : > { %v1536_v50 = vsel %vm452_vm1, %v6634_v46, 0.0 }
 0x621   : > { %1901 = vadd.xlane.f32.xlu0 %v1900_v29  ;;  %1540 = vadd.xlane.f32.xlu1 %v1539_v39 }
 0x625   : > { %1537 = vadd.xlane.f32.xlu1 %v1536_v50 }
 0x636   : > { %1577 = vrot.lane.b32.xlu1 %v1309_v35, %s5999_s9 }
 0x637   : > { %1941 = vrot.lane.b32.xlu0 %v1310_v2, %s5999_s9 }
 0x63a   : > { %2145 = vrot.lane.b32.xlu1 %v6640_v20, %s5999_s9 }
 0x63b   : > { %2143 = vrot.lane.b32.xlu0 %v6644_v18, %s5999_s9 }
 0x659   : > { %2163 = vxpose.xlu0.b32.start.end [1/1] (short) (narrow) %v6648_v5, 64 }
 0x663   : > { %2517 = vxpose.xlu1.b32.start.end [1/1] (short) (narrow) %v6651_v62, 64 }
 0x66f   : > { %v1923_v33 = vpop.xlane.xlu1 %1922 }
 0x670   : > { %5671 = vrcp.f32 %v1923_v33 }
 0x67d   : > { %v5672_v1 = vpop.eup %5671 }
 0x67e   : > { %v1939_v56 = vmul.f32 %v5672_v1, %v6563_v24 }
 0x680   : > { %5271 = vmatpush3.xpose.msk.msra.mxu1 %vm452_vm1, %v1939_v56 }
 0x681   : > { %5272 = vmatprep.subr.mxu1 %v5998_v0 }
 0x68e   : > { %v1559_v4 = vpop.xlane.xlu0 %1558 }
 0x68f   : > { %5673 = vrcp.f32 %v1559_v4 }
 0x692   : > { %v1920_v7 = vpop.xlane.xlu0 %1919 }
 0x693   : > { %5675 = vrcp.f32 %v1920_v7 }
 0x696   : > { %v1917_v9 = vpop.xlane.xlu0 %1916  ;;  %v1553_v10 = vpop.xlane.xlu1 %1552 }
 0x697   : > { %5677 = vrcp.f32 %v1917_v9 }
 0x69a   : > { %v1914_v23 = vpop.xlane.xlu0 %1913  ;;  %v1556_v8 = vpop.xlane.xlu1 %1555 }
 0x69b   : > { %5679 = vrcp.f32 %v1914_v23 }
 0x69c   : > { %v5674_v16 = vpop.eup %5673  ;;  %5681 = vrcp.f32 %v1556_v8 }
 0x69d   : > { %v1575_v15 = vmul.f32 %v5674_v16, %v6573_v3  ;;  %5683 = vrcp.f32 %v1553_v10 }
 0x69e   : > { %v1911_v24 = vpop.xlane.xlu0 %1910  ;;  %v1550_v53 = vpop.xlane.xlu1 %1549 }
 0x69f   : > { %5685 = vrcp.f32 %v1911_v24  ;;  %5238 = vmatpush3.xpose.msk.msra.mxu0 %vm452_vm1, %v1575_v15 }
 0x6a0   : > { %v5676_v59 = vpop.eup %5675  ;;  %5239 = vmatprep.subr.mxu0 %v5998_v0  ;;  %5687 = vrcp.f32 %v1550_v53 }
 0x6a1   : > { %v1938_v19 = vmul.f32 %v5676_v59, %v6578_v63  ;;  %v6719_v59 = vld [vmem:[#allocation2 + $0x38] sm:$0xff] }
 0x6a2   : > { %v1908_v21 = vpop.xlane.xlu0 %1907  ;;  %v1547_v58 = vpop.xlane.xlu1 %1546 }
 0x6a3   : > { %5689 = vrcp.f32 %v1908_v21  ;;  %5273 = vmatpush3.xpose.msk.msra.mxu1 %vm452_vm1, %v1938_v19 }
 0x6a4   : > { %v5678_v22 = vpop.eup %5677  ;;  %5274 = vmatprep.subr.mxu1 %v5998_v0  ;;  %5691 = vrcp.f32 %v1547_v58  ;;  %v2135_v58 = vadd.f32 %v6644_v18, %v6719_v59 }
 0x6a5   : > { %v1937_v3 = vmul.f32 %v5678_v22, %v6584_v12 }
 0x6a6   : > { %v1905_v51 = vpop.xlane.xlu0 %1904  ;;  %v1544_v28 = vpop.xlane.xlu1 %1543 }
 0x6a7   : > { %5693 = vrcp.f32 %v1905_v51  ;;  %5275 = vmatpush3.xpose.msk.msra.mxu1 %vm452_vm1, %v1937_v3 }
 0x6a8   : > { %v5680_v17 = vpop.eup %5679  ;;  %5276 = vmatprep.subr.mxu1 %v5998_v0  ;;  %5695 = vrcp.f32 %v1544_v28 }
 0x6a9   : > { %v5682_v63 = vpop.eup %5681  ;;  %v1936_v34 = vmul.f32 %v5680_v17, %v6589_v11 }
 0x6aa   : > { %v1902_v43 = vpop.xlane.xlu0 %1901  ;;  %v1541_v37 = vpop.xlane.xlu1 %1540  ;;  %v1574_v36 = vmul.f32 %v5682_v63, %v6595_v45 }
 0x6ab   : > { %v5684_v27 = vpop.eup %5683  ;;  %5697 = vrcp.f32 %v1902_v43  ;;  %5277 = vmatpush3.xpose.msk.msra.mxu1 %vm452_vm1, %v1936_v34 }
 0x6ac   : > { %v5686_v12 = vpop.eup %5685  ;;  %5240 = vmatpush3.xpose.msk.msra.mxu0 %vm452_vm1, %v1574_v36  ;;  %5278 = vmatprep.subr.mxu1 %v5998_v0  ;;  %5699 = vrcp.f32 %v1541_v37  ;;  %v1573_v39 = vmul.f32 %v5684_v27, %v6587_v13 }
 0x6ad   : > { %5241 = vmatprep.subr.mxu0 %v5998_v0  ;;  %v1935_v29 = vmul.f32 %v5686_v12, %v6598_v55  ;;  %v5688_v50 = vpop.eup %5687 }
 0x6ae   : > { %v1538_v11 = vpop.xlane.xlu1 %1537  ;;  %v1572_v55 = vmul.f32 %v5688_v50, %v6604_v30 }
 0x6af   : > { %5279 = vmatpush3.xpose.msk.msra.mxu1 %vm452_vm1, %v1935_v29  ;;  %5701 = vrcp.f32 %v1538_v11 }
 0x6b0   : > { %v5690_v45 = vpop.eup %5689  ;;  %5242 = vmatpush3.xpose.msk.msra.mxu0 %vm452_vm1, %v1573_v39  ;;  %5280 = vmatprep.subr.mxu1 %v5998_v0 }
 0x6b1   : > { %5243 = vmatprep.subr.mxu0 %v5998_v0  ;;  %v1934_v14 = vmul.f32 %v5690_v45, %v6606_v32  ;;  %v5692_v57 = vpop.eup %5691 }
 0x6b2   : > { %v1578_v54 = vpop.permute.xlu1 %1577  ;;  %v1571_v30 = vmul.f32 %v5692_v57, %v6612_v25  ;;  %v1942_v25 = vpop.permute.xlu0 %1941 }
 0x6b3   : > { %5281 = vmatpush3.xpose.msk.msra.mxu1 %vm452_vm1, %v1934_v14 }
 0x6b4   : > { %v5694_v13 = vpop.eup %5693  ;;  %5244 = vmatpush3.xpose.msk.msra.mxu0 %vm452_vm1, %v1572_v55  ;;  %5282 = vmatprep.subr.mxu1 %v5998_v0 }
 0x6b5   : > { %5245 = vmatprep.subr.mxu0 %v5998_v0  ;;  %v1933_v32 = vmul.f32 %v5694_v13, %v6614_v26  ;;  %v5696_v61 = vpop.eup %5695 }
 0x6b6   : > { %v2146_v44 = vpop.permute.xlu1 %2145  ;;  %v1570_v1 = vmul.f32 %v5696_v61, %v6620_v38  ;;  %v2144_v8 = vpop.permute.xlu0 %2143 }
 0x6b7   : > { %v2156_v47 = vadd.f32 %v2146_v44, %v2136_v60  ;;  %5283 = vmatpush3.xpose.msk.msra.mxu1 %vm452_vm1, %v1933_v32  ;;  %v2155_v22 = vadd.f32 %v2144_v8, %v2135_v58 }
 0x6b8   : > { %v5698_v35 = vpop.eup %5697  ;;  %5246 = vmatpush3.xpose.msk.msra.mxu0 %vm452_vm1, %v1571_v30  ;;  %5284 = vmatprep.subr.mxu1 %v5998_v0 }
 0x6b9   : > { %v2160_v2 = vmul.f32 0.33333334, %v2156_v47  ;;  %5247 = vmatprep.subr.mxu0 %v5998_v0  ;;  %v1932_v33 = vmul.f32 %v5698_v35, %v6622_v40  ;;  %v5700_v26 = vpop.eup %5699  ;;  %v2159_v28 = vmul.f32 0.33333334, %v2155_v22 }
 0x6ba   : > { %v1569_v56 = vmul.f32 %v5700_v26, %v6628_v41 }
 0x6bb   : > { %5285 = vmatpush3.xpose.msk.msra.mxu1 %vm452_vm1, %v1932_v33 }
 0x6bc   : > { %5248 = vmatpush3.xpose.msk.msra.mxu0 %vm452_vm1, %v1570_v1  ;;  %5329 = vmatprep.subr.mxu1 %v2160_v2  ;;  %v5702_v4 = vpop.eup %5701 }
 0x6bd   : > { %5249 = vmatprep.subr.mxu0 %v5998_v0  ;;  %v1568_v38 = vmul.f32 %v5702_v4, %v6634_v46 }
 0x6be   : > { %5287 = vmatmul.mubr.msk.f32.vlgmr.msra.gmra.mxu1 %vm452_vm1, %v1942_v25 }
 0x6bf   : > { %5330 = vmatpush3.msra.mxu1 %v2160_v2 }
 0x6c0   : > { %5250 = vmatpush3.xpose.msk.msra.mxu0 %vm452_vm1, %v1569_v56  ;;  %5343 = vmatprep.subr.mxu1 %v5998_v0 }
 0x6c1   : > { %5251 = vmatprep.subr.mxu0 %v5998_v0 }
 0x6c4   : > { %5252 = vmatpush3.xpose.msk.msra.mxu0 %vm452_vm1, %v1568_v38 }
 0x6c7   : > { %5254 = vmatmul.mubr.msk.f32.vlgmr.msra.gmra.mxu0 %vm452_vm1, %v1578_v54 }
 0x6c8   : > { %5293 = vmatprep.mubr.msk.f32.mxu0 %vm235_vm0, %v6437_v6 }
 0x6d5   : > { %v2179_v16 = vpop.trf.xlu0 }
 0x6d9   : > { %v2180_v15 = vpop.trf.xlu0 }
 0x6dd   : > { %v2181_v24 = vpop.trf.xlu0 }
 0x6df   : > { %v2533_v40 = vpop.trf.xlu1 }
 0x6e0   : > { %5331 = vmatprep.mubr.msk.f32.mxu1 %vm507_vm2, %v2533_v40 }
 0x6e1   : > { %v2182_v19 = vpop.trf.xlu0 }
 0x6e3   : > { %v2534_v41 = vpop.trf.xlu1 }
 0x6e4   : > { %5332 = vmatmul.mubr.msk.f32.vlgmr.msra.gmra.mxu1 %vm507_vm2, %v2534_v41 }
 0x6e5   : > { %v2183_v3 = vpop.trf.xlu0 }
 0x6e7   : > { %v2535_v7 = vpop.trf.xlu1 }
 0x6e8   : > { %5334 = vmatprep.mubr.msk.f32.mxu1 %vm507_vm2, %v2535_v7 }
 0x6e9   : > { %v2184_v63 = vpop.trf.xlu0 }
 0x6eb   : > { %v2536_v9 = vpop.trf.xlu1 }
 0x6ec   : > { %5335 = vmatmul.mubr.msk.f32.gmra.mxu1 %vm507_vm2, %v2536_v9 }
 0x6ed   : > { %v2185_v34 = vpop.trf.xlu0 }
 0x6ef   : > { %v2537_v46 = vpop.trf.xlu1 }
 0x6f0   : > { %5337 = vmatprep.mubr.msk.f32.mxu1 %vm507_vm2, %v2537_v46 }
 0x6f3   : > { %v2538_v10 = vpop.trf.xlu1 }
 0x6f4   : > { %5338 = vmatmul.mubr.msk.f32.gmra.mxu1 %vm507_vm2, %v2538_v10 }
 0x6f7   : > { %v2539_v23 = vpop.trf.xlu1 }
 0x6f8   : > { %5340 = vmatprep.mubr.msk.f32.mxu1 %vm507_vm2, %v2539_v23 }
 0x6fb   : > { %v2540_v6 = vpop.trf.xlu1 }
 0x6fc   : > { %5341 = vmatmul.mubr.msk.f32.gmra.mxu1 %vm507_vm2, %v2540_v6 }
 0x6fd   : > { %5359 = vmatprep.mubr.msk.f32.mxu1 %vm6000_vm4, %v5998_v0 }
 0x77e   : > { %v2035_v53 = vpop.f32.mrf.mxu1 }
 0x77f   : > { %5289 = vmatprep.subr.mxu0 %v2035_v53 }
 0x780   : > { %v5288_v21 = vpop.f32.mrf.mxu1  ;;  %5290 = vmatpush3.msra.mxu0 %v2035_v53 }
 0x787   : > { %v1671_v51 = vpop.f32.mrf.mxu0 }
 0x788   : > { %5291 = vmatprep.subr.mxu0 %v1671_v51 }
 0x789   : > { %v5255_v17 = vpop.f32.mrf.mxu0  ;;  %5292 = vmatpush3.msra.mxu0 %v1671_v51 }
 0x78a   : > { %5294 = vmatmul.mubr.msk.f32.vlgmr.msra.gmra.mxu0 %vm235_vm0, %v6455_v49  ;;  %5296 = vmatprep.subr.mxu0 %v2159_v28  ;;  %v2186_v49 = vpop.trf.xlu0 }
 0x78b   : > { %5297 = vmatpush3.msra.mxu0 %v2159_v28  ;;  %5298 = vmatprep.mubr.msk.f32.mxu0 %vm507_vm2, %v2179_v16 }
 0x78c   : > { %5310 = vmatprep.subr.mxu0 %v5998_v0 }
 0x78e   : > { %5299 = vmatmul.mubr.msk.f32.vlgmr.msra.gmra.mxu0 %vm507_vm2, %v2180_v15 }
 0x78f   : > { %5301 = vmatprep.mubr.msk.f32.mxu0 %vm507_vm2, %v2181_v24 }
 0x792   : > { %5302 = vmatmul.mubr.msk.f32.gmra.mxu0 %vm507_vm2, %v2182_v19 }
 0x793   : > { %5304 = vmatprep.mubr.msk.f32.mxu0 %vm507_vm2, %v2183_v3 }
 0x796   : > { %5305 = vmatmul.mubr.msk.f32.gmra.mxu0 %vm507_vm2, %v2184_v63 }
 0x797   : > { %5307 = vmatprep.mubr.msk.f32.mxu0 %vm507_vm2, %v2185_v34 }
 0x79a   : > { %5308 = vmatmul.mubr.msk.f32.gmra.mxu0 %vm507_vm2, %v2186_v49 }
 0x79b   : > { %5326 = vmatprep.mubr.msk.f32.mxu0 %vm6000_vm4, %v5998_v0 }
 0x7a4   : > { %v5333_v43 = vpop.f32.mrf.mxu1 }
 0x7a5   : > { %v2679_v47 = vsel %vm228_vm3, %v5333_v43, -1e+30 }
 0x7a6   : > { %v2639_v37 = vpop.f32.mrf.mxu1  ;;  %v2689_v35 = vsel %vm452_vm1, %v2679_v47, -inf }
 0x7a7   : > { %v6759_v2 = vsel %vm228_vm3, %v2639_v37, -1e+30 }
 0x7a8   : > { %v2686_v33 = vsel %vm452_vm1, %v6759_v2, -inf }
 0x7ac   : > { %v5336_v36 = vpop.f32.mrf.mxu1 }
 0x7ad   : > { %v2681_v32 = vsel %vm228_vm3, %v5336_v36, -1e+30 }
 0x7ae   : > { %v2649_v27 = vpop.f32.mrf.mxu1  ;;  %v2695_v44 = vsel %vm452_vm1, %v2681_v32, -inf }
 0x7af   : > { %v2680_v30 = vsel %vm228_vm3, %v2649_v27, -1e+30 }
 0x7b0   : > { %v2692_v61 = vsel %vm452_vm1, %v2680_v30, -inf }
 0x7b4   : > { %v5339_v12 = vpop.f32.mrf.mxu1 }
 0x7b5   : > { %v2683_v55 = vsel %vm228_vm3, %v5339_v12, -1e+30 }
 0x7b6   : > { %v2659_v29 = vpop.f32.mrf.mxu1  ;;  %v2701_v57 = vsel %vm452_vm1, %v2683_v55, -inf }
 0x7b7   : > { %v2682_v13 = vsel %vm228_vm3, %v2659_v29, -1e+30 }
 0x7b8   : > { %v2698_v60 = vsel %vm452_vm1, %v2682_v13, -inf }
 0x7bc   : > { %v5342_v11 = vpop.f32.mrf.mxu1 }
 0x7bd   : > { %v2685_v39 = vsel %vm228_vm3, %v5342_v11, -1e+30 }
 0x7be   : > { %v2707_v50 = vsel %vm452_vm1, %v2685_v39, -inf  ;;  %v2669_v45 = vpop.f32.mrf.mxu1 }
 0x7bf   : > { %2708 = vmax.xlane.f32.xlu0 %v2707_v50  ;;  %v2684_v14 = vsel %vm228_vm3, %v2669_v45, -1e+30 }
 0x7c0   : > { %v2704_v54 = vsel %vm452_vm1, %v2684_v14, -inf }
 0x7c3   : > { %2705 = vmax.xlane.f32.xlu0 %v2704_v54 }
 0x7c7   : > { %2702 = vmax.xlane.f32.xlu0 %v2701_v57 }
 0x7cb   : > { %2699 = vmax.xlane.f32.xlu0 %v2698_v60 }
 0x7cf   : > { %2696 = vmax.xlane.f32.xlu0 %v2695_v44 }
 0x7d3   : > { %2693 = vmax.xlane.f32.xlu0 %v2692_v61 }
 0x7d7   : > { %2690 = vmax.xlane.f32.xlu0 %v2689_v35 }
 0x7db   : > { %2687 = vmax.xlane.f32.xlu0 %v2686_v33 }
 0x848   : > { %v2709_v1 = vpop.xlane.xlu0 %2708 }
 0x849   : > { %v2717_v26 = vsub.f32 %v2685_v39, %v2709_v1 }
 0x84a   : > { %v6763_v25 = vpop.f32.mrf.mxu0 }
 0x84b   : > { %v2732_v56 = vmul.f32 1.442695, %v2717_v26 }
 0x84c   : > { %v6765_v4 = vpop.f32.mrf.mxu0  ;;  %v2706_v38 = vpop.xlane.xlu0 %2705 }
 0x84d   : > { %5703 = vpow2.f32 %v2732_v56  ;;  %v2716_v40 = vsub.f32 %v2684_v14, %v2706_v38 }
 0x84e   : > { %v6767_v41 = vpop.f32.mrf.mxu0 }
 0x84f   : > { %v2730_v7 = vmul.f32 1.442695, %v2716_v40  ;;  %v6829_v40 = vsel %vm228_vm3, %v6767_v41, -1e+30 }
 0x850   : > { %v6769_v9 = vpop.f32.mrf.mxu0  ;;  %v2703_v46 = vpop.xlane.xlu0 %2702 }
 0x851   : > { %5705 = vpow2.f32 %v2730_v7  ;;  %v2715_v10 = vsub.f32 %v2683_v55, %v2703_v46 }
 0x852   : > { %v5303_v23 = vpop.f32.mrf.mxu0 }
 0x853   : > { %v2728_v6 = vmul.f32 1.442695, %v2715_v10  ;;  %v2335_v10 = vsel %vm452_vm1, %v6829_v40, -inf }
 0x854   : > { %v2295_v8 = vpop.f32.mrf.mxu0  ;;  %v2700_v16 = vpop.xlane.xlu0 %2699 }
 0x855   : > { %5707 = vpow2.f32 %v2728_v6  ;;  %v2714_v15 = vsub.f32 %v2682_v13, %v2700_v16  ;;  %v6818_v1 = vsel %vm228_vm3, %v2295_v8, -1e+30  ;;  %v6848_v16 = vld [vmem:[#allocation2 + $0x78] sm:$0xff] }
 0x856   : > { %v5306_v24 = vpop.f32.mrf.mxu0  ;;  %v2338_v38 = vsel %vm452_vm1, %v6818_v1, -inf }
 0x857   : > { %v2726_v53 = vmul.f32 1.442695, %v2714_v15  ;;  %v2329_v39 = vsel %vm228_vm3, %v5306_v24, -1e+30 }
 0x858   : > { %v2305_v19 = vpop.f32.mrf.mxu0  ;;  %v2697_v21 = vpop.xlane.xlu0 %2696  ;;  %v2347_v55 = vsel %vm452_vm1, %v2329_v39, -inf }
 0x859   : > { %5709 = vpow2.f32 %v2726_v53  ;;  %v2713_v58 = vsub.f32 %v2681_v32, %v2697_v21  ;;  %v2328_v13 = vsel %vm228_vm3, %v2305_v19, -1e+30 }
 0x85a   : > { %v6771_v22 = vpop.eup %5703  ;;  %v5309_v3 = vpop.f32.mrf.mxu0  ;;  %v2344_v61 = vsel %vm452_vm1, %v2328_v13, -inf }
 0x85b   : > { %v2724_v51 = vmul.f32 1.442695, %v2713_v58  ;;  %v6775_v28 = vsel %vm228_vm3, %v5309_v3, -1e+30  ;;  %v2755_v17 = vsel %vm452_vm1, %v6771_v22, 0.0 }
 0x85c   : > { %v2353_v63 = vsel %vm452_vm1, %v6775_v28, -inf  ;;  %v2315_v34 = vpop.f32.mrf.mxu0  ;;  %2756 = vadd.xlane.f32.xlu0 %v2755_v17  ;;  %v2694_v49 = vpop.xlane.xlu0 %2693 }
 0x85d   : > { %5711 = vpow2.f32 %v2724_v51  ;;  %v6783_v43 = vsel %vm228_vm3, %v2315_v34, -1e+30  ;;  %2354 = vmax.xlane.f32.xlu1 %v2353_v63  ;;  %v2712_v37 = vsub.f32 %v2680_v30, %v2694_v49 }
 0x85e   : > { %v6785_v36 = vpop.eup %5705  ;;  %v2350_v29 = vsel %vm452_vm1, %v6783_v43, -inf }
 0x85f   : > { %v2722_v27 = vmul.f32 1.442695, %v2712_v37  ;;  %v2752_v12 = vsel %vm452_vm1, %v6785_v36, 0.0 }
 0x860   : > { %2753 = vadd.xlane.f32.xlu0 %v2752_v12  ;;  %v2691_v11 = vpop.xlane.xlu0 %2690 }
 0x861   : > { %5713 = vpow2.f32 %v2722_v27  ;;  %2351 = vmax.xlane.f32.xlu1 %v2350_v29  ;;  %v2711_v50 = vsub.f32 %v2679_v47, %v2691_v11  ;;  %v6808_v47 = vsel %vm228_vm3, %v5303_v23, -1e+30  ;;  %v6840_v23 = vsel %vm228_vm3, %v6769_v9, -1e+30 }
 0x862   : > { %v6793_v45 = vpop.eup %5707  ;;  %v2341_v33 = vsel %vm452_vm1, %v6808_v47, -inf  ;;  %v2332_v8 = vsel %vm452_vm1, %v6840_v23, -inf }
 0x863   : > { %v2720_v14 = vmul.f32 1.442695, %v2711_v50  ;;  %v2749_v54 = vsel %vm452_vm1, %v6793_v45, 0.0 }
 0x864   : > { %2750 = vadd.xlane.f32.xlu0 %v2749_v54  ;;  %v2688_v57 = vpop.xlane.xlu0 %2687 }
 0x865   : > { %5715 = vpow2.f32 %v2720_v14  ;;  %2348 = vmax.xlane.f32.xlu1 %v2347_v55  ;;  %v2710_v60 = vsub.f32 %v6759_v2, %v2688_v57 }
 0x866   : > { %v6801_v32 = vpop.eup %5709 }
 0x867   : > { %v2718_v44 = vmul.f32 1.442695, %v2710_v60  ;;  %v2746_v30 = vsel %vm452_vm1, %v6801_v32, 0.0 }
 0x868   : > { %2747 = vadd.xlane.f32.xlu0 %v2746_v30 }
 0x869   : > { %5717 = vpow2.f32 %v2718_v44  ;;  %2345 = vmax.xlane.f32.xlu1 %v2344_v61 }
 0x86a   : > { %v6810_v35 = vpop.eup %5711 }
 0x86b   : > { %v2743_v2 = vsel %vm452_vm1, %v6810_v35, 0.0 }
 0x86c   : > { %2744 = vadd.xlane.f32.xlu0 %v2743_v2 }
 0x86d   : > { %2342 = vmax.xlane.f32.xlu1 %v2341_v33 }
 0x86e   : > { %v6820_v26 = vpop.eup %5713 }
 0x86f   : > { %v2740_v56 = vsel %vm452_vm1, %v6820_v26, 0.0 }
 0x870   : > { %2741 = vadd.xlane.f32.xlu0 %v2740_v56 }
 0x871   : > { %2339 = vmax.xlane.f32.xlu1 %v2338_v38 }
 0x872   : > { %v6831_v7 = vpop.eup %5715 }
 0x873   : > { %v2737_v46 = vsel %vm452_vm1, %v6831_v7, 0.0 }
 0x874   : > { %2738 = vadd.xlane.f32.xlu0 %v2737_v46 }
 0x875   : > { %2336 = vmax.xlane.f32.xlu1 %v2335_v10 }
 0x876   : > { %v6842_v6 = vpop.eup %5717 }
 0x877   : > { %v2734_v41 = vsel %vm452_vm1, %v6842_v6, 0.0 }
 0x878   : > { %2735 = vadd.xlane.f32.xlu0 %v2734_v41 }
 0x879   : > { %2333 = vmax.xlane.f32.xlu1 %v2332_v8 }
 0x88e   : > { %2149 = vrot.lane.b32.xlu0 %v6848_v16, %s5999_s9 }
 0x892   : > { %2962 = vrot.lane.b32.xlu0 %v6644_v18, %s5999_s9 }
 0x896   : > { %2982 = vrot.lane.b32.xlu0 %v6719_v59, %s5999_s9 }
 0x89a   : > { %3003 = vrot.lane.b32.xlu0 %v6648_v5, %s5999_s9 }
 0x8e5   : > { %v2757_v9 = vpop.xlane.xlu0 %2756 }
 0x8e6   : > { %5719 = vrcp.f32 %v2757_v9  ;;  %v2355_v15 = vpop.xlane.xlu1 %2354 }
 0x8e7   : > { %v2363_v3 = vsub.f32 %v6775_v28, %v2355_v15 }
 0x8e9   : > { %v2754_v24 = vpop.xlane.xlu0 %2753  ;;  %v2378_v49 = vmul.f32 1.442695, %v2363_v3 }
 0x8ea   : > { %5721 = vrcp.f32 %v2754_v24  ;;  %v2352_v53 = vpop.xlane.xlu1 %2351 }
 0x8eb   : > { %v2362_v37 = vsub.f32 %v6783_v43, %v2352_v53  ;;  %v6892_v53 = vld [vmem:[#allocation2 + $0x80] sm:$0xff] }
 0x8ed   : > { %v2751_v19 = vpop.xlane.xlu0 %2750 }
 0x8ee   : > { %5723 = vrcp.f32 %v2751_v19  ;;  %v2349_v21 = vpop.xlane.xlu1 %2348 }
 0x8ef   : > { %v2361_v58 = vsub.f32 %v2329_v39, %v2349_v21  ;;  %v2376_v39 = vmul.f32 1.442695, %v2362_v37 }
 0x8f1   : > { %v2374_v51 = vmul.f32 1.442695, %v2361_v58  ;;  %v2748_v18 = vpop.xlane.xlu0 %2747 }
 0x8f2   : > { %5725 = vrcp.f32 %v2748_v18  ;;  %v2346_v17 = vpop.xlane.xlu1 %2345 }
 0x8f3   : > { %v5720_v63 = vpop.eup %5719  ;;  %5727 = vpow2.f32 %v2374_v51  ;;  %v2360_v34 = vsub.f32 %v2328_v13, %v2346_v17 }
 0x8f4   : > { %v2773_v5 = vmul.f32 %v5720_v63, %v6771_v22 }
 0x8f5   : > { %v2372_v27 = vmul.f32 1.442695, %v2360_v34  ;;  %v2745_v12 = vpop.xlane.xlu0 %2744 }
 0x8f6   : > { %5729 = vrcp.f32 %v2745_v12  ;;  %v2343_v29 = vpop.xlane.xlu1 %2342  ;;  %5344 = vmatpush3.xpose.msk.msra.mxu1 %vm452_vm1, %v2773_v5 }
 0x8f7   : > { %v5722_v11 = vpop.eup %5721  ;;  %5731 = vpow2.f32 %v2372_v27  ;;  %5345 = vmatprep.subr.mxu1 %v5998_v0  ;;  %v2359_v50 = vsub.f32 %v6808_v47, %v2343_v29 }
 0x8f8   : > { %v2772_v28 = vmul.f32 %v5722_v11, %v6785_v36  ;;  %5733 = vpow2.f32 %v2378_v49 }
 0x8f9   : > { %v2742_v22 = vpop.xlane.xlu0 %2741  ;;  %v2370_v55 = vmul.f32 1.442695, %v2359_v50 }
 0x8fa   : > { %5735 = vrcp.f32 %v2742_v22  ;;  %v2340_v14 = vpop.xlane.xlu1 %2339  ;;  %5346 = vmatpush3.xpose.msk.msra.mxu1 %vm452_vm1, %v2772_v28  ;;  %v6923_v28 = vld [vmem:[#allocation2 + $0x60] sm:$0xff] }
 0x8fb   : > { %v5724_v43 = vpop.eup %5723  ;;  %5347 = vmatprep.subr.mxu1 %v5998_v0  ;;  %5737 = vpow2.f32 %v2376_v39  ;;  %v2358_v57 = vsub.f32 %v6818_v1, %v2340_v14 }
 0x8fc   : > { %v2771_v54 = vmul.f32 %v5724_v43, %v6793_v45 }
 0x8fd   : > { %v2739_v13 = vpop.xlane.xlu0 %2738  ;;  %v2368_v61 = vmul.f32 1.442695, %v2358_v57 }
 0x8fe   : > { %5739 = vrcp.f32 %v2739_v13  ;;  %v2337_v36 = vpop.xlane.xlu1 %2336  ;;  %5348 = vmatpush3.xpose.msk.msra.mxu1 %vm452_vm1, %v2771_v54 }
 0x8ff   : > { %v5726_v60 = vpop.eup %5725  ;;  %5349 = vmatprep.subr.mxu1 %v5998_v0  ;;  %5741 = vpow2.f32 %v2370_v55  ;;  %v2357_v45 = vsub.f32 %v6829_v40, %v2337_v36 }
 0x900   : > { %v6871_v44 = vpop.eup %5727  ;;  %v2770_v30 = vmul.f32 %v5726_v60, %v6801_v32 }
 0x901   : > { %v2736_v47 = vpop.xlane.xlu0 %2735  ;;  %v2395_v2 = vsel %vm452_vm1, %v6871_v44, 0.0  ;;  %v2366_v38 = vmul.f32 1.442695, %v2357_v45 }
 0x902   : > { %5743 = vrcp.f32 %v2736_v47  ;;  %2396 = vadd.xlane.f32.xlu1 %v2395_v2  ;;  %v2334_v33 = vpop.xlane.xlu1 %2333  ;;  %5350 = vmatpush3.xpose.msk.msra.mxu1 %vm452_vm1, %v2770_v30 }
 0x903   : > { %v5730_v1 = vpop.eup %5729  ;;  %5351 = vmatprep.subr.mxu1 %v5998_v0  ;;  %5745 = vpow2.f32 %v2368_v61  ;;  %v2356_v40 = vsub.f32 %v6840_v23, %v2334_v33 }
 0x904   : > { %v6879_v56 = vpop.eup %5731  ;;  %v2769_v32 = vmul.f32 %v5730_v1, %v6810_v35  ;;  %5747 = vpow2.f32 %v2366_v38 }
 0x905   : > { %v2150_v46 = vpop.permute.xlu0 %2149  ;;  %v2392_v10 = vsel %vm452_vm1, %v6879_v56, 0.0  ;;  %v6885_v41 = vpop.eup %5733  ;;  %v2364_v35 = vmul.f32 1.442695, %v2356_v40 }
 0x906   : > { %2393 = vadd.xlane.f32.xlu1 %v2392_v10  ;;  %5352 = vmatpush3.xpose.msk.msra.mxu1 %vm452_vm1, %v2769_v32  ;;  %v2401_v23 = vsel %vm452_vm1, %v6885_v41, 0.0 }
 0x907   : > { %v5736_v8 = vpop.eup %5735  ;;  %5353 = vmatprep.subr.mxu1 %v5998_v0  ;;  %5749 = vpow2.f32 %v2364_v35 }
 0x908   : > { %v2768_v9 = vmul.f32 %v5736_v8, %v6820_v26  ;;  %v5738_v24 = vpop.eup %5737  ;;  %v2138_v26 = vadd.f32 %v6848_v16, %v6892_v53  ;;  %v6949_v8 = vld [vmem:[#allocation2 + $0x68] sm:$0xff] }
 0x909   : > { %v2963_v15 = vpop.permute.xlu0 %2962  ;;  %v2398_v51 = vsel %vm452_vm1, %v5738_v24, 0.0  ;;  %v2137_v35 = vadd.f32 %v6923_v28, %v6949_v8 }
 0x90a   : > { %2402 = vadd.xlane.f32.xlu1 %v2401_v23  ;;  %5354 = vmatpush3.xpose.msk.msra.mxu1 %vm452_vm1, %v2768_v9  ;;  %v2974_v21 = vadd.f32 %v2963_v15, %v6719_v59  ;;  %v2158_v34 = vadd.f32 %v2150_v46, %v2138_v26 }
 0x90b   : > { %v5740_v19 = vpop.eup %5739  ;;  %5355 = vmatprep.subr.mxu1 %v5998_v0 }
 0x90c   : > { %v2767_v58 = vmul.f32 %v5740_v19, %v6831_v7  ;;  %v6901_v18 = vpop.eup %5741  ;;  %v2162_v37 = vmul.f32 0.33333334, %v2158_v34  ;;  %v6965_v19 = vld [vmem:[%s7558_s2] sm:$0xff] }
 0x90d   : > { %v2983_v3 = vpop.permute.xlu0 %2982  ;;  %v2389_v5 = vsel %vm452_vm1, %v6901_v18, 0.0 }
 0x90e   : > { %v2994_v17 = vadd.f32 %v2983_v3, %v2974_v21  ;;  %2399 = vadd.xlane.f32.xlu1 %v2398_v51  ;;  %5356 = vmatpush3.xpose.msk.msra.mxu1 %vm452_vm1, %v2767_v58 }
 0x90f   : > { %v5744_v63 = vpop.eup %5743  ;;  %5357 = vmatprep.subr.mxu1 %v5998_v0 }
 0x910   : > { %v2998_v59 = vmul.f32 0.33333334, %v2994_v17  ;;  %v2766_v7 = vmul.f32 %v5744_v63, %v6842_v6  ;;  %v6908_v49 = vpop.eup %5745 }
 0x911   : > { %v2386_v27 = vsel %vm452_vm1, %v6908_v49, 0.0  ;;  %v6915_v12 = vpop.eup %5747  ;;  %v3004_v39 = vpop.permute.xlu0 %3003 }
 0x912   : > { %2390 = vadd.xlane.f32.xlu1 %v2389_v5  ;;  %5358 = vmatpush3.xpose.msk.msra.mxu1 %vm452_vm1, %v2766_v7  ;;  %v2383_v6 = vsel %vm452_vm1, %v6915_v12, 0.0 }
 0x913   : > { %3039 = vrot.lane.b32.xlu0 %v2998_v59, %s5999_s9 }
 0x914   : > { %v6919_v29 = vpop.eup %5749 }
 0x915   : > { %5360 = vmatmul.mubr.msk.f32.vlgmr.msra.gmra.mxu1 %vm452_vm1, %v2162_v37  ;;  %v2380_v11 = vsel %vm452_vm1, %v6919_v29, 0.0 }
 0x916   : > { %2387 = vadd.xlane.f32.xlu1 %v2386_v27 }
 0x91a   : > { %2384 = vadd.xlane.f32.xlu1 %v2383_v6 }
 0x91e   : > { %2381 = vadd.xlane.f32.xlu1 %v2380_v11 }
 0x92f   : > { %2147 = vrot.lane.b32.xlu1 %v6923_v28, %s5999_s9 }
 0x931   : > { %3006 = vxpose.xlu0.b32.start.end [1/1] (short) (narrow) %v3004_v39, 64 }
 0x933   : > { %2964 = vrot.lane.b32.xlu1 %v6640_v20, %s5999_s9 }
 0x937   : > { %2984 = vrot.lane.b32.xlu1 %v6680_v42, %s5999_s9 }
 0x93b   : > { %3367 = vrot.lane.b32.xlu1 %v6651_v62, %s5999_s9 }
 0x985   : > { %v3040_v17 = vpop.permute.xlu0 %3039 }
 0x98b   : > { %v2397_v50 = vpop.xlane.xlu1 %2396 }
 0x98f   : > { %v2394_v22 = vpop.xlane.xlu1 %2393 }
 0x993   : > { %v2403_v14 = vpop.xlane.xlu1 %2402 }
 0x994   : > { %5751 = vrcp.f32 %v2403_v14 }
 0x997   : > { %v2400_v43 = vpop.xlane.xlu1 %2399 }
 0x998   : > { %5753 = vrcp.f32 %v2400_v43 }
 0x999   : > { %5755 = vrcp.f32 %v2397_v50  ;;  %v6983_v50 = vld [vmem:[%s7558_s2 + $0x8] sm:$0xff] }
 0x99a   : > { %5757 = vrcp.f32 %v2394_v22 }
 0x99b   : > { %v2391_v54 = vpop.xlane.xlu1 %2390 }
 0x99c   : > { %5759 = vrcp.f32 %v2391_v54 }
 0x99f   : > { %v2388_v55 = vpop.xlane.xlu1 %2387 }
 0x9a0   : > { %5761 = vrcp.f32 %v2388_v55 }
 0x9a1   : > { %v5752_v57 = vpop.eup %5751 }
 0x9a2   : > { %v2419_v20 = vmul.f32 %v5752_v57, %v6885_v41 }
 0x9a3   : > { %v2385_v13 = vpop.xlane.xlu1 %2384 }
 0x9a4   : > { %5311 = vmatpush3.xpose.msk.msra.mxu0 %vm452_vm1, %v2419_v20  ;;  %5763 = vrcp.f32 %v2385_v13 }
 0x9a5   : > { %v5754_v36 = vpop.eup %5753  ;;  %5312 = vmatprep.subr.mxu0 %v5998_v0 }
 0x9a6   : > { %v2418_v62 = vmul.f32 %v5754_v36, %v5738_v24  ;;  %v5756_v60 = vpop.eup %5755 }
 0x9a7   : > { %v2382_v30 = vpop.xlane.xlu1 %2381  ;;  %v2417_v61 = vmul.f32 %v5756_v60, %v6871_v44  ;;  %v5758_v45 = vpop.eup %5757 }
 0x9a8   : > { %5313 = vmatpush3.xpose.msk.msra.mxu0 %vm452_vm1, %v2418_v62  ;;  %5765 = vrcp.f32 %v2382_v30  ;;  %v2416_v2 = vmul.f32 %v5758_v45, %v6879_v56 }
 0x9a9   : > { %5314 = vmatprep.subr.mxu0 %v5998_v0  ;;  %v5760_v33 = vpop.eup %5759 }
 0x9aa   : > { %v2415_v38 = vmul.f32 %v5760_v33, %v6901_v18 }
 0x9ab   : > { %v2148_v47 = vpop.permute.xlu1 %2147 }
 0x9ac   : > { %5315 = vmatpush3.xpose.msk.msra.mxu0 %vm452_vm1, %v2417_v61  ;;  %v2157_v15 = vadd.f32 %v2148_v47, %v2137_v35 }
 0x9ad   : > { %5316 = vmatprep.subr.mxu0 %v5998_v0  ;;  %v5762_v44 = vpop.eup %5761  ;;  %v3022_v59 = vpop.trf.xlu0 }
 0x9ae   : > { %v2414_v56 = vmul.f32 %v5762_v44, %v6908_v49  ;;  %v2161_v24 = vmul.f32 0.33333334, %v2157_v15 }
 0x9af   : > { %v2965_v1 = vpop.permute.xlu1 %2964 }
 0x9b0   : > { %5317 = vmatpush3.xpose.msk.msra.mxu0 %vm452_vm1, %v2416_v2  ;;  %v2975_v32 = vadd.f32 %v2965_v1, %v6680_v42 }
 0x9b1   : > { %5318 = vmatprep.subr.mxu0 %v5998_v0  ;;  %v5764_v41 = vpop.eup %5763  ;;  %v3023_v5 = vpop.trf.xlu0 }
 0x9b2   : > { %v2413_v42 = vmul.f32 %v5764_v41, %v6915_v12 }
 0x9b3   : > { %v2985_v40 = vpop.permute.xlu1 %2984 }
 0x9b4   : > { %v2995_v46 = vadd.f32 %v2985_v40, %v2975_v32  ;;  %5319 = vmatpush3.xpose.msk.msra.mxu0 %vm452_vm1, %v2415_v38 }
 0x9b5   : > { %5320 = vmatprep.subr.mxu0 %v5998_v0  ;;  %v5766_v9 = vpop.eup %5765  ;;  %v3024_v27 = vpop.trf.xlu0 }
 0x9b6   : > { %v2999_v10 = vmul.f32 0.33333334, %v2995_v46  ;;  %v2412_v23 = vmul.f32 %v5766_v9, %v6919_v29 }
 0x9b7   : > { %v3368_v26 = vpop.permute.xlu1 %3367 }
 0x9b8   : > { %5321 = vmatpush3.xpose.msk.msra.mxu0 %vm452_vm1, %v2414_v56  ;;  %3403 = vrot.lane.b32.xlu1 %v2999_v10, %s5999_s9 }
 0x9b9   : > { %5322 = vmatprep.subr.mxu0 %v5998_v0  ;;  %v3025_v6 = vpop.trf.xlu0 }
 0x9bc   : > { %5323 = vmatpush3.xpose.msk.msra.mxu0 %vm452_vm1, %v2413_v42 }
 0x9bd   : > { %5324 = vmatprep.subr.mxu0 %v5998_v0  ;;  %v3026_v29 = vpop.trf.xlu0 }
 0x9c0   : > { %5325 = vmatpush3.xpose.msk.msra.mxu0 %vm452_vm1, %v2412_v23 }
 0x9c1   : > { %v3027_v22 = vpop.trf.xlu0 }
 0x9c3   : > { %5327 = vmatmul.mubr.msk.f32.vlgmr.msra.gmra.mxu0 %vm452_vm1, %v2161_v24 }
 0x9c4   : > { %5366 = vmatprep.mubr.msk.f32.mxu0 %vm235_vm0, %v6965_v19 }
 0x9c5   : > { %v3028_v14 = vpop.trf.xlu0 }
 0x9c9   : > { %v3029_v43 = vpop.trf.xlu0 }
 0x9d5   : > { %v2867_v21 = vpop.f32.mrf.mxu1 }
 0x9d6   : > { %5362 = vmatprep.subr.mxu0 %v2867_v21 }
 0x9d7   : > { %v5361_v58 = vpop.f32.mrf.mxu1  ;;  %5363 = vmatpush3.msra.mxu0 %v2867_v21 }
 0x9e1   : > { %3370 = vxpose.xlu1.b32.start.end [1/1] (short) (narrow) %v3368_v26, 64 }
 0xa2a   : > { %v3404_v3 = vpop.permute.xlu1 %3403 }
 0xa2b   : > { %5402 = vmatprep.subr.mxu1 %v3404_v3 }
 0xa2c   : > { %5403 = vmatpush3.msra.mxu1 %v3404_v3 }
 0xa2d   : > { %5416 = vmatprep.subr.mxu1 %v5998_v0 }
 0xa5d   : > { %v3386_v51 = vpop.trf.xlu1 }
 0xa5e   : > { %5404 = vmatprep.mubr.msk.f32.mxu1 %vm507_vm2, %v3386_v51 }
 0xa61   : > { %v3387_v18 = vpop.trf.xlu1 }
 0xa62   : > { %5405 = vmatmul.mubr.msk.f32.vlgmr.msra.gmra.mxu1 %vm507_vm2, %v3387_v18 }
 0xa65   : > { %v3388_v63 = vpop.trf.xlu1 }
 0xa66   : > { %5407 = vmatprep.mubr.msk.f32.mxu1 %vm507_vm2, %v3388_v63 }
 0xa69   : > { %v3389_v34 = vpop.trf.xlu1 }
 0xa6a   : > { %5408 = vmatmul.mubr.msk.f32.gmra.mxu1 %vm507_vm2, %v3389_v34 }
 0xa6d   : > { %v3390_v7 = vpop.trf.xlu1 }
 0xa6e   : > { %5410 = vmatprep.mubr.msk.f32.mxu1 %vm507_vm2, %v3390_v7 }
 0xa71   : > { %v3391_v49 = vpop.trf.xlu1 }
 0xa72   : > { %5411 = vmatmul.mubr.msk.f32.gmra.mxu1 %vm507_vm2, %v3391_v49 }
 0xa75   : > { %v3392_v37 = vpop.trf.xlu1 }
 0xa76   : > { %5413 = vmatprep.mubr.msk.f32.mxu1 %vm507_vm2, %v3392_v37 }
 0xa79   : > { %v3393_v12 = vpop.trf.xlu1 }
 0xa7a   : > { %5414 = vmatmul.mubr.msk.f32.gmra.mxu1 %vm507_vm2, %v3393_v12 }
 0xa7b   : > { %5432 = vmatprep.mubr.msk.f32.mxu1 %vm6000_vm4, %v5998_v0 }
 0xa83   : > { %v2513_v11 = vpop.f32.mrf.mxu0 }
 0xa84   : > { %5364 = vmatprep.subr.mxu0 %v2513_v11 }
 0xa85   : > { %v5328_v39 = vpop.f32.mrf.mxu0  ;;  %5365 = vmatpush3.msra.mxu0 %v2513_v11 }
 0xa86   : > { %5367 = vmatmul.mubr.msk.f32.vlgmr.msra.gmra.mxu0 %vm235_vm0, %v6983_v50  ;;  %5369 = vmatprep.subr.mxu0 %v3040_v17 }
 0xa87   : > { %5370 = vmatpush3.msra.mxu0 %v3040_v17  ;;  %5371 = vmatprep.mubr.msk.f32.mxu0 %vm507_vm2, %v3022_v59 }
 0xa88   : > { %5383 = vmatprep.subr.mxu0 %v5998_v0 }
 0xa8a   : > { %5372 = vmatmul.mubr.msk.f32.vlgmr.msra.gmra.mxu0 %vm507_vm2, %v3023_v5 }
 0xa8b   : > { %5374 = vmatprep.mubr.msk.f32.mxu0 %vm507_vm2, %v3024_v27 }
 0xa8e   : > { %5375 = vmatmul.mubr.msk.f32.gmra.mxu0 %vm507_vm2, %v3025_v6 }
 0xa8f   : > { %5377 = vmatprep.mubr.msk.f32.mxu0 %vm507_vm2, %v3026_v29 }
 0xa92   : > { %5378 = vmatmul.mubr.msk.f32.gmra.mxu0 %vm507_vm2, %v3027_v22 }
 0xa93   : > { %5380 = vmatprep.mubr.msk.f32.mxu0 %vm507_vm2, %v3028_v14 }
 0xa96   : > { %5381 = vmatmul.mubr.msk.f32.gmra.mxu0 %vm507_vm2, %v3029_v43 }
 0xa97   : > { %5399 = vmatprep.mubr.msk.f32.mxu0 %vm6000_vm4, %v5998_v0 }
 0xb22   : > { %v5406_v54 = vpop.f32.mrf.mxu1 }
 0xb23   : > { %v7040_v15 = vsel %vm228_vm3, %v5406_v54, -1e+30 }
 0xb24   : > { %v3496_v55 = vpop.f32.mrf.mxu1  ;;  %v3546_v24 = vsel %vm452_vm1, %v7040_v15, -inf }
 0xb25   : > { %v7046_v58 = vsel %vm228_vm3, %v3496_v55, -1e+30 }
 0xb26   : > { %v3543_v51 = vsel %vm452_vm1, %v7046_v58, -inf }
 0xb2a   : > { %v5409_v57 = vpop.f32.mrf.mxu1 }
 0xb2b   : > { %v7026_v44 = vsel %vm228_vm3, %v5409_v57, -1e+30 }
 0xb2c   : > { %v3506_v20 = vpop.f32.mrf.mxu1  ;;  %v3552_v46 = vsel %vm452_vm1, %v7026_v44, -inf }
 0xb2d   : > { %v7034_v41 = vsel %vm228_vm3, %v3506_v20, -1e+30 }
 0xb2e   : > { %v3549_v9 = vsel %vm452_vm1, %v7034_v41, -inf }
 0xb32   : > { %v5412_v13 = vpop.f32.mrf.mxu1 }
 0xb33   : > { %v7012_v2 = vsel %vm228_vm3, %v5412_v13, -1e+30 }
 0xb34   : > { %v3516_v36 = vpop.f32.mrf.mxu1  ;;  %v3558_v33 = vsel %vm452_vm1, %v7012_v2, -inf }
 0xb35   : > { %v7018_v1 = vsel %vm228_vm3, %v3516_v36, -1e+30 }
 0xb36   : > { %v3555_v32 = vsel %vm452_vm1, %v7018_v1, -inf }
 0xb3a   : > { %v5415_v62 = vpop.f32.mrf.mxu1 }
 0xb3b   : > { %v7000_v60 = vsel %vm228_vm3, %v5415_v62, -1e+30 }
 0xb3c   : > { %v3564_v30 = vsel %vm452_vm1, %v7000_v60, -inf  ;;  %v3526_v61 = vpop.f32.mrf.mxu1 }
 0xb3d   : > { %3565 = vmax.xlane.f32.xlu0 %v3564_v30  ;;  %v7006_v45 = vsel %vm228_vm3, %v3526_v61, -1e+30 }
 0xb3e   : > { %v3561_v47 = vsel %vm452_vm1, %v7006_v45, -inf }
 0xb41   : > { %3562 = vmax.xlane.f32.xlu0 %v3561_v47 }
 0xb45   : > { %3559 = vmax.xlane.f32.xlu0 %v3558_v33 }
 0xb46   : > { %v7022_v38 = vpop.f32.mrf.mxu0 }
 0xb48   : > { %v7028_v40 = vpop.f32.mrf.mxu0 }
 0xb49   : > { %3556 = vmax.xlane.f32.xlu0 %v3555_v32 }
 0xb4a   : > { %v5373_v10 = vpop.f32.mrf.mxu0 }
 0xb4b   : > { %v7076_v29 = vsel %vm228_vm3, %v5373_v10, -1e+30 }
 0xb4c   : > { %v3132_v56 = vpop.f32.mrf.mxu0  ;;  %v3182_v11 = vsel %vm452_vm1, %v7076_v29, -inf }
 0xb4d   : > { %3553 = vmax.xlane.f32.xlu0 %v3552_v46  ;;  %v7084_v39 = vsel %vm228_vm3, %v3132_v56, -1e+30 }
 0xb4e   : > { %v5376_v42 = vpop.f32.mrf.mxu0  ;;  %v3179_v22 = vsel %vm452_vm1, %v7084_v39, -inf }
 0xb4f   : > { %v7064_v37 = vsel %vm228_vm3, %v5376_v42, -1e+30 }
 0xb50   : > { %v3142_v35 = vpop.f32.mrf.mxu0  ;;  %v3188_v27 = vsel %vm452_vm1, %v7064_v37, -inf }
 0xb51   : > { %3550 = vmax.xlane.f32.xlu0 %v3549_v9  ;;  %v7070_v12 = vsel %vm228_vm3, %v3142_v35, -1e+30 }
 0xb52   : > { %v5379_v23 = vpop.f32.mrf.mxu0  ;;  %v3185_v6 = vsel %vm452_vm1, %v7070_v12, -inf }
 0xb53   : > { %v3176_v59 = vsel %vm228_vm3, %v5379_v23, -1e+30 }
 0xb54   : > { %v3152_v21 = vpop.f32.mrf.mxu0  ;;  %v3194_v7 = vsel %vm452_vm1, %v3176_v59, -inf }
 0xb55   : > { %3547 = vmax.xlane.f32.xlu0 %v3546_v24  ;;  %v3175_v5 = vsel %vm228_vm3, %v3152_v21, -1e+30 }
 0xb56   : > { %v5382_v26 = vpop.f32.mrf.mxu0  ;;  %v3191_v49 = vsel %vm452_vm1, %v3175_v5, -inf }
 0xb57   : > { %v3178_v3 = vsel %vm228_vm3, %v5382_v26, -1e+30 }
 0xb58   : > { %v3200_v18 = vsel %vm452_vm1, %v3178_v3, -inf  ;;  %v3162_v17 = vpop.f32.mrf.mxu0 }
 0xb59   : > { %v3177_v63 = vsel %vm228_vm3, %v3162_v17, -1e+30  ;;  %3201 = vmax.xlane.f32.xlu1 %v3200_v18  ;;  %3544 = vmax.xlane.f32.xlu0 %v3543_v51 }
 0xb5a   : > { %v3197_v34 = vsel %vm452_vm1, %v3177_v63, -inf }
 0xb5d   : > { %3198 = vmax.xlane.f32.xlu1 %v3197_v34 }
 0xb61   : > { %3195 = vmax.xlane.f32.xlu1 %v3194_v7 }
 0xb65   : > { %3192 = vmax.xlane.f32.xlu1 %v3191_v49 }
 0xb69   : > { %3189 = vmax.xlane.f32.xlu1 %v3188_v27 }
 0xb6d   : > { %3186 = vmax.xlane.f32.xlu1 %v3185_v6 }
 0xb6f   : > { %2968 = vrot.lane.b32.xlu0 %v6848_v16, %s5999_s9 }
 0xb71   : > { %3183 = vmax.xlane.f32.xlu1 %v3182_v11 }
 0xb73   : > { %2986 = vrot.lane.b32.xlu0 %v6949_v8, %s5999_s9 }
 0xb75   : > { %3180 = vmax.xlane.f32.xlu1 %v3179_v22 }
 0xb86   : > { %2966 = vrot.lane.b32.xlu1 %v6923_v28, %s5999_s9 }
 0xb8a   : > { %2988 = vrot.lane.b32.xlu1 %v6892_v53, %s5999_s9 }
 0xbc6   : > { %v3566_v16 = vpop.xlane.xlu0 %3565 }
 0xbc7   : > { %v3574_v14 = vsub.f32 %v7000_v60, %v3566_v16 }
 0xbc9   : > { %v3589_v43 = vmul.f32 1.442695, %v3574_v14 }
 0xbca   : > { %v3563_v54 = vpop.xlane.xlu0 %3562 }
 0xbcb   : > { %5767 = vpow2.f32 %v3589_v43  ;;  %v3573_v36 = vsub.f32 %v7006_v45, %v3563_v54 }
 0xbcd   : > { %v3587_v61 = vmul.f32 1.442695, %v3573_v36 }
 0xbce   : > { %v3560_v55 = vpop.xlane.xlu0 %3559 }
 0xbcf   : > { %v3572_v47 = vsub.f32 %v7012_v2, %v3560_v55 }
 0xbd1   : > { %v3585_v46 = vmul.f32 1.442695, %v3572_v47 }
 0xbd2   : > { %v3557_v13 = vpop.xlane.xlu0 %3556 }
 0xbd3   : > { %v3571_v32 = vsub.f32 %v7018_v1, %v3557_v13 }
 0xbd5   : > { %v3583_v35 = vmul.f32 1.442695, %v3571_v32 }
 0xbd6   : > { %v3554_v62 = vpop.xlane.xlu0 %3553 }
 0xbd7   : > { %v3570_v45 = vsub.f32 %v7026_v44, %v3554_v62 }
 0xbd8   : > { %v7095_v57 = vpop.eup %5767 }
 0xbd9   : > { %v3612_v20 = vsel %vm452_vm1, %v7095_v57, 0.0 }
 0xbda   : > { %3613 = vadd.xlane.f32.xlu1 %v3612_v20  ;;  %v3551_v10 = vpop.xlane.xlu0 %3550 }
 0xbdb   : > { %v3569_v1 = vsub.f32 %v7034_v41, %v3551_v10 }
 0xbdd   : > { %v3579_v44 = vmul.f32 1.442695, %v3569_v1 }
 0xbde   : > { %v3548_v26 = vpop.xlane.xlu0 %3547 }
 0xbdf   : > { %v3568_v34 = vsub.f32 %v7040_v15, %v3548_v26 }
 0xbe2   : > { %v3202_v28 = vpop.xlane.xlu1 %3201 }
 0xbe3   : > { %v3210_v30 = vsub.f32 %v3178_v3, %v3202_v28  ;;  %v3581_v3 = vmul.f32 1.442695, %v3570_v45 }
 0xbe5   : > { %v3225_v60 = vmul.f32 1.442695, %v3210_v30 }
 0xbe6   : > { %v3199_v33 = vpop.xlane.xlu1 %3198 }
 0xbe7   : > { %5769 = vpow2.f32 %v3225_v60  ;;  %v3209_v56 = vsub.f32 %v3177_v63, %v3199_v33 }
 0xbe8   : > { %5771 = vpow2.f32 %v3587_v61 }
 0xbe9   : > { %5773 = vpow2.f32 %v3585_v46  ;;  %v3223_v23 = vmul.f32 1.442695, %v3209_v56 }
 0xbea   : > { %v3196_v42 = vpop.xlane.xlu1 %3195 }
 0xbeb   : > { %v3208_v9 = vsub.f32 %v3176_v59, %v3196_v42  ;;  %v3545_v59 = vpop.xlane.xlu0 %3544 }
 0xbec   : > { %v3567_v6 = vsub.f32 %v7046_v58, %v3545_v59 }
 0xbed   : > { %v3221_v24 = vmul.f32 1.442695, %v3208_v9 }
 0xbee   : > { %v3193_v21 = vpop.xlane.xlu1 %3192  ;;  %v3575_v54 = vmul.f32 1.442695, %v3567_v6 }
 0xbef   : > { %5775 = vpow2.f32 %v3221_v24  ;;  %v3207_v2 = vsub.f32 %v3175_v5, %v3193_v21  ;;  %v2969_v1 = vpop.permute.xlu0 %2968 }
 0xbf0   : > { %5777 = vpow2.f32 %v3583_v35 }
 0xbf1   : > { %5779 = vpow2.f32 %v3223_v23  ;;  %v3219_v51 = vmul.f32 1.442695, %v3207_v2 }
 0xbf2   : > { %v3190_v18 = vpop.xlane.xlu1 %3189  ;;  %5781 = vpow2.f32 %v3581_v3 }
 0xbf3   : > { %v3206_v17 = vsub.f32 %v7064_v37, %v3190_v18  ;;  %5783 = vpow2.f32 %v3219_v51  ;;  %v3577_v37 = vmul.f32 1.442695, %v3568_v34 }
 0xbf4   : > { %v7105_v63 = vpop.eup %5769  ;;  %5785 = vpow2.f32 %v3579_v44  ;;  %v2987_v44 = vpop.permute.xlu0 %2986 }
 0xbf5   : > { %v3217_v7 = vmul.f32 1.442695, %v3206_v17  ;;  %v3248_v5 = vsel %vm452_vm1, %v7105_v63, 0.0  ;;  %v7110_v49 = vpop.eup %5771  ;;  %v2977_v17 = vadd.f32 %v2969_v1, %v6892_v53 }
 0xbf6   : > { %v3187_v41 = vpop.xlane.xlu1 %3186  ;;  %3249 = vadd.xlane.f32.xlu0 %v3248_v5  ;;  %v3609_v15 = vsel %vm452_vm1, %v7110_v49, 0.0  ;;  %v7116_v22 = vpop.eup %5773 }
 0xbf7   : > { %v3205_v27 = vsub.f32 %v7070_v12, %v3187_v41  ;;  %5787 = vpow2.f32 %v3217_v7  ;;  %v3606_v20 = vsel %vm452_vm1, %v7116_v22, 0.0  ;;  %v3830_v41 = vld [vmem:[#allocation2 + $0x50] sm:$0xff] }
 0xbf8   : > { %5789 = vpow2.f32 %v3577_v37  ;;  %v3815_v37 = vld [vmem:[#allocation2 + $0x10] sm:$0xff] }
 0xbf9   : > { %v3215_v11 = vmul.f32 1.442695, %v3205_v27  ;;  %v3829_v27 = vld [vmem:[#allocation2 + $0x38] sm:$0xff] }
 0xbfa   : > { %v3184_v16 = vpop.xlane.xlu1 %3183  ;;  %3610 = vadd.xlane.f32.xlu0 %v3609_v15 }
 0xbfb   : > { %v3204_v14 = vsub.f32 %v7076_v29, %v3184_v16  ;;  %5791 = vpow2.f32 %v3215_v11 }
 0xbfc   : > { %v7119_v43 = vpop.eup %5775  ;;  %5793 = vpow2.f32 %v3575_v54 }
 0xbfd   : > { %v7121_v12 = vpop.eup %5777  ;;  %v3213_v55 = vmul.f32 1.442695, %v3204_v14  ;;  %v3242_v58 = vsel %vm452_vm1, %v7119_v43, 0.0 }
 0xbfe   : > { %v7127_v13 = vpop.eup %5779  ;;  %v3181_v36 = vpop.xlane.xlu1 %3180  ;;  %3243 = vadd.xlane.f32.xlu1 %v3242_v58  ;;  %3607 = vadd.xlane.f32.xlu0 %v3606_v20  ;;  %v3603_v61 = vsel %vm452_vm1, %v7121_v12, 0.0 }
 0xbff   : > { %v3203_v29 = vsub.f32 %v7084_v39, %v3181_v36  ;;  %v7130_v28 = vpop.eup %5781  ;;  %5795 = vpow2.f32 %v3213_v55  ;;  %v3245_v30 = vsel %vm452_vm1, %v7127_v13, 0.0 }
 0xc00   : > { %v7136_v47 = vpop.eup %5783  ;;  %v3600_v33 = vsel %vm452_vm1, %v7130_v28, 0.0 }
 0xc01   : > { %v3211_v62 = vmul.f32 1.442695, %v3203_v29  ;;  %v7138_v60 = vpop.eup %5785  ;;  %v3239_v39 = vsel %vm452_vm1, %v7136_v47, 0.0 }
 0xc02   : > { %3246 = vadd.xlane.f32.xlu1 %v3245_v30  ;;  %3604 = vadd.xlane.f32.xlu0 %v3603_v61  ;;  %v3597_v56 = vsel %vm452_vm1, %v7138_v60, 0.0  ;;  %v2967_v3 = vpop.permute.xlu1 %2966 }
 0xc03   : > { %5797 = vpow2.f32 %v3211_v62  ;;  %v2976_v51 = vadd.f32 %v2967_v3, %v6949_v8  ;;  %v3816_v8 = vld [vmem:[#allocation2 + $0x28] sm:$0xff] }
 0xc04   : > { %v7144_v32 = vpop.eup %5787 }
 0xc05   : > { %v7146_v46 = vpop.eup %5789  ;;  %v3236_v10 = vsel %vm452_vm1, %v7144_v32, 0.0  ;;  %v2996_v34 = vadd.f32 %v2987_v44, %v2976_v51 }
 0xc06   : > { %3240 = vadd.xlane.f32.xlu1 %v3239_v39  ;;  %3601 = vadd.xlane.f32.xlu0 %v3600_v33  ;;  %v3594_v45 = vsel %vm452_vm1, %v7146_v46, 0.0  ;;  %v2989_v18 = vpop.permute.xlu1 %2988 }
 0xc07   : > { %v2997_v59 = vadd.f32 %v2989_v18, %v2977_v17  ;;  %v3000_v7 = vmul.f32 0.33333334, %v2996_v34 }
 0xc08   : > { %v7152_v42 = vpop.eup %5791 }
 0xc09   : > { %v7154_v9 = vpop.eup %5793  ;;  %v3233_v35 = vsel %vm452_vm1, %v7152_v42, 0.0  ;;  %v3001_v5 = vmul.f32 0.33333334, %v2997_v59  ;;  %v3818_v59 = vld [vmem:[#allocation2 + $0x58] sm:$0xff] }
 0xc0a   : > { %3237 = vadd.xlane.f32.xlu1 %v3236_v10  ;;  %3598 = vadd.xlane.f32.xlu0 %v3597_v56  ;;  %v3591_v21 = vsel %vm452_vm1, %v7154_v9, 0.0 }
 0xc0c   : > { %v7160_v23 = vpop.eup %5795 }
 0xc0d   : > { %v3230_v24 = vsel %vm452_vm1, %v7160_v23, 0.0 }
 0xc0e   : > { %3234 = vadd.xlane.f32.xlu1 %v3233_v35  ;;  %3595 = vadd.xlane.f32.xlu0 %v3594_v45 }
 0xc10   : > { %v7166_v26 = vpop.eup %5797 }
 0xc11   : > { %v3227_v2 = vsel %vm452_vm1, %v7166_v26, 0.0 }
 0xc12   : > { %3231 = vadd.xlane.f32.xlu1 %v3230_v24  ;;  %3592 = vadd.xlane.f32.xlu0 %v3591_v21 }
 0xc16   : > { %3228 = vadd.xlane.f32.xlu1 %v3227_v2 }
 0xc27   : > { %3268 = vrot.lane.b32.xlu1 %v3000_v7, %s5999_s9  ;;  %v3822_v7 = vld [vmem:[#allocation2 + $0x48] sm:$0xff] }
 0xc28   : > { %3632 = vrot.lane.b32.xlu0 %v3001_v5, %s5999_s9  ;;  %v3826_v5 = vadd.f32 %v3822_v7, %v3818_v59 }
 0xc2b   : > { %3839 = vrot.lane.b32.xlu1 %v3830_v41, %s5999_s9 }
 0xc2c   : > { %3837 = vrot.lane.b32.xlu0 %v3829_v27, %s5999_s9 }
 0xc4a   : > { %3857 = vxpose.xlu0.b32.start.end [1/1] (short) (narrow) %v3815_v37, 64 }
 0xc54   : > { %4211 = vxpose.xlu1.b32.start.end [1/1] (short) (narrow) %v3816_v8, 64 }
 0xc63   : > { %v3614_v53 = vpop.xlane.xlu1 %3613 }
 0xc64   : > { %5799 = vrcp.f32 %v3614_v53 }
 0xc71   : > { %v5800_v6 = vpop.eup %5799 }
 0xc72   : > { %v3630_v11 = vmul.f32 %v5800_v6, %v7095_v57 }
 0xc74   : > { %5417 = vmatpush3.xpose.msk.msra.mxu1 %vm452_vm1, %v3630_v11 }
 0xc75   : > { %5418 = vmatprep.subr.mxu1 %v5998_v0 }
 0xc7f   : > { %v3250_v15 = vpop.xlane.xlu0 %3249 }
 0xc80   : > { %5801 = vrcp.f32 %v3250_v15 }
 0xc83   : > { %v3611_v16 = vpop.xlane.xlu0 %3610 }
 0xc84   : > { %5803 = vrcp.f32 %v3611_v16 }
 0xc87   : > { %v3244_v14 = vpop.xlane.xlu1 %3243  ;;  %v3608_v54 = vpop.xlane.xlu0 %3607 }
 0xc88   : > { %5805 = vrcp.f32 %v3608_v54 }
 0xc8b   : > { %v3247_v55 = vpop.xlane.xlu1 %3246  ;;  %v3605_v58 = vpop.xlane.xlu0 %3604 }
 0xc8c   : > { %5807 = vrcp.f32 %v3247_v55 }
 0xc8d   : > { %v5802_v20 = vpop.eup %5801  ;;  %5809 = vrcp.f32 %v3605_v58 }
 0xc8e   : > { %5811 = vrcp.f32 %v3244_v14  ;;  %v3266_v36 = vmul.f32 %v5802_v20, %v7105_v63 }
 0xc8f   : > { %v3241_v57 = vpop.xlane.xlu1 %3240  ;;  %v3602_v29 = vpop.xlane.xlu0 %3601 }
 0xc90   : > { %5384 = vmatpush3.xpose.msk.msra.mxu0 %vm452_vm1, %v3266_v36  ;;  %5813 = vrcp.f32 %v3602_v29 }
 0xc91   : > { %v5804_v62 = vpop.eup %5803  ;;  %5385 = vmatprep.subr.mxu0 %v5998_v0  ;;  %5815 = vrcp.f32 %v3241_v57 }
 0xc92   : > { %v3629_v30 = vmul.f32 %v5804_v62, %v7110_v49  ;;  %v3817_v62 = vld [vmem:[#allocation2 + $0x40] sm:$0xff] }
 0xc93   : > { %v3238_v61 = vpop.xlane.xlu1 %3237  ;;  %v3599_v39 = vpop.xlane.xlu0 %3598 }
 0xc94   : > { %5419 = vmatpush3.xpose.msk.msra.mxu1 %vm452_vm1, %v3629_v30  ;;  %5817 = vrcp.f32 %v3599_v39  ;;  %v3821_v30 = vld [vmem:[#allocation2 + $0x30] sm:$0xff] }
 0xc95   : > { %5420 = vmatprep.subr.mxu1 %v5998_v0  ;;  %v5806_v33 = vpop.eup %5805  ;;  %5819 = vrcp.f32 %v3238_v61 }
 0xc96   : > { %v3628_v56 = vmul.f32 %v5806_v33, %v7116_v22  ;;  %v3825_v33 = vadd.f32 %v3821_v30, %v3817_v62 }
 0xc97   : > { %v3235_v63 = vpop.xlane.xlu1 %3234  ;;  %v3596_v10 = vpop.xlane.xlu0 %3595 }
 0xc98   : > { %5821 = vrcp.f32 %v3596_v10  ;;  %5421 = vmatpush3.xpose.msk.msra.mxu1 %vm452_vm1, %v3628_v56 }
 0xc99   : > { %v5808_v35 = vpop.eup %5807  ;;  %5823 = vrcp.f32 %v3235_v63  ;;  %5422 = vmatprep.subr.mxu1 %v5998_v0 }
 0xc9a   : > { %v5810_v45 = vpop.eup %5809  ;;  %v3265_v49 = vmul.f32 %v5808_v35, %v7127_v13 }
 0xc9b   : > { %v5812_v24 = vpop.eup %5811  ;;  %v3232_v21 = vpop.xlane.xlu1 %3231  ;;  %v3627_v3 = vmul.f32 %v5810_v45, %v7121_v12 }
 0xc9c   : > { %v3593_v2 = vpop.xlane.xlu0 %3592  ;;  %5386 = vmatpush3.xpose.msk.msra.mxu0 %vm452_vm1, %v3265_v49  ;;  %v3264_v1 = vmul.f32 %v5812_v24, %v7119_v43 }
 0xc9d   : > { %5825 = vrcp.f32 %v3593_v2  ;;  %5423 = vmatpush3.xpose.msk.msra.mxu1 %vm452_vm1, %v3627_v3  ;;  %5387 = vmatprep.subr.mxu0 %v5998_v0  ;;  %v5814_v22 = vpop.eup %5813 }
 0xc9e   : > { %5827 = vrcp.f32 %v3232_v21  ;;  %5424 = vmatprep.subr.mxu1 %v5998_v0  ;;  %v5816_v51 = vpop.eup %5815  ;;  %v3626_v18 = vmul.f32 %v5814_v22, %v7130_v28 }
 0xc9f   : > { %v3229_v13 = vpop.xlane.xlu1 %3228  ;;  %v3263_v17 = vmul.f32 %v5816_v51, %v7136_v47 }
 0xca0   : > { %5388 = vmatpush3.xpose.msk.msra.mxu0 %vm452_vm1, %v3264_v1  ;;  %5829 = vrcp.f32 %v3229_v13  ;;  %v3633_v16 = vpop.permute.xlu0 %3632 }
 0xca1   : > { %5425 = vmatpush3.xpose.msk.msra.mxu1 %vm452_vm1, %v3626_v18  ;;  %5389 = vmatprep.subr.mxu0 %v5998_v0  ;;  %v5818_v12 = vpop.eup %5817 }
 0xca2   : > { %5426 = vmatprep.subr.mxu1 %v5998_v0  ;;  %v5820_v44 = vpop.eup %5819  ;;  %v3625_v43 = vmul.f32 %v5818_v12, %v7138_v60 }
 0xca3   : > { %v3269_v34 = vpop.permute.xlu1 %3268  ;;  %v3262_v41 = vmul.f32 %v5820_v44, %v7144_v32 }
 0xca4   : > { %5390 = vmatpush3.xpose.msk.msra.mxu0 %vm452_vm1, %v3263_v17  ;;  %v3838_v20 = vpop.permute.xlu0 %3837 }
 0xca5   : > { %5427 = vmatpush3.xpose.msk.msra.mxu1 %vm452_vm1, %v3625_v43  ;;  %5391 = vmatprep.subr.mxu0 %v5998_v0  ;;  %v5822_v28 = vpop.eup %5821  ;;  %v3849_v10 = vadd.f32 %v3838_v20, %v3825_v33 }
 0xca6   : > { %5428 = vmatprep.subr.mxu1 %v5998_v0  ;;  %v5824_v27 = vpop.eup %5823  ;;  %v3624_v37 = vmul.f32 %v5822_v28, %v7146_v46 }
 0xca7   : > { %v3840_v47 = vpop.permute.xlu1 %3839  ;;  %v3261_v6 = vmul.f32 %v5824_v27, %v7152_v42  ;;  %v3853_v45 = vmul.f32 0.33333334, %v3849_v10 }
 0xca8   : > { %v3850_v8 = vadd.f32 %v3840_v47, %v3826_v5  ;;  %5392 = vmatpush3.xpose.msk.msra.mxu0 %vm452_vm1, %v3262_v41 }
 0xca9   : > { %5429 = vmatpush3.xpose.msk.msra.mxu1 %vm452_vm1, %v3624_v37  ;;  %5393 = vmatprep.subr.mxu0 %v5998_v0 }
 0xcaa   : > { %v5826_v60 = vpop.eup %5825  ;;  %v3854_v53 = vmul.f32 0.33333334, %v3850_v8  ;;  %5430 = vmatprep.subr.mxu1 %v5998_v0 }
 0xcab   : > { %v5828_v11 = vpop.eup %5827  ;;  %v3623_v32 = vmul.f32 %v5826_v60, %v7154_v9 }
 0xcac   : > { %5394 = vmatpush3.xpose.msk.msra.mxu0 %vm452_vm1, %v3261_v6  ;;  %v3260_v46 = vmul.f32 %v5828_v11, %v7160_v23  ;;  %v6001_v11 = vmov 0  }
 0xcad   : > { %5431 = vmatpush3.xpose.msk.msra.mxu1 %vm452_vm1, %v3623_v32  ;;  %5395 = vmatprep.subr.mxu0 %v5998_v0  ;;  %v5830_v15 = vpop.eup %5829 }
 0xcae   : > { %5475 = vmatprep.subr.mxu1 %v3854_v53  ;;  %v3259_v42 = vmul.f32 %v5830_v15, %v7166_v26  ;;  %5574 = vset.pattern.permute.xlu0 %v6001_v11 }
 0xcaf   : > { %5573 = vset.pattern.permute.xlu1 %v6001_v11 }
 0xcb0   : > { %5433 = vmatmul.mubr.msk.f32.vlgmr.msra.gmra.mxu1 %vm452_vm1, %v3633_v16  ;;  %5396 = vmatpush3.xpose.msk.msra.mxu0 %vm452_vm1, %v3260_v46 }
 0xcb1   : > { %5476 = vmatpush3.msra.mxu1 %v3854_v53  ;;  %5397 = vmatprep.subr.mxu0 %v5998_v0 }
 0xcb2   : > { %5489 = vmatprep.subr.mxu1 %v5998_v0 }
 0xcb4   : > { %5398 = vmatpush3.xpose.msk.msra.mxu0 %vm452_vm1, %v3259_v42 }
 0xcb7   : > { %5400 = vmatmul.mubr.msk.f32.vlgmr.msra.gmra.mxu0 %vm452_vm1, %v3269_v34 }
 0xcb8   : > { %5439 = vmatprep.mubr.msk.f32.mxu0 %vm235_vm0, %v6965_v19 }
 0xcc6   : > { %v3873_v36 = vpop.trf.xlu0 }
 0xcca   : > { %v3874_v57 = vpop.trf.xlu0 }
 0xcce   : > { %v3875_v29 = vpop.trf.xlu0 }
 0xcd0   : > { %v4227_v9 = vpop.trf.xlu1 }
 0xcd1   : > { %5477 = vmatprep.mubr.msk.f32.mxu1 %vm507_vm2, %v4227_v9 }
 0xcd2   : > { %v3876_v61 = vpop.trf.xlu0 }
 0xcd4   : > { %v4228_v23 = vpop.trf.xlu1 }
 0xcd5   : > { %5478 = vmatmul.mubr.msk.f32.vlgmr.msra.gmra.mxu1 %vm507_vm2, %v4228_v23 }
 0xcd6   : > { %v3877_v56 = vpop.trf.xlu0 }
 0xcd8   : > { %v4229_v14 = vpop.trf.xlu1 }
 0xcd9   : > { %5480 = vmatprep.mubr.msk.f32.mxu1 %vm507_vm2, %v4229_v14 }
 0xcda   : > { %v3878_v24 = vpop.trf.xlu0 }
 0xcdc   : > { %v4230_v54 = vpop.trf.xlu1 }
 0xcdd   : > { %5481 = vmatmul.mubr.msk.f32.gmra.mxu1 %vm507_vm2, %v4230_v54 }
 0xcde   : > { %v3879_v21 = vpop.trf.xlu0 }
 0xce0   : > { %v4231_v26 = vpop.trf.xlu1 }
 0xce1   : > { %5483 = vmatprep.mubr.msk.f32.mxu1 %vm507_vm2, %v4231_v26 }
 0xce4   : > { %v4232_v55 = vpop.trf.xlu1 }
 0xce5   : > { %5484 = vmatmul.mubr.msk.f32.gmra.mxu1 %vm507_vm2, %v4232_v55 }
 0xce8   : > { %v4233_v58 = vpop.trf.xlu1 }
 0xce9   : > { %5486 = vmatprep.mubr.msk.f32.mxu1 %vm507_vm2, %v4233_v58 }
 0xcec   : > { %v4234_v19 = vpop.trf.xlu1 }
 0xced   : > { %5487 = vmatmul.mubr.msk.f32.gmra.mxu1 %vm507_vm2, %v4234_v19 }
 0xcee   : > { %5505 = vmatprep.mubr.msk.f32.mxu1 %vm6000_vm4, %v5998_v0 }
 0xd70   : > { %v3726_v39 = vpop.f32.mrf.mxu1 }
 0xd71   : > { %5435 = vmatprep.subr.mxu0 %v3726_v39 }
 0xd72   : > { %v5434_v63 = vpop.f32.mrf.mxu1  ;;  %5436 = vmatpush3.msra.mxu0 %v3726_v39 }
 0xd77   : > { %v3362_v35 = vpop.f32.mrf.mxu0 }
 0xd78   : > { %5437 = vmatprep.subr.mxu0 %v3362_v35 }
 0xd79   : > { %v5401_v49 = vpop.f32.mrf.mxu0  ;;  %5438 = vmatpush3.msra.mxu0 %v3362_v35 }
 0xd7a   : > { %5440 = vmatmul.mubr.msk.f32.vlgmr.msra.gmra.mxu0 %vm235_vm0, %v6983_v50  ;;  %5442 = vmatprep.subr.mxu0 %v3853_v45  ;;  %v3880_v50 = vpop.trf.xlu0 }
 0xd7b   : > { %5443 = vmatpush3.msra.mxu0 %v3853_v45  ;;  %5444 = vmatprep.mubr.msk.f32.mxu0 %vm507_vm2, %v3873_v36 }
 0xd7c   : > { %5456 = vmatprep.subr.mxu0 %v5998_v0 }
 0xd7e   : > { %5445 = vmatmul.mubr.msk.f32.vlgmr.msra.gmra.mxu0 %vm507_vm2, %v3874_v57 }
 0xd7f   : > { %5447 = vmatprep.mubr.msk.f32.mxu0 %vm507_vm2, %v3875_v29 }
 0xd82   : > { %5448 = vmatmul.mubr.msk.f32.gmra.mxu0 %vm507_vm2, %v3876_v61 }
 0xd83   : > { %5450 = vmatprep.mubr.msk.f32.mxu0 %vm507_vm2, %v3877_v56 }
 0xd86   : > { %5451 = vmatmul.mubr.msk.f32.gmra.mxu0 %vm507_vm2, %v3878_v24 }
 0xd87   : > { %5453 = vmatprep.mubr.msk.f32.mxu0 %vm507_vm2, %v3879_v21 }
 0xd8a   : > { %5454 = vmatmul.mubr.msk.f32.gmra.mxu0 %vm507_vm2, %v3880_v50 }
 0xd8b   : > { %5472 = vmatprep.mubr.msk.f32.mxu0 %vm6000_vm4, %v5998_v0 }
 0xd95   : > { %v5479_v2 = vpop.f32.mrf.mxu1 }
 0xd96   : > { %v4373_v8 = vsel %vm228_vm3, %v5479_v2, -1e+30 }
 0xd97   : > { %v4333_v3 = vpop.f32.mrf.mxu1  ;;  %v4383_v60 = vsel %vm452_vm1, %v4373_v8, -inf }
 0xd98   : > { %v7273_v53 = vsel %vm228_vm3, %v4333_v3, -1e+30 }
 0xd99   : > { %v4380_v6 = vsel %vm452_vm1, %v7273_v53, -inf }
 0xd9d   : > { %v5482_v22 = vpop.f32.mrf.mxu1 }
 0xd9e   : > { %v4375_v41 = vsel %vm228_vm3, %v5482_v22, -1e+30 }
 0xd9f   : > { %v4343_v1 = vpop.f32.mrf.mxu1  ;;  %v4389_v27 = vsel %vm452_vm1, %v4375_v41, -inf }
 0xda0   : > { %v4374_v47 = vsel %vm228_vm3, %v4343_v1, -1e+30 }
 0xda1   : > { %v4386_v37 = vsel %vm452_vm1, %v4374_v47, -inf }
 0xda5   : > { %v5485_v51 = vpop.f32.mrf.mxu1 }
 0xda6   : > { %v4377_v59 = vsel %vm228_vm3, %v5485_v51, -1e+30 }
 0xda7   : > { %v4353_v13 = vpop.f32.mrf.mxu1  ;;  %v4395_v7 = vsel %vm452_vm1, %v4377_v59, -inf }
 0xda8   : > { %v4376_v28 = vsel %vm228_vm3, %v4353_v13, -1e+30 }
 0xda9   : > { %v4392_v5 = vsel %vm452_vm1, %v4376_v28, -inf }
 0xdad   : > { %v5488_v18 = vpop.f32.mrf.mxu1 }
 0xdae   : > { %v4379_v12 = vsel %vm228_vm3, %v5488_v18, -1e+30 }
 0xdaf   : > { %v4401_v17 = vsel %vm452_vm1, %v4379_v12, -inf  ;;  %v4363_v44 = vpop.f32.mrf.mxu1 }
 0xdb0   : > { %4402 = vmax.xlane.f32.xlu0 %v4401_v17  ;;  %v4378_v34 = vsel %vm228_vm3, %v4363_v44, -1e+30 }
 0xdb1   : > { %v4398_v43 = vsel %vm452_vm1, %v4378_v34, -inf }
 0xdb4   : > { %4399 = vmax.xlane.f32.xlu0 %v4398_v43 }
 0xdb8   : > { %4396 = vmax.xlane.f32.xlu0 %v4395_v7 }
 0xdbc   : > { %4393 = vmax.xlane.f32.xlu0 %v4392_v5 }
 0xdc0   : > { %4390 = vmax.xlane.f32.xlu0 %v4389_v27 }
 0xdc4   : > { %4387 = vmax.xlane.f32.xlu0 %v4386_v37 }
 0xdc8   : > { %4384 = vmax.xlane.f32.xlu0 %v4383_v60 }
 0xdcc   : > { %4381 = vmax.xlane.f32.xlu0 %v4380_v6 }
 0xe39   : > { %v4403_v32 = vpop.xlane.xlu0 %4402 }
 0xe3a   : > { %v4411_v46 = vsub.f32 %v4379_v12, %v4403_v32  ;;  %v7277_v15 = vpop.f32.mrf.mxu0 }
 0xe3c   : > { %v4426_v16 = vmul.f32 1.442695, %v4411_v46  ;;  %v7279_v42 = vpop.f32.mrf.mxu0 }
 0xe3d   : > { %v4400_v9 = vpop.xlane.xlu0 %4399 }
 0xe3e   : > { %5831 = vpow2.f32 %v4426_v16  ;;  %v4410_v23 = vsub.f32 %v4378_v34, %v4400_v9  ;;  %v7281_v14 = vpop.f32.mrf.mxu0 }
 0xe3f   : > { %v7343_v16 = vsel %vm228_vm3, %v7281_v14, -1e+30 }
 0xe40   : > { %v4424_v54 = vmul.f32 1.442695, %v4410_v23  ;;  %v7283_v26 = vpop.f32.mrf.mxu0  ;;  %v4029_v23 = vsel %vm452_vm1, %v7343_v16, -inf }
 0xe41   : > { %v4397_v55 = vpop.xlane.xlu0 %4396 }
 0xe42   : > { %5833 = vpow2.f32 %v4424_v54  ;;  %v4409_v58 = vsub.f32 %v4377_v59, %v4397_v55  ;;  %v5449_v19 = vpop.f32.mrf.mxu0  ;;  %v7354_v55 = vsel %vm228_vm3, %v7283_v26, -1e+30 }
 0xe43   : > { %v7322_v37 = vsel %vm228_vm3, %v5449_v19, -1e+30  ;;  %v4026_v14 = vsel %vm452_vm1, %v7354_v55, -inf }
 0xe44   : > { %v4422_v20 = vmul.f32 1.442695, %v4409_v58  ;;  %v3989_v36 = vpop.f32.mrf.mxu0  ;;  %v4035_v60 = vsel %vm452_vm1, %v7322_v37, -inf }
 0xe45   : > { %v4394_v57 = vpop.xlane.xlu0 %4393  ;;  %v7332_v6 = vsel %vm228_vm3, %v3989_v36, -1e+30 }
 0xe46   : > { %5835 = vpow2.f32 %v4422_v20  ;;  %v4408_v29 = vsub.f32 %v4376_v28, %v4394_v57  ;;  %v5452_v62 = vpop.f32.mrf.mxu0  ;;  %v4032_v32 = vsel %vm452_vm1, %v7332_v6, -inf  ;;  %v3832_v20 = vld [vmem:[#allocation2 + $0x80] sm:$0xff] }
 0xe47   : > { %v4023_v13 = vsel %vm228_vm3, %v5452_v62, -1e+30 }
 0xe48   : > { %v4420_v30 = vmul.f32 1.442695, %v4408_v29  ;;  %v3999_v61 = vpop.f32.mrf.mxu0  ;;  %v4041_v44 = vsel %vm452_vm1, %v4023_v13, -inf }
 0xe49   : > { %v4391_v39 = vpop.xlane.xlu0 %4390  ;;  %v4022_v59 = vsel %vm228_vm3, %v3999_v61, -1e+30 }
 0xe4a   : > { %5837 = vpow2.f32 %v4420_v30  ;;  %v4407_v33 = vsub.f32 %v4375_v41, %v4391_v39  ;;  %v5455_v63 = vpop.f32.mrf.mxu0  ;;  %v4038_v41 = vsel %vm452_vm1, %v4022_v59, -inf }
 0xe4b   : > { %v7285_v10 = vpop.eup %5831  ;;  %v7289_v56 = vsel %vm228_vm3, %v5455_v63, -1e+30 }
 0xe4c   : > { %v4418_v35 = vmul.f32 1.442695, %v4407_v33  ;;  %v4047_v45 = vsel %vm452_vm1, %v7289_v56, -inf  ;;  %v4009_v49 = vpop.f32.mrf.mxu0  ;;  %v4449_v24 = vsel %vm452_vm1, %v7285_v10, 0.0 }
 0xe4d   : > { %v7297_v21 = vsel %vm228_vm3, %v4009_v49, -1e+30  ;;  %4048 = vmax.xlane.f32.xlu1 %v4047_v45  ;;  %4450 = vadd.xlane.f32.xlu0 %v4449_v24  ;;  %v4388_v50 = vpop.xlane.xlu0 %4387 }
 0xe4e   : > { %5839 = vpow2.f32 %v4418_v35  ;;  %v4406_v2 = vsub.f32 %v4374_v47, %v4388_v50  ;;  %v4044_v22 = vsel %vm452_vm1, %v7297_v21, -inf }
 0xe4f   : > { %v7299_v3 = vpop.eup %5833 }
 0xe50   : > { %v4416_v1 = vmul.f32 1.442695, %v4406_v2  ;;  %v4446_v51 = vsel %vm452_vm1, %v7299_v3, 0.0 }
 0xe51   : > { %4045 = vmax.xlane.f32.xlu1 %v4044_v22  ;;  %4447 = vadd.xlane.f32.xlu0 %v4446_v51  ;;  %v4385_v18 = vpop.xlane.xlu0 %4384 }
 0xe52   : > { %5841 = vpow2.f32 %v4416_v1  ;;  %v4405_v12 = vsub.f32 %v4373_v8, %v4385_v18 }
 0xe53   : > { %v7307_v17 = vpop.eup %5835 }
 0xe54   : > { %v4414_v34 = vmul.f32 1.442695, %v4405_v12  ;;  %v4443_v43 = vsel %vm452_vm1, %v7307_v17, 0.0 }
 0xe55   : > { %4042 = vmax.xlane.f32.xlu1 %v4041_v44  ;;  %4444 = vadd.xlane.f32.xlu0 %v4443_v43  ;;  %v4382_v7 = vpop.xlane.xlu0 %4381 }
 0xe56   : > { %5843 = vpow2.f32 %v4414_v34  ;;  %v4404_v28 = vsub.f32 %v7273_v53, %v4382_v7 }
 0xe57   : > { %v7315_v5 = vpop.eup %5837 }
 0xe58   : > { %v4412_v27 = vmul.f32 1.442695, %v4404_v28  ;;  %v4440_v47 = vsel %vm452_vm1, %v7315_v5, 0.0 }
 0xe59   : > { %4039 = vmax.xlane.f32.xlu1 %v4038_v41  ;;  %4441 = vadd.xlane.f32.xlu0 %v4440_v47 }
 0xe5a   : > { %5845 = vpow2.f32 %v4412_v27 }
 0xe5b   : > { %v7324_v8 = vpop.eup %5839 }
 0xe5c   : > { %v4437_v53 = vsel %vm452_vm1, %v7324_v8, 0.0 }
 0xe5d   : > { %4036 = vmax.xlane.f32.xlu1 %v4035_v60  ;;  %4438 = vadd.xlane.f32.xlu0 %v4437_v53 }
 0xe5f   : > { %v7334_v11 = vpop.eup %5841 }
 0xe60   : > { %v4434_v46 = vsel %vm452_vm1, %v7334_v11, 0.0 }
 0xe61   : > { %4033 = vmax.xlane.f32.xlu1 %v4032_v32  ;;  %4435 = vadd.xlane.f32.xlu0 %v4434_v46 }
 0xe63   : > { %v7345_v9 = vpop.eup %5843 }
 0xe64   : > { %v4431_v54 = vsel %vm452_vm1, %v7345_v9, 0.0 }
 0xe65   : > { %4030 = vmax.xlane.f32.xlu1 %v4029_v23  ;;  %4432 = vadd.xlane.f32.xlu0 %v4431_v54 }
 0xe67   : > { %v7356_v58 = vpop.eup %5845 }
 0xe68   : > { %v4428_v19 = vsel %vm452_vm1, %v7356_v58, 0.0 }
 0xe69   : > { %4027 = vmax.xlane.f32.xlu1 %v4026_v14  ;;  %4429 = vadd.xlane.f32.xlu0 %v4428_v19 }
 0xe7f   : > { %3843 = vrot.lane.b32.xlu0 %v3832_v20, %s5999_s9 }
 0xe83   : > { %1191 = vperm.xlu0 %5574, %v225_v48  }
 0xed6   : > { %v4049_v26 = vpop.xlane.xlu1 %4048  ;;  %v4451_v36 = vpop.xlane.xlu0 %4450 }
 0xed7   : > { %5847 = vrcp.f32 %v4451_v36  ;;  %v4057_v39 = vsub.f32 %v7289_v56, %v4049_v26  ;;  %v3820_v36 = vld [vmem:[#allocation2 + $0x88] sm:$0xff] }
 0xed9   : > { %v4072_v24 = vmul.f32 1.442695, %v4057_v39 }
 0xeda   : > { %v4046_v57 = vpop.xlane.xlu1 %4045  ;;  %v4448_v29 = vpop.xlane.xlu0 %4447 }
 0xedb   : > { %5849 = vrcp.f32 %v4448_v29  ;;  %v4056_v50 = vsub.f32 %v7297_v21, %v4046_v57  ;;  %v3824_v57 = vld [vmem:[#allocation2 + $0x78] sm:$0xff] }
 0xedc   : > { %v3828_v39 = vadd.f32 %v3824_v57, %v3820_v36 }
 0xede   : > { %v4043_v62 = vpop.xlane.xlu1 %4042  ;;  %v4445_v30 = vpop.xlane.xlu0 %4444 }
 0xedf   : > { %v4055_v61 = vsub.f32 %v4023_v13, %v4043_v62  ;;  %5851 = vrcp.f32 %v4445_v30  ;;  %v4070_v13 = vmul.f32 1.442695, %v4056_v50 }
 0xee1   : > { %v4068_v33 = vmul.f32 1.442695, %v4055_v61 }
 0xee2   : > { %v4040_v63 = vpop.xlane.xlu1 %4039  ;;  %v4442_v35 = vpop.xlane.xlu0 %4441 }
 0xee3   : > { %5853 = vpow2.f32 %v4068_v33  ;;  %v4054_v45 = vsub.f32 %v4022_v59, %v4040_v63 }
 0xee4   : > { %v5848_v49 = vpop.eup %5847  ;;  %5855 = vrcp.f32 %v4442_v35 }
 0xee5   : > { %v4066_v2 = vmul.f32 1.442695, %v4054_v45  ;;  %v4467_v22 = vmul.f32 %v5848_v49, %v7285_v10 }
 0xee6   : > { %v4037_v1 = vpop.xlane.xlu1 %4036  ;;  %v4439_v51 = vpop.xlane.xlu0 %4438 }
 0xee7   : > { %5857 = vpow2.f32 %v4066_v2  ;;  %5490 = vmatpush3.xpose.msk.msra.mxu1 %vm452_vm1, %v4467_v22  ;;  %v4053_v18 = vsub.f32 %v7322_v37, %v4037_v1  ;;  %v3831_v22 = vld [vmem:[#allocation2 + $0x68] sm:$0xff]  ;;  %v224_v1 = vld [vmem:[%s7559_s3] sm:$0xff] }
 0xee8   : > { %5859 = vrcp.f32 %v4439_v51  ;;  %5491 = vmatprep.subr.mxu1 %v5998_v0  ;;  %v5850_v56 = vpop.eup %5849 }
 0xee9   : > { %5861 = vpow2.f32 %v4072_v24  ;;  %v4466_v21 = vmul.f32 %v5850_v56, %v7299_v3  ;;  %v4064_v34 = vmul.f32 1.442695, %v4053_v18 }
 0xeea   : > { %v4034_v12 = vpop.xlane.xlu1 %4033  ;;  %v4436_v44 = vpop.xlane.xlu0 %4435 }
 0xeeb   : > { %5863 = vrcp.f32 %v4436_v44  ;;  %5492 = vmatpush3.xpose.msk.msra.mxu1 %vm452_vm1, %v4466_v21  ;;  %v4052_v43 = vsub.f32 %v7332_v6, %v4034_v12 }
 0xeec   : > { %v5852_v10 = vpop.eup %5851  ;;  %5865 = vpow2.f32 %v4070_v13  ;;  %5493 = vmatprep.subr.mxu1 %v5998_v0 }
 0xeed   : > { %v4465_v28 = vmul.f32 %v5852_v10, %v7307_v17  ;;  %v4062_v27 = vmul.f32 1.442695, %v4052_v43 }
 0xeee   : > { %v4031_v59 = vpop.xlane.xlu1 %4030  ;;  %v4433_v7 = vpop.xlane.xlu0 %4432 }
 0xeef   : > { %5867 = vrcp.f32 %v4433_v7  ;;  %5494 = vmatpush3.xpose.msk.msra.mxu1 %vm452_vm1, %v4465_v28  ;;  %v4051_v47 = vsub.f32 %v7343_v16, %v4031_v59 }
 0xef0   : > { %v7377_v41 = vpop.eup %5853  ;;  %5869 = vpow2.f32 %v4064_v34  ;;  %5495 = vmatprep.subr.mxu1 %v5998_v0 }
 0xef1   : > { %v5856_v3 = vpop.eup %5855  ;;  %v4089_v37 = vsel %vm452_vm1, %v7377_v41, 0.0  ;;  %v4060_v46 = vmul.f32 1.442695, %v4051_v47 }
 0xef2   : > { %4090 = vadd.xlane.f32.xlu1 %v4089_v37  ;;  %v4028_v60 = vpop.xlane.xlu1 %4027  ;;  %v4430_v53 = vpop.xlane.xlu0 %4429  ;;  %v4464_v17 = vmul.f32 %v5856_v3, %v7315_v5 }
 0xef3   : > { %5871 = vrcp.f32 %v4430_v53  ;;  %v4050_v16 = vsub.f32 %v7354_v55, %v4028_v60 }
 0xef4   : > { %v7385_v6 = vpop.eup %5857  ;;  %5496 = vmatpush3.xpose.msk.msra.mxu1 %vm452_vm1, %v4464_v17  ;;  %5873 = vpow2.f32 %v4062_v27 }
 0xef5   : > { %v5860_v32 = vpop.eup %5859  ;;  %v4086_v23 = vsel %vm452_vm1, %v7385_v6, 0.0  ;;  %5497 = vmatprep.subr.mxu1 %v5998_v0  ;;  %5875 = vpow2.f32 %v4060_v46  ;;  %v4058_v19 = vmul.f32 1.442695, %v4050_v16  ;;  %v3819_v16 = vld [vmem:[#allocation2 + $0x70] sm:$0xff] }
 0xef6   : > { %v7392_v54 = vpop.eup %5861  ;;  %4087 = vadd.xlane.f32.xlu1 %v4086_v23  ;;  %v4463_v5 = vmul.f32 %v5860_v32, %v7324_v8  ;;  %v3844_v48 = vpop.permute.xlu0 %3843  ;;  %v3823_v23 = vld [vmem:[#allocation2 + $0x60] sm:$0xff] }
 0xef7   : > { %v4095_v20 = vsel %vm452_vm1, %v7392_v54, 0.0  ;;  %5877 = vpow2.f32 %v4058_v19  ;;  %v3852_v35 = vadd.f32 %v3844_v48, %v3828_v39 }
 0xef8   : > { %5498 = vmatpush3.xpose.msk.msra.mxu1 %vm452_vm1, %v4463_v5  ;;  %v5864_v14 = vpop.eup %5863 }
 0xef9   : > { %5499 = vmatprep.subr.mxu1 %v5998_v0  ;;  %v5866_v55 = vpop.eup %5865  ;;  %v4462_v26 = vmul.f32 %v5864_v14, %v7334_v11  ;;  %v3827_v14 = vadd.f32 %v3823_v23, %v3819_v16 }
 0xefa   : > { %4096 = vadd.xlane.f32.xlu1 %v4095_v20  ;;  %v4092_v29 = vsel %vm452_vm1, %v5866_v55, 0.0 }
 0xefc   : > { %5500 = vmatpush3.xpose.msk.msra.mxu1 %vm452_vm1, %v4462_v26  ;;  %v5868_v8 = vpop.eup %5867 }
 0xefd   : > { %5501 = vmatprep.subr.mxu1 %v5998_v0  ;;  %v7403_v62 = vpop.eup %5869  ;;  %v4461_v61 = vmul.f32 %v5868_v8, %v7345_v9  ;;  %v3856_v9 = vmul.f32 0.33333334, %v3852_v35 }
 0xefe   : > { %4093 = vadd.xlane.f32.xlu1 %v4092_v29  ;;  %v7405_v30 = vpop.permute.xlu0 %1191  ;;  %v4083_v45 = vsel %vm452_vm1, %v7403_v62, 0.0 }
 0xeff   : > { %v1272_v11 = vadd.f32 %v6498_v31, %v7405_v30  ;;  %v2943_v33 = vadd.f32 %v7022_v38, %v7405_v30 }
 0xf00   : > { %5502 = vmatpush3.xpose.msk.msra.mxu1 %vm452_vm1, %v4461_v61  ;;  %v5872_v63 = vpop.eup %5871  ;;  %v5900_v61 = vld [vmem:[%s7558_s2 + $0x8] sm:$0xff] }
 0xf01   : > { %5503 = vmatprep.subr.mxu1 %v5998_v0  ;;  %1276 = vst.msk [vmem:[%s7418_s29 + $0x18] sm:$0xff] %vm452_vm1, %v1272_v11  ;;  %2947 = vst.msk [vmem:[%s7418_s29 + $0x20] sm:$0xff] %vm452_vm1, %v2943_v33  ;;  %v7424_v31 = vpop.eup %5873  ;;  %v4460_v38 = vmul.f32 %v5872_v63, %v7356_v58 }
 0xf02   : > { %4084 = vadd.xlane.f32.xlu1 %v4083_v45  ;;  %v4080_v49 = vsel %vm452_vm1, %v7424_v31, 0.0  ;;  %v7430_v24 = vpop.eup %5875 }
 0xf03   : > { %v4077_v50 = vsel %vm452_vm1, %v7430_v24, 0.0 }
 0xf04   : > { %5504 = vmatpush3.xpose.msk.msra.mxu1 %vm452_vm1, %v4460_v38  ;;  %v7435_v2 = vpop.eup %5877 }
 0xf05   : > { %v4074_v58 = vsel %vm452_vm1, %v7435_v2, 0.0 }
 0xf06   : > { %4081 = vadd.xlane.f32.xlu1 %v4080_v49 }
 0xf07   : > { %5506 = vmatmul.mubr.msk.f32.vlgmr.msra.gmra.mxu1 %vm452_vm1, %v3856_v9 }
 0xf0a   : > { %4078 = vadd.xlane.f32.xlu1 %v4077_v50 }
 0xf0e   : > { %4075 = vadd.xlane.f32.xlu1 %v4074_v58 }
 0xf1f   : > { %3841 = vrot.lane.b32.xlu1 %v3831_v22, %s5999_s9 }
 0xf23   : > { %1186 = vperm.xlu1 %5573, %v224_v1  }
 0xf7b   : > { %v4091_v51 = vpop.xlane.xlu1 %4090 }
 0xf7f   : > { %v4088_v56 = vpop.xlane.xlu1 %4087 }
 0xf83   : > { %v4097_v13 = vpop.xlane.xlu1 %4096 }
 0xf84   : > { %5879 = vrcp.f32 %v4097_v13 }
 0xf87   : > { %v4094_v18 = vpop.xlane.xlu1 %4093 }
 0xf88   : > { %5881 = vrcp.f32 %v4094_v18 }
 0xf89   : > { %5883 = vrcp.f32 %v4091_v51 }
 0xf8a   : > { %5885 = vrcp.f32 %v4088_v56 }
 0xf8b   : > { %v4085_v12 = vpop.xlane.xlu1 %4084 }
 0xf8c   : > { %5887 = vrcp.f32 %v4085_v12 }
 0xf8f   : > { %v4082_v44 = vpop.xlane.xlu1 %4081 }
 0xf90   : > { %5889 = vrcp.f32 %v4082_v44 }
 0xf91   : > { %v5880_v21 = vpop.eup %5879 }
 0xf92   : > { %v4113_v10 = vmul.f32 %v5880_v21, %v7392_v54  ;;  %v3802_v54 = vadd.f32 %v7277_v15, %v7405_v30 }
 0xf93   : > { %v4079_v34 = vpop.xlane.xlu1 %4078 }
 0xf94   : > { %5457 = vmatpush3.xpose.msk.msra.mxu0 %vm452_vm1, %v4113_v10  ;;  %5891 = vrcp.f32 %v4079_v34 }
 0xf95   : > { %v5882_v43 = vpop.eup %5881  ;;  %5458 = vmatprep.subr.mxu0 %v5998_v0 }
 0xf96   : > { %v4112_v59 = vmul.f32 %v5882_v43, %v5866_v55  ;;  %v5884_v7 = vpop.eup %5883  ;;  %v5899_v55 = vld [vmem:[%s7558_s2] sm:$0xff] }
 0xf97   : > { %v4076_v28 = vpop.xlane.xlu1 %4075  ;;  %v4111_v3 = vmul.f32 %v5884_v7, %v7377_v41  ;;  %v5886_v27 = vpop.eup %5885 }
 0xf98   : > { %5459 = vmatpush3.xpose.msk.msra.mxu0 %vm452_vm1, %v4112_v59  ;;  %5893 = vrcp.f32 %v4076_v28  ;;  %v4110_v37 = vmul.f32 %v5886_v27, %v7385_v6 }
 0xf99   : > { %5460 = vmatprep.subr.mxu0 %v5998_v0  ;;  %v5888_v60 = vpop.eup %5887 }
 0xf9a   : > { %v4109_v6 = vmul.f32 %v5888_v60, %v7403_v62 }
 0xf9b   : > { %v3842_v47 = vpop.permute.xlu1 %3841 }
 0xf9c   : > { %5461 = vmatpush3.xpose.msk.msra.mxu0 %vm452_vm1, %v4111_v3  ;;  %v3851_v19 = vadd.f32 %v3842_v47, %v3827_v14 }
 0xf9d   : > { %5462 = vmatprep.subr.mxu0 %v5998_v0 }
 0xf9e   : > { %v3855_v15 = vmul.f32 0.33333334, %v3851_v19 }
 0xf9f   : > { %v7452_v53 = vpop.permute.xlu1 %1186 }
 0xfa0   : > { %v1267_v17 = vadd.f32 %v6502_v52, %v7452_v53  ;;  %v2938_v41 = vadd.f32 %v7028_v40, %v7452_v53  ;;  %5463 = vmatpush3.xpose.msk.msra.mxu0 %vm452_vm1, %v4110_v37  ;;  %v2106_v32 = vadd.f32 %v6765_v4, %v7452_v53  ;;  %v3797_v46 = vadd.f32 %v7279_v42, %v7452_v53  ;;  %v5890_v52 = vpop.eup %5889 }
 0xfa1   : > { %5464 = vmatprep.subr.mxu0 %v5998_v0  ;;  %v2111_v4 = vadd.f32 %v6763_v25, %v7405_v30  ;;  %v4108_v40 = vmul.f32 %v5890_v52, %v7424_v31  ;;  %v5892_v42 = vpop.eup %5891 }
 0xfa2   : > { %2116 = vrot.lane.b32.xlu1 %v2106_v32, %s5999_s9  ;;  %3807 = vrot.lane.b32.xlu0 %v3797_v46, %s5999_s9  ;;  %1275 = vst.msk [vmem:[%s7418_s29] sm:$0xff] %vm452_vm1, %v1267_v17  ;;  %2946 = vst.msk [vmem:[%s7418_s29 + $0x8] sm:$0xff] %vm452_vm1, %v2938_v41  ;;  %v4107_v25 = vmul.f32 %v5892_v42, %v7430_v24 }
 0xfa4   : > { %5465 = vmatpush3.xpose.msk.msra.mxu0 %vm452_vm1, %v4109_v6 }
 0xfa5   : > { %5466 = vmatprep.subr.mxu0 %v5998_v0  ;;  %v5894_v5 = vpop.eup %5893 }
 0xfa6   : > { %2118 = vrot.lane.b32.xlu1 %v2111_v4, %s5999_s9  ;;  %v4106_v20 = vmul.f32 %v5894_v5, %v7435_v2 }
 0xfa8   : > { %5467 = vmatpush3.xpose.msk.msra.mxu0 %vm452_vm1, %v4108_v40 }
 0xfa9   : > { %5468 = vmatprep.subr.mxu0 %v5998_v0 }
 0xfaa   : > { %3809 = vrot.lane.b32.xlu1 %v3802_v54, %s5999_s9 }
 0xfac   : > { %5469 = vmatpush3.xpose.msk.msra.mxu0 %vm452_vm1, %v4107_v25 }
 0xfad   : > { %5470 = vmatprep.subr.mxu0 %v5998_v0 }
 0xfb0   : > { %5471 = vmatpush3.xpose.msk.msra.mxu0 %vm452_vm1, %v4106_v20 }
 0xfb3   : > { %5473 = vmatmul.mubr.msk.f32.vlgmr.msra.gmra.mxu0 %vm452_vm1, %v3855_v15 }
 0xfb4   : > { %5512 = vmatprep.mubr.msk.f32.mxu0 %vm235_vm0, %v5899_v55 }
 0xfc7   : > { %v4561_v48 = vpop.f32.mrf.mxu1 }
 0xfc8   : > { %5508 = vmatprep.subr.mxu0 %v4561_v48 }
 0xfc9   : > { %v5507_v26 = vpop.f32.mrf.mxu1  ;;  %5509 = vmatpush3.msra.mxu0 %v4561_v48 }
0x1014   : > { %v2117_v0 = vpop.permute.xlu1 %2116  ;;  %v3808_v36 = vpop.permute.xlu0 %3807 }
0x1015   : > { %2123 = vst.msk [vmem:[%s7418_s29] sm:$0xff] %vm2122_vm5, %v2117_v0  ;;  %3813 = vst.msk [vmem:[%s7418_s29 + $0x8] sm:$0xff] %vm2122_vm5, %v3808_v36 }
0x1018   : > { %v2119_v57 = vpop.permute.xlu1 %2118 }
0x1019   : > { %2124 = vst.msk [vmem:[%s7418_s29 + $0x18] sm:$0xff] %vm2122_vm5, %v2119_v57 }
0x101c   : > { %v3810_v8 = vpop.permute.xlu1 %3809 }
0x101d   : > { %3814 = vst.msk [vmem:[%s7418_s29 + $0x20] sm:$0xff] %vm2122_vm5, %v3810_v8 }
0x1073   : > { %v4207_v29 = vpop.f32.mrf.mxu0 }
0x1074   : > { %5510 = vmatprep.subr.mxu0 %v4207_v29 }
0x1075   : > { %v5474_v62 = vpop.f32.mrf.mxu0  ;;  %5511 = vmatpush3.msra.mxu0 %v4207_v29 }
0x1076   : > { %5513 = vmatmul.mubr.msk.f32.vlgmr.msra.gmra.mxu0 %vm235_vm0, %v5900_v61 }
0x1136   : > { %v5514_v39 = vpop.f32.mrf.mxu0 }
0x1137   : > { %v4637_v11 = vadd.f32 %v5514_v39, %v7405_v30 }
0x1138   : > { %v4631_v33 = vpop.f32.mrf.mxu0 }
0x1139   : > { %4641 = vst.msk [vmem:[%s7418_s29 + $0x28] sm:$0xff] %vm452_vm1, %v4637_v11  ;;  %v4632_v63 = vadd.f32 %v4631_v33, %v7452_v53 }
0x113b   : > { %4640 = vst.msk [vmem:[%s7418_s29 + $0x10] sm:$0xff] %vm452_vm1, %v4632_v63 }
0x113c   : > { %5942 = shalt.err (!%p5939_p10)
}
0x113d   : > { %s5943_s29 = scalar_lea.hbm %s7506_s10, 768  ;;  %s5947_s5 = scalar_lea.hbm %s7560_s4, 1536 }
0x113e   : > { %p5944_p0 = scmp.ne.s32.totalorder %s7506_s10, %s5943_s29  ;;  %p5948_p1 = scmp.lt.s32.totalorder %s7506_s10, %s7560_s4 }
0x113f   : > { %p5949_p3 = scmp.lt.s32.totalorder %s5947_s5, %s5943_s29 }
0x1140   : > { %p5945_p2 = pnand %p5944_p0, %p7568_p12 }
0x1141   : > { %p5950_p6 = por %p5949_p3, %p5948_p1 }
0x1142   : > { %p5946_p9 = pneg %p5945_p2 }
0x1144   : > { %p5951_p11 = pnand %p5950_p6, %p5946_p9 }
0x1146   : > { %5954 = shalt.err (!%p5951_p11)
}
0x1147   : > { %s6003_s14 = smov 384   ;;  %s6004_s20 = smov 24  }
0x1148   : > { %5521 = dma.vmem_to_hbm [thread:$0]  (%p7568_p12), %s7508_s7, 768, %s7506_s10, %s4643_s19, %s6003_s14, %s6003_s14, %s6004_s20  }
0x1149 PF: > { %s4671_s8 = sand.u32 1, %s5981_s15   ;;  %p7569_p13 = scmp.ne.s32.totalorder %s7565_s27, 0 }
0x114a   : > { %p7570_p4 = scmp.ge.s32.totalorder %s5993_s18, 2  ;;  %s4672_s25 = scalar_lea.sflag [#allocation5], %s4671_s8 }
0x114c   : > { %p5528_p5 = pnand %p7570_p4, %p7569_p13 }
0x114e   : > { %p5529_p7 = pneg %p5528_p5 }
0x1150   : > { %5976 = dma.done.wait (%p5529_p7), %s4672_s25, 768  }
0x1151   : > { %5978 = vsyncadd (%p5529_p7), %s4672_s25, 4294966528  ;;  %p17_p8 = scmp.ge.s32.totalorder %s6055_s21, 4   ;;  %s7571_s15 = smov %s5985_s16 }
0x1152   : > { %s7572_s16 = smov %s5989_s17  ;;  %s7573_s17 = smov %s6067_s24 }
0x1153   : > { %s7574_s18 = smov %s6055_s21  ;;  %19 = sbr.rel (!%p17_p8) target bundleno = 5 (0x5), region = 81 }
0x1158   :  { %4677 = vsyncpa [#allocation4], 1 }
0x1159   :  { %4679 = vsyncpa [#allocation4 + $0x1], 1 }
0x115a   :  { %4680 = vsyncpa [#allocation5], 1 }
0x115b   :  { %4682 = vsyncpa [#allocation5 + $0x1], 1 }

</bundles_post_ra>
